<compile_context>
chip_gen: v5e
topology: v5e:2x2
jax: 0.10.0
libtpu: 0.0.40
codegen_flags: <defaults>
</compile_context>

<pallas_src>
import functools

import jax
import jax.numpy as jnp
from jax.experimental import pallas as pl
from jax.experimental.pallas import tpu as pltpu

_VMEM_LIMIT = 48 * 1024 * 1024   # < 64 MiB so the same tiling is safe on v7x
_TM_FFN = 256                    # fixed token tile for the FFN kernel
_TQ_CAP = 256                    # query-tile cap for attention


def _q_tile(sq):
    """Query-tile size: <= 256 and divides Sq; else the whole Sq (keys must
    never be padded, so we do not pad the sequence dim for attention)."""
    if sq <= _TQ_CAP:
        return sq
    for t in (256, 128, 64, 32, 16, 8):
        if sq % t == 0:
            return t
    return sq


def _layernorm_f32(y, g, b, eps=1e-5):
    mu = jnp.mean(y, axis=-1, keepdims=True)
    var = jnp.mean(jnp.square(y - mu), axis=-1, keepdims=True)
    return (y - mu) * jax.lax.rsqrt(var + eps) * g + b


def _softmax_rows_f32(s):
    s = s - jnp.max(s, axis=-1, keepdims=True)
    p = jnp.exp(s)
    return p * pl.reciprocal(jnp.sum(p, axis=-1, keepdims=True), approx=True)


# -----------------------------------------------------------------------------
# Fused self-attention residual block:
#   LN(x + OutProj(MHA(x Wq, x Wk, x Wv)))       -- one pallas_call
# -----------------------------------------------------------------------------
def _make_self_attn_kernel(nhead, scale, has_mask):
    def kernel(*refs):
        if has_mask:
            (xf_ref, xq_ref, wqkv_ref, bqkv_ref, wo_ref, bo_ref,
             g_ref, beta_ref, mask_ref, o_ref, k_scr, v_scr) = refs
        else:
            (xf_ref, xq_ref, wqkv_ref, bqkv_ref, wo_ref, bo_ref,
             g_ref, beta_ref, o_ref, k_scr, v_scr) = refs
            mask_ref = None

        E = xq_ref.shape[-1]
        Dh = E // nhead
        w_qkv = wqkv_ref[...]          # (E, 3E) bf16, VMEM-resident
        b_qkv = bqkv_ref[...]          # (1, 3E) f32

        # K/V projection over the full sequence: once per batch element.
        @pl.when(pl.program_id(1) == 0)
        def _():
            xf = xf_ref[0]                                        # (S, E)
            k = jnp.dot(xf, w_qkv[:, E:2 * E],
                        preferred_element_type=jnp.float32) + b_qkv[:, E:2 * E]
            v = jnp.dot(xf, w_qkv[:, 2 * E:],
                        preferred_element_type=jnp.float32) + b_qkv[:, 2 * E:]
            k_scr[...] = k.astype(k_scr.dtype)
            v_scr[...] = v.astype(v_scr.dtype)

        xq = xq_ref[0]                                            # (tq, E)
        q = (jnp.dot(xq, w_qkv[:, :E], preferred_element_type=jnp.float32)
             + b_qkv[:, :E]) * scale                              # pre-scaled q
        q = q.astype(k_scr.dtype)
        k = k_scr[...]
        v = v_scr[...]
        w_o = wo_ref[...]                                         # (E, E)
        mask = mask_ref[...] if has_mask else None

        # Per-head attention; each head folds directly into the output
        # projection, so no concatenate relayout and no per-head live slabs.
        acc = jnp.zeros((q.shape[0], E), jnp.float32)
        for h in range(nhead):
            sl = slice(h * Dh, (h + 1) * Dh)
            s = jax.lax.dot_general(q[:, sl], k[:, sl],
                                    (((1,), (1,)), ((), ())),
                                    preferred_element_type=jnp.float32)
            if has_mask:
                s = s + mask
            p = _softmax_rows_f32(s)
            oh = jnp.dot(p.astype(v.dtype), v[:, sl],
                         preferred_element_type=jnp.float32)
            acc = acc + jnp.dot(oh.astype(w_o.dtype), w_o[sl, :],
                                preferred_element_type=jnp.float32)

        y = acc + bo_ref[...] + xq.astype(jnp.float32)
        o_ref[0] = _layernorm_f32(y, g_ref[...], beta_ref[...]).astype(o_ref.dtype)
    return kernel


def self_attn_block(x, mask, w_qkv, b_qkv, w_out, b_out, g, beta, nhead):
    """x:(B,S,E) bf16; mask:(S,S) additive f32 or None -> (B,S,E) bf16."""
    B, S, E = x.shape
    tq = _q_tile(S)
    scale = float(E // nhead) ** -0.5
    kernel = _make_self_attn_kernel(nhead, scale, mask is not None)
    in_specs = [
        pl.BlockSpec((1, S, E), lambda b, qt: (b, 0, 0)),    # full seq (K/V src)
        pl.BlockSpec((1, tq, E), lambda b, qt: (b, qt, 0)),  # q tile / residual
        pl.BlockSpec((E, 3 * E), lambda b, qt: (0, 0)),      # VMEM-resident W
        pl.BlockSpec((1, 3 * E), lambda b, qt: (0, 0)),
        pl.BlockSpec((E, E), lambda b, qt: (0, 0)),
        pl.BlockSpec((1, E), lambda b, qt: (0, 0)),
        pl.BlockSpec((1, E), lambda b, qt: (0, 0)),
        pl.BlockSpec((1, E), lambda b, qt: (0, 0)),
    ]
    args = [x, x, w_qkv, b_qkv, w_out, b_out, g, beta]
    if mask is not None:
        in_specs.append(pl.BlockSpec((tq, S), lambda b, qt: (qt, 0)))
        args.append(mask)
    return pl.pallas_call(
        kernel,
        out_shape=jax.ShapeDtypeStruct((B, S, E), x.dtype),
        grid=(B, S // tq),
        in_specs=in_specs,
        out_specs=pl.BlockSpec((1, tq, E), lambda b, qt: (b, qt, 0)),
        scratch_shapes=[pltpu.VMEM((S, E), x.dtype),   # K scratch (persists over qt)
                        pltpu.VMEM((S, E), x.dtype)],  # V scratch
        compiler_params=pltpu.CompilerParams(
            dimension_semantics=("parallel", "arbitrary"),
            vmem_limit_bytes=_VMEM_LIMIT),
    )(*args)


# -----------------------------------------------------------------------------
# Fused cross-attention residual block:
#   LN(x + OutProj(MHA(x Wq, mem Wk, mem Wv)))   -- one pallas_call
# -----------------------------------------------------------------------------
def _make_cross_attn_kernel(nhead, scale, has_mask):
    def kernel(*refs):
        if has_mask:
            (mem_ref, xq_ref, wq_ref, bq_ref, wkv_ref, bkv_ref, wo_ref, bo_ref,
             g_ref, beta_ref, mask_ref, o_ref, k_scr, v_scr) = refs
        else:
            (mem_ref, xq_ref, wq_ref, bq_ref, wkv_ref, bkv_ref, wo_ref, bo_ref,
             g_ref, beta_ref, o_ref, k_scr, v_scr) = refs
            mask_ref = None

        E = xq_ref.shape[-1]
        Dh = E // nhead

        @pl.when(pl.program_id(1) == 0)
        def _():
            mem = mem_ref[0]                                      # (S, E)
            w_kv = wkv_ref[...]
            b_kv = bkv_ref[...]
            k = jnp.dot(mem, w_kv[:, :E],
                        preferred_element_type=jnp.float32) + b_kv[:, :E]
            v = jnp.dot(mem, w_kv[:, E:],
                        preferred_element_type=jnp.float32) + b_kv[:, E:]
            k_scr[...] = k.astype(k_scr.dtype)
            v_scr[...] = v.astype(v_scr.dtype)

        xq = xq_ref[0]                                            # (tq, E)
        q = (jnp.dot(xq, wq_ref[...], preferred_element_type=jnp.float32)
             + bq_ref[...]) * scale
        q = q.astype(k_scr.dtype)
        k = k_scr[...]
        v = v_scr[...]
        w_o = wo_ref[...]
        mask = mask_ref[...] if has_mask else None

        acc = jnp.zeros((q.shape[0], E), jnp.float32)
        for h in range(nhead):
            sl = slice(h * Dh, (h + 1) * Dh)
            s = jax.lax.dot_general(q[:, sl], k[:, sl],
                                    (((1,), (1,)), ((), ())),
                                    preferred_element_type=jnp.float32)
            if has_mask:
                s = s + mask
            p = _softmax_rows_f32(s)
            oh = jnp.dot(p.astype(v.dtype), v[:, sl],
                         preferred_element_type=jnp.float32)
            acc = acc + jnp.dot(oh.astype(w_o.dtype), w_o[sl, :],
                                preferred_element_type=jnp.float32)

        y = acc + bo_ref[...] + xq.astype(jnp.float32)
        o_ref[0] = _layernorm_f32(y, g_ref[...], beta_ref[...]).astype(o_ref.dtype)
    return kernel


def cross_attn_block(x, memory, mask, w_q, b_q, w_kv, b_kv, w_out, b_out,
                     g, beta, nhead):
    """x:(B,T,E), memory:(B,S,E) bf16; mask:(T,S) or None -> (B,T,E) bf16."""
    B, T, E = x.shape
    S = memory.shape[1]
    tq = _q_tile(T)
    scale = float(E // nhead) ** -0.5
    kernel = _make_cross_attn_kernel(nhead, scale, mask is not None)
    in_specs = [
        pl.BlockSpec((1, S, E), lambda b, qt: (b, 0, 0)),    # memory (K/V src)
        pl.BlockSpec((1, tq, E), lambda b, qt: (b, qt, 0)),  # q tile / residual
        pl.BlockSpec((E, E), lambda b, qt: (0, 0)),
        pl.BlockSpec((1, E), lambda b, qt: (0, 0)),
        pl.BlockSpec((E, 2 * E), lambda b, qt: (0, 0)),
        pl.BlockSpec((1, 2 * E), lambda b, qt: (0, 0)),
        pl.BlockSpec((E, E), lambda b, qt: (0, 0)),
        pl.BlockSpec((1, E), lambda b, qt: (0, 0)),
        pl.BlockSpec((1, E), lambda b, qt: (0, 0)),
        pl.BlockSpec((1, E), lambda b, qt: (0, 0)),
    ]
    args = [memory, x, w_q, b_q, w_kv, b_kv, w_out, b_out, g, beta]
    if mask is not None:
        in_specs.append(pl.BlockSpec((tq, S), lambda b, qt: (qt, 0)))
        args.append(mask)
    return pl.pallas_call(
        kernel,
        out_shape=jax.ShapeDtypeStruct((B, T, E), x.dtype),
        grid=(B, T // tq),
        in_specs=in_specs,
        out_specs=pl.BlockSpec((1, tq, E), lambda b, qt: (b, qt, 0)),
        scratch_shapes=[pltpu.VMEM((S, E), x.dtype),
                        pltpu.VMEM((S, E), x.dtype)],
        compiler_params=pltpu.CompilerParams(
            dimension_semantics=("parallel", "arbitrary"),
            vmem_limit_bytes=_VMEM_LIMIT),
    )(*args)


# -----------------------------------------------------------------------------
# Fused FFN residual block: LN(x + W2 relu(W1 x + b1) + b2)
# -----------------------------------------------------------------------------
def _ffn_add_ln_kernel(x_ref, w1_ref, b1_ref, w2_ref, b2_ref, g_ref, beta_ref,
                       o_ref):
    x = x_ref[...]                                               # (tm, E) bf16
    h = jnp.dot(x, w1_ref[...], preferred_element_type=jnp.float32) + b1_ref[...]
    h = jnp.maximum(h, 0.0)                                      # ReLU (f32)
    y = jnp.dot(h.astype(w2_ref.dtype), w2_ref[...],
                preferred_element_type=jnp.float32) + b2_ref[...]
    y = y + x.astype(jnp.float32)
    o_ref[...] = _layernorm_f32(y, g_ref[...], beta_ref[...]).astype(o_ref.dtype)


def ffn_add_ln(x, w1, b1, w2, b2, gamma, beta):
    """x:(M,E) bf16 -> (M,E) bf16. Fixed 256-row token tile, zero-padded M."""
    M, E = x.shape
    F = w1.shape[1]
    if M <= _TM_FFN:
        tm, Mp = M, M
    else:
        tm = _TM_FFN
        Mp = ((M + tm - 1) // tm) * tm
    xp = x if Mp == M else jnp.pad(x, ((0, Mp - M), (0, 0)))
    out = pl.pallas_call(
        _ffn_add_ln_kernel,
        out_shape=jax.ShapeDtypeStruct((Mp, E), x.dtype),
        grid=(Mp // tm,),
        in_specs=[
            pl.BlockSpec((tm, E), lambda i: (i, 0)),
            pl.BlockSpec((E, F), lambda i: (0, 0)),
            pl.BlockSpec((1, F), lambda i: (0, 0)),
            pl.BlockSpec((F, E), lambda i: (0, 0)),
            pl.BlockSpec((1, E), lambda i: (0, 0)),
            pl.BlockSpec((1, E), lambda i: (0, 0)),
            pl.BlockSpec((1, E), lambda i: (0, 0)),
        ],
        out_specs=pl.BlockSpec((tm, E), lambda i: (i, 0)),
        compiler_params=pltpu.CompilerParams(
            dimension_semantics=("parallel",),
            vmem_limit_bytes=_VMEM_LIMIT),
    )(xp, w1, b1, w2, b2, gamma, beta)
    return out if Mp == M else out[:M]


# -----------------------------------------------------------------------------
# Encoder / decoder layers (batch-first internal layout, bf16 activations)
# -----------------------------------------------------------------------------
def encoder_layer(x, src_mask, p, nhead):
    B, S, E = x.shape
    x = self_attn_block(x, src_mask, p["w_qkv"], p["b_qkv"], p["w_out"],
                        p["b_out"], p["ln1_g"], p["ln1_b"], nhead)
    x2d = ffn_add_ln(x.reshape(B * S, E), p["w1"], p["b1"], p["w2"], p["b2"],
                     p["ln2_g"], p["ln2_b"])
    return x2d.reshape(B, S, E)


def decoder_layer(x, memory, tgt_mask, memory_mask, p, nhead):
    B, T, E = x.shape
    x = self_attn_block(x, tgt_mask, p["sa_w_qkv"], p["sa_b_qkv"],
                        p["sa_w_out"], p["sa_b_out"], p["ln1_g"], p["ln1_b"],
                        nhead)
    x = cross_attn_block(x, memory, memory_mask, p["ca_w_q"], p["ca_b_q"],
                         p["ca_w_kv"], p["ca_b_kv"], p["ca_w_out"],
                         p["ca_b_out"], p["ln2_g"], p["ln2_b"], nhead)
    x2d = ffn_add_ln(x.reshape(B * T, E), p["w1"], p["b1"], p["w2"], p["b2"],
                     p["ln3_g"], p["ln3_b"])
    return x2d.reshape(B, T, E)


def detr_transformer(src, tgt, src_mask, tgt_mask, memory_mask, params, nhead):
    """src:(S,B,E) tgt:(T,B,E) -> (T,B,E). PyTorch nn.Transformer semantics.
    Masks are additive float masks, or None to skip the mask work entirely."""
    cdt = jnp.bfloat16                              # compute dtype (f32 accum)
    memory = jnp.transpose(src, (1, 0, 2)).astype(cdt)      # one transpose in
    for lp in params["encoder"]:
        memory = encoder_layer(memory, src_mask, lp, nhead)
    out = jnp.transpose(tgt, (1, 0, 2)).astype(cdt)
    for lp in params["decoder"]:
        out = decoder_layer(out, memory, tgt_mask, memory_mask, lp, nhead)
    return jnp.transpose(out, (1, 0, 2)).astype(src.dtype)  # one transpose out


# -----------------------------------------------------------------------------
# Deterministic parameter init (pre-packed, pre-transposed, bf16 weights)
# -----------------------------------------------------------------------------
def init_params(key, d_model, num_enc, num_dec, dim_ff, w_dtype=jnp.bfloat16):
    keys = iter(jax.random.split(key, 1024))
    E, F = d_model, dim_ff

    def w(shape):   # bf16 weights in "x @ W" orientation
        return (0.02 * jax.random.normal(next(keys), shape, jnp.float32)
                ).astype(w_dtype)

    def b(shape):   # f32 biases (added to f32 accumulators)
        return 0.02 * jax.random.normal(next(keys), shape, jnp.float32)

    ones = jnp.ones((1, E), jnp.float32)
    zeros = jnp.zeros((1, E), jnp.float32)

    def enc_p():
        return dict(
            w_qkv=w((E, 3 * E)), b_qkv=b((1, 3 * E)),
            w_out=w((E, E)), b_out=b((1, E)),
            w1=w((E, F)), b1=b((1, F)),
            w2=w((F, E)), b2=b((1, E)),
            ln1_g=ones, ln1_b=zeros,
            ln2_g=ones, ln2_b=zeros,
        )

    def dec_p():
        return dict(
            sa_w_qkv=w((E, 3 * E)), sa_b_qkv=b((1, 3 * E)),
            sa_w_out=w((E, E)), sa_b_out=b((1, E)),
            ca_w_q=w((E, E)), ca_b_q=b((1, E)),
            ca_w_kv=w((E, 2 * E)), ca_b_kv=b((1, 2 * E)),
            ca_w_out=w((E, E)), ca_b_out=b((1, E)),
            w1=w((E, F)), b1=b((1, F)),
            w2=w((F, E)), b2=b((1, E)),
            ln1_g=ones, ln1_b=zeros,
            ln2_g=ones, ln2_b=zeros,
            ln3_g=ones, ln3_b=zeros,
        )

    return dict(encoder=[enc_p() for _ in range(num_enc)],
                decoder=[dec_p() for _ in range(num_dec)])


# -----------------------------------------------------------------------------
if __name__ == "__main__":
    d_model = 32
    nhead = 4
    num_encoder_layers = 2
    num_decoder_layers = 2
    dim_feedforward = 64
    S, T, B = 8, 8, 2  # src seq, tgt seq, batch

    key = jax.random.PRNGKey(0)
    k_src, k_tgt, k_par = jax.random.split(key, 3)

    src = jax.random.normal(k_src, (S, B, d_model), jnp.float32)
    tgt = jax.random.normal(k_tgt, (T, B, d_model), jnp.float32)

    # PyTorch semantics: additive float masks. DETR's encoder/memory masks are
    # all-zero / absent, so we pass None and skip the mask load+add entirely;
    # the decoder self-attention mask is causal.
    src_mask = None
    memory_mask = None
    tgt_mask = jnp.where(jnp.triu(jnp.ones((T, T), jnp.float32), k=1) > 0,
                         -1e9, 0.0).astype(jnp.float32)

    params = init_params(k_par, d_model, num_encoder_layers,
                         num_decoder_layers, dim_feedforward)

    fwd = jax.jit(functools.partial(detr_transformer, nhead=nhead))
    out = fwd(src, tgt, src_mask, tgt_mask, memory_mask, params)
    out = jax.block_until_ready(out)

    assert out.shape == (T, B, d_model), out.shape
    assert bool(jnp.all(jnp.isfinite(out)))
    print("KERNEL_OK")
</pallas_src>

<mosaic_0001>
module attributes {stable_mosaic.version = 11 : i64} {
  func.func @_ffn_add_ln_kernel(%arg0: i32, %arg1: memref<16x32xbf16, #tpu.memory_space<vmem>>, %arg2: memref<32x64xbf16, #tpu.memory_space<vmem>>, %arg3: memref<1x64xf32, #tpu.memory_space<vmem>>, %arg4: memref<64x32xbf16, #tpu.memory_space<vmem>>, %arg5: memref<1x32xf32, #tpu.memory_space<vmem>>, %arg6: memref<1x32xf32, #tpu.memory_space<vmem>>, %arg7: memref<1x32xf32, #tpu.memory_space<vmem>>, %arg8: memref<16x32xbf16, #tpu.memory_space<vmem>>) attributes {dimension_semantics = [#tpu.dimension_semantics<parallel>], iteration_bounds = array<i64: 1>, scalar_prefetch = 0 : i64, scratch_operands = 0 : i64, tpu.core_type = #tpu.core_type<tc>, window_params = [{transform_indices = @transform_0, window_bounds = array<i64: 16, 32>}, {pipeline_mode = #tpu.pipeline_mode<synchronous>, transform_indices = @transform_1, window_bounds = array<i64: 32, 64>}, {pipeline_mode = #tpu.pipeline_mode<synchronous>, transform_indices = @transform_2, window_bounds = array<i64: 1, 64>}, {pipeline_mode = #tpu.pipeline_mode<synchronous>, transform_indices = @transform_3, window_bounds = array<i64: 64, 32>}, {pipeline_mode = #tpu.pipeline_mode<synchronous>, transform_indices = @transform_4, window_bounds = array<i64: 1, 32>}, {pipeline_mode = #tpu.pipeline_mode<synchronous>, transform_indices = @transform_5, window_bounds = array<i64: 1, 32>}, {pipeline_mode = #tpu.pipeline_mode<synchronous>, transform_indices = @transform_6, window_bounds = array<i64: 1, 32>}, {transform_indices = @transform_7, window_bounds = array<i64: 16, 32>}]} {
    %c0 = arith.constant 0 : index
    %c0_0 = arith.constant 0 : index
    %0 = vector.load %arg1[%c0, %c0_0] : memref<16x32xbf16, #tpu.memory_space<vmem>>, vector<16x32xbf16>
    %c0_1 = arith.constant 0 : index
    %c0_2 = arith.constant 0 : index
    %1 = vector.load %arg2[%c0_1, %c0_2] : memref<32x64xbf16, #tpu.memory_space<vmem>>, vector<32x64xbf16>
    %cst = arith.constant dense<0.000000e+00> : vector<16x64xf32>
    %2 = tpu.matmul %0, %1, %cst {dimension_numbers = #tpu.dot_dimension_numbers<[1], [0], [0], [1], [0, 0, 1, 1], [], []>} : vector<16x32xbf16>, vector<32x64xbf16>, vector<16x64xf32> -> vector<16x64xf32>
    %c0_3 = arith.constant 0 : index
    %c0_4 = arith.constant 0 : index
    %3 = vector.load %arg3[%c0_3, %c0_4] : memref<1x64xf32, #tpu.memory_space<vmem>>, vector<1x64xf32>
    %4 = vector.broadcast %3 : vector<1x64xf32> to vector<16x64xf32>
    %5 = arith.addf %2, %4 : vector<16x64xf32>
    %cst_5 = arith.constant 0.000000e+00 : f32
    %6 = vector.broadcast %cst_5 : f32 to vector<16x64xf32>
    %7 = arith.maximumf %5, %6 : vector<16x64xf32>
    %8 = arith.truncf %7 : vector<16x64xf32> to vector<16x64xbf16>
    %c0_6 = arith.constant 0 : index
    %c0_7 = arith.constant 0 : index
    %9 = vector.load %arg4[%c0_6, %c0_7] : memref<64x32xbf16, #tpu.memory_space<vmem>>, vector<64x32xbf16>
    %cst_8 = arith.constant dense<0.000000e+00> : vector<16x32xf32>
    %10 = tpu.matmul %8, %9, %cst_8 {dimension_numbers = #tpu.dot_dimension_numbers<[1], [0], [0], [1], [0, 0, 1, 1], [], []>} : vector<16x64xbf16>, vector<64x32xbf16>, vector<16x32xf32> -> vector<16x32xf32>
    %c0_9 = arith.constant 0 : index
    %c0_10 = arith.constant 0 : index
    %11 = vector.load %arg5[%c0_9, %c0_10] : memref<1x32xf32, #tpu.memory_space<vmem>>, vector<1x32xf32>
    %12 = vector.broadcast %11 : vector<1x32xf32> to vector<16x32xf32>
    %13 = arith.addf %10, %12 : vector<16x32xf32>
    %14 = arith.extf %0 : vector<16x32xbf16> to vector<16x32xf32>
    %15 = arith.addf %13, %14 : vector<16x32xf32>
    %c0_11 = arith.constant 0 : index
    %c0_12 = arith.constant 0 : index
    %16 = vector.load %arg6[%c0_11, %c0_12] : memref<1x32xf32, #tpu.memory_space<vmem>>, vector<1x32xf32>
    %c0_13 = arith.constant 0 : index
    %c0_14 = arith.constant 0 : index
    %17 = vector.load %arg7[%c0_13, %c0_14] : memref<1x32xf32, #tpu.memory_space<vmem>>, vector<1x32xf32>
    %cst_15 = arith.constant dense<0.000000e+00> : vector<16xf32>
    %18 = vector.multi_reduction <add>, %15, %cst_15 [1] : vector<16x32xf32> to vector<16xf32>
    %19 = vector.shape_cast %18 : vector<16xf32> to vector<16x1xf32>
    %cst_16 = arith.constant 3.200000e+01 : f32
    %20 = vector.broadcast %cst_16 : f32 to vector<16x1xf32>
    %21 = arith.divf %19, %20 : vector<16x1xf32>
    %22 = vector.broadcast %21 : vector<16x1xf32> to vector<16x32xf32>
    %23 = arith.subf %15, %22 : vector<16x32xf32>
    %24 = arith.mulf %23, %23 : vector<16x32xf32>
    %cst_17 = arith.constant dense<0.000000e+00> : vector<16xf32>
    %25 = vector.multi_reduction <add>, %24, %cst_17 [1] : vector<16x32xf32> to vector<16xf32>
    %26 = vector.shape_cast %25 : vector<16xf32> to vector<16x1xf32>
    %cst_18 = arith.constant 3.200000e+01 : f32
    %27 = vector.broadcast %cst_18 : f32 to vector<16x1xf32>
    %28 = arith.divf %26, %27 : vector<16x1xf32>
    %29 = vector.broadcast %21 : vector<16x1xf32> to vector<16x32xf32>
    %30 = arith.subf %15, %29 : vector<16x32xf32>
    %cst_19 = arith.constant 9.99999974E-6 : f32
    %31 = vector.broadcast %cst_19 : f32 to vector<16x1xf32>
    %32 = arith.addf %28, %31 : vector<16x1xf32>
    %33 = math.rsqrt %32 : vector<16x1xf32>
    %34 = vector.broadcast %33 : vector<16x1xf32> to vector<16x32xf32>
    %35 = arith.mulf %30, %34 : vector<16x32xf32>
    %36 = vector.broadcast %16 : vector<1x32xf32> to vector<16x32xf32>
    %37 = arith.mulf %35, %36 : vector<16x32xf32>
    %38 = vector.broadcast %17 : vector<1x32xf32> to vector<16x32xf32>
    %39 = arith.addf %37, %38 : vector<16x32xf32>
    %40 = arith.truncf %39 : vector<16x32xf32> to vector<16x32xbf16>
    %c0_20 = arith.constant 0 : index
    %c0_21 = arith.constant 0 : index
    %41 = vector.load %arg8[%c0_20, %c0_21] : memref<16x32xbf16, #tpu.memory_space<vmem>>, vector<16x32xbf16>
    tpu.vector_store %arg8[%c0_20, %c0_21], %40 {strides = array<i32>} : memref<16x32xbf16, #tpu.memory_space<vmem>>, vector<16x32xbf16>,
    return
  }
  func.func @transform_0(%arg0: i32) -> (i32, i32) {
    %c0_i32 = arith.constant 0 : i32
    %c0_i32_0 = arith.constant 0 : i32
    return %arg0, %c0_i32 : i32, i32
  }
  func.func @transform_1(%arg0: i32) -> (i32, i32) {
    %c0_i32 = arith.constant 0 : i32
    %c0_i32_0 = arith.constant 0 : i32
    %c0_i32_1 = arith.constant 0 : i32
    return %c0_i32, %c0_i32_0 : i32, i32
  }
  func.func @transform_2(%arg0: i32) -> (i32, i32) {
    %c0_i32 = arith.constant 0 : i32
    %c0_i32_0 = arith.constant 0 : i32
    %c0_i32_1 = arith.constant 0 : i32
    return %c0_i32, %c0_i32_0 : i32, i32
  }
  func.func @transform_3(%arg0: i32) -> (i32, i32) {
    %c0_i32 = arith.constant 0 : i32
    %c0_i32_0 = arith.constant 0 : i32
    %c0_i32_1 = arith.constant 0 : i32
    return %c0_i32, %c0_i32_0 : i32, i32
  }
  func.func @transform_4(%arg0: i32) -> (i32, i32) {
    %c0_i32 = arith.constant 0 : i32
    %c0_i32_0 = arith.constant 0 : i32
    %c0_i32_1 = arith.constant 0 : i32
    return %c0_i32, %c0_i32_0 : i32, i32
  }
  func.func @transform_5(%arg0: i32) -> (i32, i32) {
    %c0_i32 = arith.constant 0 : i32
    %c0_i32_0 = arith.constant 0 : i32
    %c0_i32_1 = arith.constant 0 : i32
    return %c0_i32, %c0_i32_0 : i32, i32
  }
  func.func @transform_6(%arg0: i32) -> (i32, i32) {
    %c0_i32 = arith.constant 0 : i32
    %c0_i32_0 = arith.constant 0 : i32
    %c0_i32_1 = arith.constant 0 : i32
    return %c0_i32, %c0_i32_0 : i32, i32
  }
  func.func @transform_7(%arg0: i32) -> (i32, i32) {
    %c0_i32 = arith.constant 0 : i32
    %c0_i32_0 = arith.constant 0 : i32
    return %arg0, %c0_i32 : i32, i32
  }
}

module attributes {stable_mosaic.version = 11 : i64} {
  func.func @_ffn_add_ln_kernel(%arg0: i32, %arg1: memref<16x32xbf16, #tpu.memory_space<vmem>>, %arg2: memref<32x64xbf16, #tpu.memory_space<vmem>>, %arg3: memref<1x64xf32, #tpu.memory_space<vmem>>, %arg4: memref<64x32xbf16, #tpu.memory_space<vmem>>, %arg5: memref<1x32xf32, #tpu.memory_space<vmem>>, %arg6: memref<1x32xf32, #tpu.memory_space<vmem>>, %arg7: memref<1x32xf32, #tpu.memory_space<vmem>>, %arg8: memref<16x32xbf16, #tpu.memory_space<vmem>>) attributes {dimension_semantics = [#tpu.dimension_semantics<parallel>], iteration_bounds = array<i64: 1>, scalar_prefetch = 0 : i64, scratch_operands = 0 : i64, tpu.core_type = #tpu.core_type<tc>, window_params = [{transform_indices = @transform_0, window_bounds = array<i64: 16, 32>}, {pipeline_mode = #tpu.pipeline_mode<synchronous>, transform_indices = @transform_1, window_bounds = array<i64: 32, 64>}, {pipeline_mode = #tpu.pipeline_mode<synchronous>, transform_indices = @transform_2, window_bounds = array<i64: 1, 64>}, {pipeline_mode = #tpu.pipeline_mode<synchronous>, transform_indices = @transform_3, window_bounds = array<i64: 64, 32>}, {pipeline_mode = #tpu.pipeline_mode<synchronous>, transform_indices = @transform_4, window_bounds = array<i64: 1, 32>}, {pipeline_mode = #tpu.pipeline_mode<synchronous>, transform_indices = @transform_5, window_bounds = array<i64: 1, 32>}, {pipeline_mode = #tpu.pipeline_mode<synchronous>, transform_indices = @transform_6, window_bounds = array<i64: 1, 32>}, {transform_indices = @transform_7, window_bounds = array<i64: 16, 32>}]} {
    %c0 = arith.constant 0 : index
    %c0_0 = arith.constant 0 : index
    %0 = vector.load %arg1[%c0, %c0_0] : memref<16x32xbf16, #tpu.memory_space<vmem>>, vector<16x32xbf16>
    %c0_1 = arith.constant 0 : index
    %c0_2 = arith.constant 0 : index
    %1 = vector.load %arg2[%c0_1, %c0_2] : memref<32x64xbf16, #tpu.memory_space<vmem>>, vector<32x64xbf16>
    %cst = arith.constant dense<0.000000e+00> : vector<16x64xf32>
    %2 = tpu.matmul %0, %1, %cst {dimension_numbers = #tpu.dot_dimension_numbers<[1], [0], [0], [1], [0, 0, 1, 1], [], []>} : vector<16x32xbf16>, vector<32x64xbf16>, vector<16x64xf32> -> vector<16x64xf32>
    %c0_3 = arith.constant 0 : index
    %c0_4 = arith.constant 0 : index
    %3 = vector.load %arg3[%c0_3, %c0_4] : memref<1x64xf32, #tpu.memory_space<vmem>>, vector<1x64xf32>
    %4 = vector.broadcast %3 : vector<1x64xf32> to vector<16x64xf32>
    %5 = arith.addf %2, %4 : vector<16x64xf32>
    %cst_5 = arith.constant 0.000000e+00 : f32
    %6 = vector.broadcast %cst_5 : f32 to vector<16x64xf32>
    %7 = arith.maximumf %5, %6 : vector<16x64xf32>
    %8 = arith.truncf %7 : vector<16x64xf32> to vector<16x64xbf16>
    %c0_6 = arith.constant 0 : index
    %c0_7 = arith.constant 0 : index
    %9 = vector.load %arg4[%c0_6, %c0_7] : memref<64x32xbf16, #tpu.memory_space<vmem>>, vector<64x32xbf16>
    %cst_8 = arith.constant dense<0.000000e+00> : vector<16x32xf32>
    %10 = tpu.matmul %8, %9, %cst_8 {dimension_numbers = #tpu.dot_dimension_numbers<[1], [0], [0], [1], [0, 0, 1, 1], [], []>} : vector<16x64xbf16>, vector<64x32xbf16>, vector<16x32xf32> -> vector<16x32xf32>
    %c0_9 = arith.constant 0 : index
    %c0_10 = arith.constant 0 : index
    %11 = vector.load %arg5[%c0_9, %c0_10] : memref<1x32xf32, #tpu.memory_space<vmem>>, vector<1x32xf32>
    %12 = vector.broadcast %11 : vector<1x32xf32> to vector<16x32xf32>
    %13 = arith.addf %10, %12 : vector<16x32xf32>
    %14 = arith.extf %0 : vector<16x32xbf16> to vector<16x32xf32>
    %15 = arith.addf %13, %14 : vector<16x32xf32>
    %c0_11 = arith.constant 0 : index
    %c0_12 = arith.constant 0 : index
    %16 = vector.load %arg6[%c0_11, %c0_12] : memref<1x32xf32, #tpu.memory_space<vmem>>, vector<1x32xf32>
    %c0_13 = arith.constant 0 : index
    %c0_14 = arith.constant 0 : index
    %17 = vector.load %arg7[%c0_13, %c0_14] : memref<1x32xf32, #tpu.memory_space<vmem>>, vector<1x32xf32>
    %cst_15 = arith.constant dense<0.000000e+00> : vector<16xf32>
    %18 = vector.multi_reduction <add>, %15, %cst_15 [1] : vector<16x32xf32> to vector<16xf32>
    %19 = vector.shape_cast %18 : vector<16xf32> to vector<16x1xf32>
    %cst_16 = arith.constant 3.200000e+01 : f32
    %20 = vector.broadcast %cst_16 : f32 to vector<16x1xf32>
    %21 = arith.divf %19, %20 : vector<16x1xf32>
    %22 = vector.broadcast %21 : vector<16x1xf32> to vector<16x32xf32>
    %23 = arith.subf %15, %22 : vector<16x32xf32>
    %24 = arith.mulf %23, %23 : vector<16x32xf32>
    %cst_17 = arith.constant dense<0.000000e+00> : vector<16xf32>
    %25 = vector.multi_reduction <add>, %24, %cst_17 [1] : vector<16x32xf32> to vector<16xf32>
    %26 = vector.shape_cast %25 : vector<16xf32> to vector<16x1xf32>
    %cst_18 = arith.constant 3.200000e+01 : f32
    %27 = vector.broadcast %cst_18 : f32 to vector<16x1xf32>
    %28 = arith.divf %26, %27 : vector<16x1xf32>
    %29 = vector.broadcast %21 : vector<16x1xf32> to vector<16x32xf32>
    %30 = arith.subf %15, %29 : vector<16x32xf32>
    %cst_19 = arith.constant 9.99999974E-6 : f32
    %31 = vector.broadcast %cst_19 : f32 to vector<16x1xf32>
    %32 = arith.addf %28, %31 : vector<16x1xf32>
    %33 = math.rsqrt %32 : vector<16x1xf32>
    %34 = vector.broadcast %33 : vector<16x1xf32> to vector<16x32xf32>
    %35 = arith.mulf %30, %34 : vector<16x32xf32>
    %36 = vector.broadcast %16 : vector<1x32xf32> to vector<16x32xf32>
    %37 = arith.mulf %35, %36 : vector<16x32xf32>
    %38 = vector.broadcast %17 : vector<1x32xf32> to vector<16x32xf32>
    %39 = arith.addf %37, %38 : vector<16x32xf32>
    %40 = arith.truncf %39 : vector<16x32xf32> to vector<16x32xbf16>
    %c0_20 = arith.constant 0 : index
    %c0_21 = arith.constant 0 : index
    %41 = vector.load %arg8[%c0_20, %c0_21] : memref<16x32xbf16, #tpu.memory_space<vmem>>, vector<16x32xbf16>
    tpu.vector_store %arg8[%c0_20, %c0_21], %40 {strides = array<i32>} : memref<16x32xbf16, #tpu.memory_space<vmem>>, vector<16x32xbf16>,
    return
  }
  func.func @transform_0(%arg0: i32) -> (i32, i32) {
    %c0_i32 = arith.constant 0 : i32
    %c0_i32_0 = arith.constant 0 : i32
    return %arg0, %c0_i32 : i32, i32
  }
  func.func @transform_1(%arg0: i32) -> (i32, i32) {
    %c0_i32 = arith.constant 0 : i32
    %c0_i32_0 = arith.constant 0 : i32
    %c0_i32_1 = arith.constant 0 : i32
    return %c0_i32, %c0_i32_0 : i32, i32
  }
  func.func @transform_2(%arg0: i32) -> (i32, i32) {
    %c0_i32 = arith.constant 0 : i32
    %c0_i32_0 = arith.constant 0 : i32
    %c0_i32_1 = arith.constant 0 : i32
    return %c0_i32, %c0_i32_0 : i32, i32
  }
  func.func @transform_3(%arg0: i32) -> (i32, i32) {
    %c0_i32 = arith.constant 0 : i32
    %c0_i32_0 = arith.constant 0 : i32
    %c0_i32_1 = arith.constant 0 : i32
    return %c0_i32, %c0_i32_0 : i32, i32
  }
  func.func @transform_4(%arg0: i32) -> (i32, i32) {
    %c0_i32 = arith.constant 0 : i32
    %c0_i32_0 = arith.constant 0 : i32
    %c0_i32_1 = arith.constant 0 : i32
    return %c0_i32, %c0_i32_0 : i32, i32
  }
  func.func @transform_5(%arg0: i32) -> (i32, i32) {
    %c0_i32 = arith.constant 0 : i32
    %c0_i32_0 = arith.constant 0 : i32
    %c0_i32_1 = arith.constant 0 : i32
    return %c0_i32, %c0_i32_0 : i32, i32
  }
  func.func @transform_6(%arg0: i32) -> (i32, i32) {
    %c0_i32 = arith.constant 0 : i32
    %c0_i32_0 = arith.constant 0 : i32
    %c0_i32_1 = arith.constant 0 : i32
    return %c0_i32, %c0_i32_0 : i32, i32
  }
  func.func @transform_7(%arg0: i32) -> (i32, i32) {
    %c0_i32 = arith.constant 0 : i32
    %c0_i32_0 = arith.constant 0 : i32
    return %arg0, %c0_i32 : i32, i32
  }
}

module attributes {stable_mosaic.version = 11 : i64} {
  func.func @kernel(%arg0: i32, %arg1: i32, %arg2: memref<1x8x32xbf16, #tpu.memory_space<vmem>>, %arg3: memref<1x8x32xbf16, #tpu.memory_space<vmem>>, %arg4: memref<32x96xbf16, #tpu.memory_space<vmem>>, %arg5: memref<1x96xf32, #tpu.memory_space<vmem>>, %arg6: memref<32x32xbf16, #tpu.memory_space<vmem>>, %arg7: memref<1x32xf32, #tpu.memory_space<vmem>>, %arg8: memref<1x32xf32, #tpu.memory_space<vmem>>, %arg9: memref<1x32xf32, #tpu.memory_space<vmem>>, %arg10: memref<1x8x32xbf16, #tpu.memory_space<vmem>>, %arg11: memref<8x32xbf16, #tpu.memory_space<vmem>>, %arg12: memref<8x32xbf16, #tpu.memory_space<vmem>>) attributes {dimension_semantics = [#tpu.dimension_semantics<parallel>, #tpu.dimension_semantics<arbitrary>], iteration_bounds = array<i64: 2, 1>, scalar_prefetch = 0 : i64, scratch_operands = 2 : i64, tpu.core_type = #tpu.core_type<tc>, window_params = [{transform_indices = @transform_0, window_bounds = array<i64: 1, 8, 32>}, {transform_indices = @transform_1, window_bounds = array<i64: 1, 8, 32>}, {pipeline_mode = #tpu.pipeline_mode<synchronous>, transform_indices = @transform_2, window_bounds = array<i64: 32, 96>}, {pipeline_mode = #tpu.pipeline_mode<synchronous>, transform_indices = @transform_3, window_bounds = array<i64: 1, 96>}, {pipeline_mode = #tpu.pipeline_mode<synchronous>, transform_indices = @transform_4, window_bounds = array<i64: 32, 32>}, {pipeline_mode = #tpu.pipeline_mode<synchronous>, transform_indices = @transform_5, window_bounds = array<i64: 1, 32>}, {pipeline_mode = #tpu.pipeline_mode<synchronous>, transform_indices = @transform_6, window_bounds = array<i64: 1, 32>}, {pipeline_mode = #tpu.pipeline_mode<synchronous>, transform_indices = @transform_7, window_bounds = array<i64: 1, 32>}, {transform_indices = @transform_8, window_bounds = array<i64: 1, 8, 32>}]} {
    %c0 = arith.constant 0 : index
    %c0_0 = arith.constant 0 : index
    %0 = vector.load %arg4[%c0, %c0_0] : memref<32x96xbf16, #tpu.memory_space<vmem>>, vector<32x96xbf16>
    %c0_1 = arith.constant 0 : index
    %c0_2 = arith.constant 0 : index
    %1 = vector.load %arg5[%c0_1, %c0_2] : memref<1x96xf32, #tpu.memory_space<vmem>>, vector<1x96xf32>
    %c0_i32 = arith.constant 0 : i32
    %2 = arith.cmpi eq, %arg1, %c0_i32 : i32
    %3 = arith.extui %2 : i1 to i32
    %c0_i32_3 = arith.constant 0 : i32
    %4 = arith.cmpi ne, %3, %c0_i32_3 : i32
    scf.if %4 {
      %c0_49 = arith.constant 0 : index
      %c0_50 = arith.constant 0 : index
      %c0_51 = arith.constant 0 : index
      %132 = vector.load %arg2[%c0_49, %c0_50, %c0_51] : memref<1x8x32xbf16, #tpu.memory_space<vmem>>, vector<1x8x32xbf16>
      %133 = vector.shape_cast %132 : vector<1x8x32xbf16> to vector<8x32xbf16>
      %134 = vector.extract_strided_slice %0 {offsets = [0, 32], sizes = [32, 32], strides = [1, 1]} : vector<32x96xbf16> to vector<32x32xbf16>
      %cst_52 = arith.constant dense<0.000000e+00> : vector<8x32xf32>
      %135 = tpu.matmul %133, %134, %cst_52 {dimension_numbers = #tpu.dot_dimension_numbers<[1], [0], [0], [1], [0, 0, 1, 1], [], []>} : vector<8x32xbf16>, vector<32x32xbf16>, vector<8x32xf32> -> vector<8x32xf32>
      %136 = vector.extract_strided_slice %1 {offsets = [0, 32], sizes = [1, 32], strides = [1, 1]} : vector<1x96xf32> to vector<1x32xf32>
      %137 = vector.broadcast %136 : vector<1x32xf32> to vector<8x32xf32>
      %138 = arith.addf %135, %137 : vector<8x32xf32>
      %139 = vector.extract_strided_slice %0 {offsets = [0, 64], sizes = [32, 32], strides = [1, 1]} : vector<32x96xbf16> to vector<32x32xbf16>
      %cst_53 = arith.constant dense<0.000000e+00> : vector<8x32xf32>
      %140 = tpu.matmul %133, %139, %cst_53 {dimension_numbers = #tpu.dot_dimension_numbers<[1], [0], [0], [1], [0, 0, 1, 1], [], []>} : vector<8x32xbf16>, vector<32x32xbf16>, vector<8x32xf32> -> vector<8x32xf32>
      %141 = vector.extract_strided_slice %1 {offsets = [0, 64], sizes = [1, 32], strides = [1, 1]} : vector<1x96xf32> to vector<1x32xf32>
      %142 = vector.broadcast %141 : vector<1x32xf32> to vector<8x32xf32>
      %143 = arith.addf %140, %142 : vector<8x32xf32>
      %144 = arith.truncf %138 : vector<8x32xf32> to vector<8x32xbf16>
      %c0_54 = arith.constant 0 : index
      %c0_55 = arith.constant 0 : index
      %145 = vector.load %arg11[%c0_54, %c0_55] : memref<8x32xbf16, #tpu.memory_space<vmem>>, vector<8x32xbf16>
      tpu.vector_store %arg11[%c0_54, %c0_55], %144 {strides = array<i32>} : memref<8x32xbf16, #tpu.memory_space<vmem>>, vector<8x32xbf16>,
      %146 = arith.truncf %143 : vector<8x32xf32> to vector<8x32xbf16>
      %c0_56 = arith.constant 0 : index
      %c0_57 = arith.constant 0 : index
      %147 = vector.load %arg12[%c0_56, %c0_57] : memref<8x32xbf16, #tpu.memory_space<vmem>>, vector<8x32xbf16>
      tpu.vector_store %arg12[%c0_56, %c0_57], %146 {strides = array<i32>} : memref<8x32xbf16, #tpu.memory_space<vmem>>, vector<8x32xbf16>,
    } else {
    }
    %c0_4 = arith.constant 0 : index
    %c0_5 = arith.constant 0 : index
    %c0_6 = arith.constant 0 : index
    %5 = vector.load %arg3[%c0_4, %c0_5, %c0_6] : memref<1x8x32xbf16, #tpu.memory_space<vmem>>, vector<1x8x32xbf16>
    %6 = vector.shape_cast %5 : vector<1x8x32xbf16> to vector<8x32xbf16>
    %7 = vector.extract_strided_slice %0 {offsets = [0, 0], sizes = [32, 32], strides = [1, 1]} : vector<32x96xbf16> to vector<32x32xbf16>
    %cst = arith.constant dense<0.000000e+00> : vector<8x32xf32>
    %8 = tpu.matmul %6, %7, %cst {dimension_numbers = #tpu.dot_dimension_numbers<[1], [0], [0], [1], [0, 0, 1, 1], [], []>} : vector<8x32xbf16>, vector<32x32xbf16>, vector<8x32xf32> -> vector<8x32xf32>
    %9 = vector.extract_strided_slice %1 {offsets = [0, 0], sizes = [1, 32], strides = [1, 1]} : vector<1x96xf32> to vector<1x32xf32>
    %10 = vector.broadcast %9 : vector<1x32xf32> to vector<8x32xf32>
    %11 = arith.addf %8, %10 : vector<8x32xf32>
    %cst_7 = arith.constant 0.353553385 : f32
    %12 = vector.broadcast %cst_7 : f32 to vector<8x32xf32>
    %13 = arith.mulf %11, %12 : vector<8x32xf32>
    %14 = arith.truncf %13 : vector<8x32xf32> to vector<8x32xbf16>
    %c0_8 = arith.constant 0 : index
    %c0_9 = arith.constant 0 : index
    %15 = vector.load %arg11[%c0_8, %c0_9] : memref<8x32xbf16, #tpu.memory_space<vmem>>, vector<8x32xbf16>
    %c0_10 = arith.constant 0 : index
    %c0_11 = arith.constant 0 : index
    %16 = vector.load %arg12[%c0_10, %c0_11] : memref<8x32xbf16, #tpu.memory_space<vmem>>, vector<8x32xbf16>
    %c0_12 = arith.constant 0 : index
    %c0_13 = arith.constant 0 : index
    %17 = vector.load %arg6[%c0_12, %c0_13] : memref<32x32xbf16, #tpu.memory_space<vmem>>, vector<32x32xbf16>
    %cst_14 = arith.constant 0.000000e+00 : f32
    %18 = vector.broadcast %cst_14 : f32 to vector<8x32xf32>
    %19 = vector.extract_strided_slice %14 {offsets = [0, 0], sizes = [8, 8], strides = [1, 1]} : vector<8x32xbf16> to vector<8x8xbf16>
    %20 = vector.extract_strided_slice %15 {offsets = [0, 0], sizes = [8, 8], strides = [1, 1]} : vector<8x32xbf16> to vector<8x8xbf16>
    %cst_15 = arith.constant dense<0.000000e+00> : vector<8x8xf32>
    %21 = tpu.matmul %19, %20, %cst_15 {dimension_numbers = #tpu.dot_dimension_numbers<[1], [1], [0], [0], [0, 0, 1, 0], [], []>} : vector<8x8xbf16>, vector<8x8xbf16>, vector<8x8xf32> -> vector<8x8xf32>
    %cst_16 = arith.constant dense<0xFF800000> : vector<8xf32>
    %22 = vector.multi_reduction <maximumf>, %21, %cst_16 [1] : vector<8x8xf32> to vector<8xf32>
    %23 = vector.shape_cast %22 : vector<8xf32> to vector<8x1xf32>
    %24 = vector.broadcast %23 : vector<8x1xf32> to vector<8x8xf32>
    %25 = arith.subf %21, %24 : vector<8x8xf32>
    %26 = math.exp %25 : vector<8x8xf32>
    %cst_17 = arith.constant dense<0.000000e+00> : vector<8xf32>
    %27 = vector.multi_reduction <add>, %26, %cst_17 [1] : vector<8x8xf32> to vector<8xf32>
    %28 = vector.shape_cast %27 : vector<8xf32> to vector<8x1xf32>
    %29 = tpu.reciprocal %28 {approx = true} : vector<8x1xf32> -> vector<8x1xf32>
    %30 = vector.broadcast %29 : vector<8x1xf32> to vector<8x8xf32>
    %31 = arith.mulf %26, %30 : vector<8x8xf32>
    %32 = arith.truncf %31 : vector<8x8xf32> to vector<8x8xbf16>
    %33 = vector.extract_strided_slice %16 {offsets = [0, 0], sizes = [8, 8], strides = [1, 1]} : vector<8x32xbf16> to vector<8x8xbf16>
    %cst_18 = arith.constant dense<0.000000e+00> : vector<8x8xf32>
    %34 = tpu.matmul %32, %33, %cst_18 {dimension_numbers = #tpu.dot_dimension_numbers<[1], [0], [0], [1], [0, 0, 1, 1], [], []>} : vector<8x8xbf16>, vector<8x8xbf16>, vector<8x8xf32> -> vector<8x8xf32>
    %35 = arith.truncf %34 : vector<8x8xf32> to vector<8x8xbf16>
    %36 = vector.extract_strided_slice %17 {offsets = [0, 0], sizes = [8, 32], strides = [1, 1]} : vector<32x32xbf16> to vector<8x32xbf16>
    %cst_19 = arith.constant dense<0.000000e+00> : vector<8x32xf32>
    %37 = tpu.matmul %35, %36, %cst_19 {dimension_numbers = #tpu.dot_dimension_numbers<[1], [0], [0], [1], [0, 0, 1, 1], [], []>} : vector<8x8xbf16>, vector<8x32xbf16>, vector<8x32xf32> -> vector<8x32xf32>
    %38 = arith.addf %18, %37 : vector<8x32xf32>
    %39 = vector.extract_strided_slice %14 {offsets = [0, 8], sizes = [8, 8], strides = [1, 1]} : vector<8x32xbf16> to vector<8x8xbf16>
    %40 = vector.extract_strided_slice %15 {offsets = [0, 8], sizes = [8, 8], strides = [1, 1]} : vector<8x32xbf16> to vector<8x8xbf16>
    %cst_20 = arith.constant dense<0.000000e+00> : vector<8x8xf32>
    %41 = tpu.matmul %39, %40, %cst_20 {dimension_numbers = #tpu.dot_dimension_numbers<[1], [1], [0], [0], [0, 0, 1, 0], [], []>} : vector<8x8xbf16>, vector<8x8xbf16>, vector<8x8xf32> -> vector<8x8xf32>
    %cst_21 = arith.constant dense<0xFF800000> : vector<8xf32>
    %42 = vector.multi_reduction <maximumf>, %41, %cst_21 [1] : vector<8x8xf32> to vector<8xf32>
    %43 = vector.shape_cast %42 : vector<8xf32> to vector<8x1xf32>
    %44 = vector.broadcast %43 : vector<8x1xf32> to vector<8x8xf32>
    %45 = arith.subf %41, %44 : vector<8x8xf32>
    %46 = math.exp %45 : vector<8x8xf32>
    %cst_22 = arith.constant dense<0.000000e+00> : vector<8xf32>
    %47 = vector.multi_reduction <add>, %46, %cst_22 [1] : vector<8x8xf32> to vector<8xf32>
    %48 = vector.shape_cast %47 : vector<8xf32> to vector<8x1xf32>
    %49 = tpu.reciprocal %48 {approx = true} : vector<8x1xf32> -> vector<8x1xf32>
    %50 = vector.broadcast %49 : vector<8x1xf32> to vector<8x8xf32>
    %51 = arith.mulf %46, %50 : vector<8x8xf32>
    %52 = arith.truncf %51 : vector<8x8xf32> to vector<8x8xbf16>
    %53 = vector.extract_strided_slice %16 {offsets = [0, 8], sizes = [8, 8], strides = [1, 1]} : vector<8x32xbf16> to vector<8x8xbf16>
    %cst_23 = arith.constant dense<0.000000e+00> : vector<8x8xf32>
    %54 = tpu.matmul %52, %53, %cst_23 {dimension_numbers = #tpu.dot_dimension_numbers<[1], [0], [0], [1], [0, 0, 1, 1], [], []>} : vector<8x8xbf16>, vector<8x8xbf16>, vector<8x8xf32> -> vector<8x8xf32>
    %55 = arith.truncf %54 : vector<8x8xf32> to vector<8x8xbf16>
    %56 = vector.extract_strided_slice %17 {offsets = [8, 0], sizes = [8, 32], strides = [1, 1]} : vector<32x32xbf16> to vector<8x32xbf16>
    %cst_24 = arith.constant dense<0.000000e+00> : vector<8x32xf32>
    %57 = tpu.matmul %55, %56, %cst_24 {dimension_numbers = #tpu.dot_dimension_numbers<[1], [0], [0], [1], [0, 0, 1, 1], [], []>} : vector<8x8xbf16>, vector<8x32xbf16>, vector<8x32xf32> -> vector<8x32xf32>
    %58 = arith.addf %38, %57 : vector<8x32xf32>
    %59 = vector.extract_strided_slice %14 {offsets = [0, 16], sizes = [8, 8], strides = [1, 1]} : vector<8x32xbf16> to vector<8x8xbf16>
    %60 = vector.extract_strided_slice %15 {offsets = [0, 16], sizes = [8, 8], strides = [1, 1]} : vector<8x32xbf16> to vector<8x8xbf16>
    %cst_25 = arith.constant dense<0.000000e+00> : vector<8x8xf32>
    %61 = tpu.matmul %59, %60, %cst_25 {dimension_numbers = #tpu.dot_dimension_numbers<[1], [1], [0], [0], [0, 0, 1, 0], [], []>} : vector<8x8xbf16>, vector<8x8xbf16>, vector<8x8xf32> -> vector<8x8xf32>
    %cst_26 = arith.constant dense<0xFF800000> : vector<8xf32>
    %62 = vector.multi_reduction <maximumf>, %61, %cst_26 [1] : vector<8x8xf32> to vector<8xf32>
    %63 = vector.shape_cast %62 : vector<8xf32> to vector<8x1xf32>
    %64 = vector.broadcast %63 : vector<8x1xf32> to vector<8x8xf32>
    %65 = arith.subf %61, %64 : vector<8x8xf32>
    %66 = math.exp %65 : vector<8x8xf32>
    %cst_27 = arith.constant dense<0.000000e+00> : vector<8xf32>
    %67 = vector.multi_reduction <add>, %66, %cst_27 [1] : vector<8x8xf32> to vector<8xf32>
    %68 = vector.shape_cast %67 : vector<8xf32> to vector<8x1xf32>
    %69 = tpu.reciprocal %68 {approx = true} : vector<8x1xf32> -> vector<8x1xf32>
    %70 = vector.broadcast %69 : vector<8x1xf32> to vector<8x8xf32>
    %71 = arith.mulf %66, %70 : vector<8x8xf32>
    %72 = arith.truncf %71 : vector<8x8xf32> to vector<8x8xbf16>
    %73 = vector.extract_strided_slice %16 {offsets = [0, 16], sizes = [8, 8], strides = [1, 1]} : vector<8x32xbf16> to vector<8x8xbf16>
    %cst_28 = arith.constant dense<0.000000e+00> : vector<8x8xf32>
    %74 = tpu.matmul %72, %73, %cst_28 {dimension_numbers = #tpu.dot_dimension_numbers<[1], [0], [0], [1], [0, 0, 1, 1], [], []>} : vector<8x8xbf16>, vector<8x8xbf16>, vector<8x8xf32> -> vector<8x8xf32>
    %75 = arith.truncf %74 : vector<8x8xf32> to vector<8x8xbf16>
    %76 = vector.extract_strided_slice %17 {offsets = [16, 0], sizes = [8, 32], strides = [1, 1]} : vector<32x32xbf16> to vector<8x32xbf16>
    %cst_29 = arith.constant dense<0.000000e+00> : vector<8x32xf32>
    %77 = tpu.matmul %75, %76, %cst_29 {dimension_numbers = #tpu.dot_dimension_numbers<[1], [0], [0], [1], [0, 0, 1, 1], [], []>} : vector<8x8xbf16>, vector<8x32xbf16>, vector<8x32xf32> -> vector<8x32xf32>
    %78 = arith.addf %58, %77 : vector<8x32xf32>
    %79 = vector.extract_strided_slice %14 {offsets = [0, 24], sizes = [8, 8], strides = [1, 1]} : vector<8x32xbf16> to vector<8x8xbf16>
    %80 = vector.extract_strided_slice %15 {offsets = [0, 24], sizes = [8, 8], strides = [1, 1]} : vector<8x32xbf16> to vector<8x8xbf16>
    %cst_30 = arith.constant dense<0.000000e+00> : vector<8x8xf32>
    %81 = tpu.matmul %79, %80, %cst_30 {dimension_numbers = #tpu.dot_dimension_numbers<[1], [1], [0], [0], [0, 0, 1, 0], [], []>} : vector<8x8xbf16>, vector<8x8xbf16>, vector<8x8xf32> -> vector<8x8xf32>
    %cst_31 = arith.constant dense<0xFF800000> : vector<8xf32>
    %82 = vector.multi_reduction <maximumf>, %81, %cst_31 [1] : vector<8x8xf32> to vector<8xf32>
    %83 = vector.shape_cast %82 : vector<8xf32> to vector<8x1xf32>
    %84 = vector.broadcast %83 : vector<8x1xf32> to vector<8x8xf32>
    %85 = arith.subf %81, %84 : vector<8x8xf32>
    %86 = math.exp %85 : vector<8x8xf32>
    %cst_32 = arith.constant dense<0.000000e+00> : vector<8xf32>
    %87 = vector.multi_reduction <add>, %86, %cst_32 [1] : vector<8x8xf32> to vector<8xf32>
    %88 = vector.shape_cast %87 : vector<8xf32> to vector<8x1xf32>
    %89 = tpu.reciprocal %88 {approx = true} : vector<8x1xf32> -> vector<8x1xf32>
    %90 = vector.broadcast %89 : vector<8x1xf32> to vector<8x8xf32>
    %91 = arith.mulf %86, %90 : vector<8x8xf32>
    %92 = arith.truncf %91 : vector<8x8xf32> to vector<8x8xbf16>
    %93 = vector.extract_strided_slice %16 {offsets = [0, 24], sizes = [8, 8], strides = [1, 1]} : vector<8x32xbf16> to vector<8x8xbf16>
    %cst_33 = arith.constant dense<0.000000e+00> : vector<8x8xf32>
    %94 = tpu.matmul %92, %93, %cst_33 {dimension_numbers = #tpu.dot_dimension_numbers<[1], [0], [0], [1], [0, 0, 1, 1], [], []>} : vector<8x8xbf16>, vector<8x8xbf16>, vector<8x8xf32> -> vector<8x8xf32>
    %95 = arith.truncf %94 : vector<8x8xf32> to vector<8x8xbf16>
    %96 = vector.extract_strided_slice %17 {offsets = [24, 0], sizes = [8, 32], strides = [1, 1]} : vector<32x32xbf16> to vector<8x32xbf16>
    %cst_34 = arith.constant dense<0.000000e+00> : vector<8x32xf32>
    %97 = tpu.matmul %95, %96, %cst_34 {dimension_numbers = #tpu.dot_dimension_numbers<[1], [0], [0], [1], [0, 0, 1, 1], [], []>} : vector<8x8xbf16>, vector<8x32xbf16>, vector<8x32xf32> -> vector<8x32xf32>
    %98 = arith.addf %78, %97 : vector<8x32xf32>
    %c0_35 = arith.constant 0 : index
    %c0_36 = arith.constant 0 : index
    %99 = vector.load %arg7[%c0_35, %c0_36] : memref<1x32xf32, #tpu.memory_space<vmem>>, vector<1x32xf32>
    %100 = vector.broadcast %99 : vector<1x32xf32> to vector<8x32xf32>
    %101 = arith.addf %98, %100 : vector<8x32xf32>
    %102 = arith.extf %6 : vector<8x32xbf16> to vector<8x32xf32>
    %103 = arith.addf %101, %102 : vector<8x32xf32>
    %c0_37 = arith.constant 0 : index
    %c0_38 = arith.constant 0 : index
    %104 = vector.load %arg8[%c0_37, %c0_38] : memref<1x32xf32, #tpu.memory_space<vmem>>, vector<1x32xf32>
    %c0_39 = arith.constant 0 : index
    %c0_40 = arith.constant 0 : index
    %105 = vector.load %arg9[%c0_39, %c0_40] : memref<1x32xf32, #tpu.memory_space<vmem>>, vector<1x32xf32>
    %cst_41 = arith.constant dense<0.000000e+00> : vector<8xf32>
    %106 = vector.multi_reduction <add>, %103, %cst_41 [1] : vector<8x32xf32> to vector<8xf32>
    %107 = vector.shape_cast %106 : vector<8xf32> to vector<8x1xf32>
    %cst_42 = arith.constant 3.200000e+01 : f32
    %108 = vector.broadcast %cst_42 : f32 to vector<8x1xf32>
    %109 = arith.divf %107, %108 : vector<8x1xf32>
    %110 = vector.broadcast %109 : vector<8x1xf32> to vector<8x32xf32>
    %111 = arith.subf %103, %110 : vector<8x32xf32>
    %112 = arith.mulf %111, %111 : vector<8x32xf32>
    %cst_43 = arith.constant dense<0.000000e+00> : vector<8xf32>
    %113 = vector.multi_reduction <add>, %112, %cst_43 [1] : vector<8x32xf32> to vector<8xf32>
    %114 = vector.shape_cast %113 : vector<8xf32> to vector<8x1xf32>
    %cst_44 = arith.constant 3.200000e+01 : f32
    %115 = vector.broadcast %cst_44 : f32 to vector<8x1xf32>
    %116 = arith.divf %114, %115 : vector<8x1xf32>
    %117 = vector.broadcast %109 : vector<8x1xf32> to vector<8x32xf32>
    %118 = arith.subf %103, %117 : vector<8x32xf32>
    %cst_45 = arith.constant 9.99999974E-6 : f32
    %119 = vector.broadcast %cst_45 : f32 to vector<8x1xf32>
    %120 = arith.addf %116, %119 : vector<8x1xf32>
    %121 = math.rsqrt %120 : vector<8x1xf32>
    %122 = vector.broadcast %121 : vector<8x1xf32> to vector<8x32xf32>
    %123 = arith.mulf %118, %122 : vector<8x32xf32>
    %124 = vector.broadcast %104 : vector<1x32xf32> to vector<8x32xf32>
    %125 = arith.mulf %123, %124 : vector<8x32xf32>
    %126 = vector.broadcast %105 : vector<1x32xf32> to vector<8x32xf32>
    %127 = arith.addf %125, %126 : vector<8x32xf32>
    %128 = arith.truncf %127 : vector<8x32xf32> to vector<8x32xbf16>
    %c0_46 = arith.constant 0 : index
    %c0_47 = arith.constant 0 : index
    %c0_48 = arith.constant 0 : index
    %129 = vector.load %arg10[%c0_46, %c0_47, %c0_48] : memref<1x8x32xbf16, #tpu.memory_space<vmem>>, vector<1x8x32xbf16>
    %130 = vector.shape_cast %129 : vector<1x8x32xbf16> to vector<8x32xbf16>
    %131 = vector.shape_cast %128 : vector<8x32xbf16> to vector<1x8x32xbf16>
    tpu.vector_store %arg10[%c0_46, %c0_47, %c0_48], %131 {strides = array<i32>} : memref<1x8x32xbf16, #tpu.memory_space<vmem>>, vector<1x8x32xbf16>,
    return
  }
  func.func @transform_0(%arg0: i32, %arg1: i32) -> (i32, i32, i32) {
    %c0_i32 = arith.constant 0 : i32
    %c0_i32_0 = arith.constant 0 : i32
    %c0_i32_1 = arith.constant 0 : i32
    return %arg0, %c0_i32, %c0_i32_0 : i32, i32, i32
  }
  func.func @transform_1(%arg0: i32, %arg1: i32) -> (i32, i32, i32) {
    %c0_i32 = arith.constant 0 : i32
    %c0_i32_0 = arith.constant 0 : i32
    return %arg0, %arg1, %c0_i32 : i32, i32, i32
  }
  func.func @transform_2(%arg0: i32, %arg1: i32) -> (i32, i32) {
    %c0_i32 = arith.constant 0 : i32
    %c0_i32_0 = arith.constant 0 : i32
    %c0_i32_1 = arith.constant 0 : i32
    return %c0_i32, %c0_i32_0 : i32, i32
  }
  func.func @transform_3(%arg0: i32, %arg1: i32) -> (i32, i32) {
    %c0_i32 = arith.constant 0 : i32
    %c0_i32_0 = arith.constant 0 : i32
    %c0_i32_1 = arith.constant 0 : i32
    return %c0_i32, %c0_i32_0 : i32, i32
  }
  func.func @transform_4(%arg0: i32, %arg1: i32) -> (i32, i32) {
    %c0_i32 = arith.constant 0 : i32
    %c0_i32_0 = arith.constant 0 : i32
    %c0_i32_1 = arith.constant 0 : i32
    return %c0_i32, %c0_i32_0 : i32, i32
  }
  func.func @transform_5(%arg0: i32, %arg1: i32) -> (i32, i32) {
    %c0_i32 = arith.constant 0 : i32
    %c0_i32_0 = arith.constant 0 : i32
    %c0_i32_1 = arith.constant 0 : i32
    return %c0_i32, %c0_i32_0 : i32, i32
  }
  func.func @transform_6(%arg0: i32, %arg1: i32) -> (i32, i32) {
    %c0_i32 = arith.constant 0 : i32
    %c0_i32_0 = arith.constant 0 : i32
    %c0_i32_1 = arith.constant 0 : i32
    return %c0_i32, %c0_i32_0 : i32, i32
  }
  func.func @transform_7(%arg0: i32, %arg1: i32) -> (i32, i32) {
    %c0_i32 = arith.constant 0 : i32
    %c0_i32_0 = arith.constant 0 : i32
    %c0_i32_1 = arith.constant 0 : i32
    return %c0_i32, %c0_i32_0 : i32, i32
  }
  func.func @transform_8(%arg0: i32, %arg1: i32) -> (i32, i32, i32) {
    %c0_i32 = arith.constant 0 : i32
    %c0_i32_0 = arith.constant 0 : i32
    return %arg0, %arg1, %c0_i32 : i32, i32, i32
  }
}

module attributes {stable_mosaic.version = 11 : i64} {
  func.func @kernel(%arg0: i32, %arg1: i32, %arg2: memref<1x8x32xbf16, #tpu.memory_space<vmem>>, %arg3: memref<1x8x32xbf16, #tpu.memory_space<vmem>>, %arg4: memref<32x96xbf16, #tpu.memory_space<vmem>>, %arg5: memref<1x96xf32, #tpu.memory_space<vmem>>, %arg6: memref<32x32xbf16, #tpu.memory_space<vmem>>, %arg7: memref<1x32xf32, #tpu.memory_space<vmem>>, %arg8: memref<1x32xf32, #tpu.memory_space<vmem>>, %arg9: memref<1x32xf32, #tpu.memory_space<vmem>>, %arg10: memref<1x8x32xbf16, #tpu.memory_space<vmem>>, %arg11: memref<8x32xbf16, #tpu.memory_space<vmem>>, %arg12: memref<8x32xbf16, #tpu.memory_space<vmem>>) attributes {dimension_semantics = [#tpu.dimension_semantics<parallel>, #tpu.dimension_semantics<arbitrary>], iteration_bounds = array<i64: 2, 1>, scalar_prefetch = 0 : i64, scratch_operands = 2 : i64, tpu.core_type = #tpu.core_type<tc>, window_params = [{transform_indices = @transform_0, window_bounds = array<i64: 1, 8, 32>}, {transform_indices = @transform_1, window_bounds = array<i64: 1, 8, 32>}, {pipeline_mode = #tpu.pipeline_mode<synchronous>, transform_indices = @transform_2, window_bounds = array<i64: 32, 96>}, {pipeline_mode = #tpu.pipeline_mode<synchronous>, transform_indices = @transform_3, window_bounds = array<i64: 1, 96>}, {pipeline_mode = #tpu.pipeline_mode<synchronous>, transform_indices = @transform_4, window_bounds = array<i64: 32, 32>}, {pipeline_mode = #tpu.pipeline_mode<synchronous>, transform_indices = @transform_5, window_bounds = array<i64: 1, 32>}, {pipeline_mode = #tpu.pipeline_mode<synchronous>, transform_indices = @transform_6, window_bounds = array<i64: 1, 32>}, {pipeline_mode = #tpu.pipeline_mode<synchronous>, transform_indices = @transform_7, window_bounds = array<i64: 1, 32>}, {transform_indices = @transform_8, window_bounds = array<i64: 1, 8, 32>}]} {
    %c0 = arith.constant 0 : index
    %c0_0 = arith.constant 0 : index
    %0 = vector.load %arg4[%c0, %c0_0] : memref<32x96xbf16, #tpu.memory_space<vmem>>, vector<32x96xbf16>
    %c0_1 = arith.constant 0 : index
    %c0_2 = arith.constant 0 : index
    %1 = vector.load %arg5[%c0_1, %c0_2] : memref<1x96xf32, #tpu.memory_space<vmem>>, vector<1x96xf32>
    %c0_i32 = arith.constant 0 : i32
    %2 = arith.cmpi eq, %arg1, %c0_i32 : i32
    %3 = arith.extui %2 : i1 to i32
    %c0_i32_3 = arith.constant 0 : i32
    %4 = arith.cmpi ne, %3, %c0_i32_3 : i32
    scf.if %4 {
      %c0_49 = arith.constant 0 : index
      %c0_50 = arith.constant 0 : index
      %c0_51 = arith.constant 0 : index
      %132 = vector.load %arg2[%c0_49, %c0_50, %c0_51] : memref<1x8x32xbf16, #tpu.memory_space<vmem>>, vector<1x8x32xbf16>
      %133 = vector.shape_cast %132 : vector<1x8x32xbf16> to vector<8x32xbf16>
      %134 = vector.extract_strided_slice %0 {offsets = [0, 32], sizes = [32, 32], strides = [1, 1]} : vector<32x96xbf16> to vector<32x32xbf16>
      %cst_52 = arith.constant dense<0.000000e+00> : vector<8x32xf32>
      %135 = tpu.matmul %133, %134, %cst_52 {dimension_numbers = #tpu.dot_dimension_numbers<[1], [0], [0], [1], [0, 0, 1, 1], [], []>} : vector<8x32xbf16>, vector<32x32xbf16>, vector<8x32xf32> -> vector<8x32xf32>
      %136 = vector.extract_strided_slice %1 {offsets = [0, 32], sizes = [1, 32], strides = [1, 1]} : vector<1x96xf32> to vector<1x32xf32>
      %137 = vector.broadcast %136 : vector<1x32xf32> to vector<8x32xf32>
      %138 = arith.addf %135, %137 : vector<8x32xf32>
      %139 = vector.extract_strided_slice %0 {offsets = [0, 64], sizes = [32, 32], strides = [1, 1]} : vector<32x96xbf16> to vector<32x32xbf16>
      %cst_53 = arith.constant dense<0.000000e+00> : vector<8x32xf32>
      %140 = tpu.matmul %133, %139, %cst_53 {dimension_numbers = #tpu.dot_dimension_numbers<[1], [0], [0], [1], [0, 0, 1, 1], [], []>} : vector<8x32xbf16>, vector<32x32xbf16>, vector<8x32xf32> -> vector<8x32xf32>
      %141 = vector.extract_strided_slice %1 {offsets = [0, 64], sizes = [1, 32], strides = [1, 1]} : vector<1x96xf32> to vector<1x32xf32>
      %142 = vector.broadcast %141 : vector<1x32xf32> to vector<8x32xf32>
      %143 = arith.addf %140, %142 : vector<8x32xf32>
      %144 = arith.truncf %138 : vector<8x32xf32> to vector<8x32xbf16>
      %c0_54 = arith.constant 0 : index
      %c0_55 = arith.constant 0 : index
      %145 = vector.load %arg11[%c0_54, %c0_55] : memref<8x32xbf16, #tpu.memory_space<vmem>>, vector<8x32xbf16>
      tpu.vector_store %arg11[%c0_54, %c0_55], %144 {strides = array<i32>} : memref<8x32xbf16, #tpu.memory_space<vmem>>, vector<8x32xbf16>,
      %146 = arith.truncf %143 : vector<8x32xf32> to vector<8x32xbf16>
      %c0_56 = arith.constant 0 : index
      %c0_57 = arith.constant 0 : index
      %147 = vector.load %arg12[%c0_56, %c0_57] : memref<8x32xbf16, #tpu.memory_space<vmem>>, vector<8x32xbf16>
      tpu.vector_store %arg12[%c0_56, %c0_57], %146 {strides = array<i32>} : memref<8x32xbf16, #tpu.memory_space<vmem>>, vector<8x32xbf16>,
    } else {
    }
    %c0_4 = arith.constant 0 : index
    %c0_5 = arith.constant 0 : index
    %c0_6 = arith.constant 0 : index
    %5 = vector.load %arg3[%c0_4, %c0_5, %c0_6] : memref<1x8x32xbf16, #tpu.memory_space<vmem>>, vector<1x8x32xbf16>
    %6 = vector.shape_cast %5 : vector<1x8x32xbf16> to vector<8x32xbf16>
    %7 = vector.extract_strided_slice %0 {offsets = [0, 0], sizes = [32, 32], strides = [1, 1]} : vector<32x96xbf16> to vector<32x32xbf16>
    %cst = arith.constant dense<0.000000e+00> : vector<8x32xf32>
    %8 = tpu.matmul %6, %7, %cst {dimension_numbers = #tpu.dot_dimension_numbers<[1], [0], [0], [1], [0, 0, 1, 1], [], []>} : vector<8x32xbf16>, vector<32x32xbf16>, vector<8x32xf32> -> vector<8x32xf32>
    %9 = vector.extract_strided_slice %1 {offsets = [0, 0], sizes = [1, 32], strides = [1, 1]} : vector<1x96xf32> to vector<1x32xf32>
    %10 = vector.broadcast %9 : vector<1x32xf32> to vector<8x32xf32>
    %11 = arith.addf %8, %10 : vector<8x32xf32>
    %cst_7 = arith.constant 0.353553385 : f32
    %12 = vector.broadcast %cst_7 : f32 to vector<8x32xf32>
    %13 = arith.mulf %11, %12 : vector<8x32xf32>
    %14 = arith.truncf %13 : vector<8x32xf32> to vector<8x32xbf16>
    %c0_8 = arith.constant 0 : index
    %c0_9 = arith.constant 0 : index
    %15 = vector.load %arg11[%c0_8, %c0_9] : memref<8x32xbf16, #tpu.memory_space<vmem>>, vector<8x32xbf16>
    %c0_10 = arith.constant 0 : index
    %c0_11 = arith.constant 0 : index
    %16 = vector.load %arg12[%c0_10, %c0_11] : memref<8x32xbf16, #tpu.memory_space<vmem>>, vector<8x32xbf16>
    %c0_12 = arith.constant 0 : index
    %c0_13 = arith.constant 0 : index
    %17 = vector.load %arg6[%c0_12, %c0_13] : memref<32x32xbf16, #tpu.memory_space<vmem>>, vector<32x32xbf16>
    %cst_14 = arith.constant 0.000000e+00 : f32
    %18 = vector.broadcast %cst_14 : f32 to vector<8x32xf32>
    %19 = vector.extract_strided_slice %14 {offsets = [0, 0], sizes = [8, 8], strides = [1, 1]} : vector<8x32xbf16> to vector<8x8xbf16>
    %20 = vector.extract_strided_slice %15 {offsets = [0, 0], sizes = [8, 8], strides = [1, 1]} : vector<8x32xbf16> to vector<8x8xbf16>
    %cst_15 = arith.constant dense<0.000000e+00> : vector<8x8xf32>
    %21 = tpu.matmul %19, %20, %cst_15 {dimension_numbers = #tpu.dot_dimension_numbers<[1], [1], [0], [0], [0, 0, 1, 0], [], []>} : vector<8x8xbf16>, vector<8x8xbf16>, vector<8x8xf32> -> vector<8x8xf32>
    %cst_16 = arith.constant dense<0xFF800000> : vector<8xf32>
    %22 = vector.multi_reduction <maximumf>, %21, %cst_16 [1] : vector<8x8xf32> to vector<8xf32>
    %23 = vector.shape_cast %22 : vector<8xf32> to vector<8x1xf32>
    %24 = vector.broadcast %23 : vector<8x1xf32> to vector<8x8xf32>
    %25 = arith.subf %21, %24 : vector<8x8xf32>
    %26 = math.exp %25 : vector<8x8xf32>
    %cst_17 = arith.constant dense<0.000000e+00> : vector<8xf32>
    %27 = vector.multi_reduction <add>, %26, %cst_17 [1] : vector<8x8xf32> to vector<8xf32>
    %28 = vector.shape_cast %27 : vector<8xf32> to vector<8x1xf32>
    %29 = tpu.reciprocal %28 {approx = true} : vector<8x1xf32> -> vector<8x1xf32>
    %30 = vector.broadcast %29 : vector<8x1xf32> to vector<8x8xf32>
    %31 = arith.mulf %26, %30 : vector<8x8xf32>
    %32 = arith.truncf %31 : vector<8x8xf32> to vector<8x8xbf16>
    %33 = vector.extract_strided_slice %16 {offsets = [0, 0], sizes = [8, 8], strides = [1, 1]} : vector<8x32xbf16> to vector<8x8xbf16>
    %cst_18 = arith.constant dense<0.000000e+00> : vector<8x8xf32>
    %34 = tpu.matmul %32, %33, %cst_18 {dimension_numbers = #tpu.dot_dimension_numbers<[1], [0], [0], [1], [0, 0, 1, 1], [], []>} : vector<8x8xbf16>, vector<8x8xbf16>, vector<8x8xf32> -> vector<8x8xf32>
    %35 = arith.truncf %34 : vector<8x8xf32> to vector<8x8xbf16>
    %36 = vector.extract_strided_slice %17 {offsets = [0, 0], sizes = [8, 32], strides = [1, 1]} : vector<32x32xbf16> to vector<8x32xbf16>
    %cst_19 = arith.constant dense<0.000000e+00> : vector<8x32xf32>
    %37 = tpu.matmul %35, %36, %cst_19 {dimension_numbers = #tpu.dot_dimension_numbers<[1], [0], [0], [1], [0, 0, 1, 1], [], []>} : vector<8x8xbf16>, vector<8x32xbf16>, vector<8x32xf32> -> vector<8x32xf32>
    %38 = arith.addf %18, %37 : vector<8x32xf32>
    %39 = vector.extract_strided_slice %14 {offsets = [0, 8], sizes = [8, 8], strides = [1, 1]} : vector<8x32xbf16> to vector<8x8xbf16>
    %40 = vector.extract_strided_slice %15 {offsets = [0, 8], sizes = [8, 8], strides = [1, 1]} : vector<8x32xbf16> to vector<8x8xbf16>
    %cst_20 = arith.constant dense<0.000000e+00> : vector<8x8xf32>
    %41 = tpu.matmul %39, %40, %cst_20 {dimension_numbers = #tpu.dot_dimension_numbers<[1], [1], [0], [0], [0, 0, 1, 0], [], []>} : vector<8x8xbf16>, vector<8x8xbf16>, vector<8x8xf32> -> vector<8x8xf32>
    %cst_21 = arith.constant dense<0xFF800000> : vector<8xf32>
    %42 = vector.multi_reduction <maximumf>, %41, %cst_21 [1] : vector<8x8xf32> to vector<8xf32>
    %43 = vector.shape_cast %42 : vector<8xf32> to vector<8x1xf32>
    %44 = vector.broadcast %43 : vector<8x1xf32> to vector<8x8xf32>
    %45 = arith.subf %41, %44 : vector<8x8xf32>
    %46 = math.exp %45 : vector<8x8xf32>
    %cst_22 = arith.constant dense<0.000000e+00> : vector<8xf32>
    %47 = vector.multi_reduction <add>, %46, %cst_22 [1] : vector<8x8xf32> to vector<8xf32>
    %48 = vector.shape_cast %47 : vector<8xf32> to vector<8x1xf32>
    %49 = tpu.reciprocal %48 {approx = true} : vector<8x1xf32> -> vector<8x1xf32>
    %50 = vector.broadcast %49 : vector<8x1xf32> to vector<8x8xf32>
    %51 = arith.mulf %46, %50 : vector<8x8xf32>
    %52 = arith.truncf %51 : vector<8x8xf32> to vector<8x8xbf16>
    %53 = vector.extract_strided_slice %16 {offsets = [0, 8], sizes = [8, 8], strides = [1, 1]} : vector<8x32xbf16> to vector<8x8xbf16>
    %cst_23 = arith.constant dense<0.000000e+00> : vector<8x8xf32>
    %54 = tpu.matmul %52, %53, %cst_23 {dimension_numbers = #tpu.dot_dimension_numbers<[1], [0], [0], [1], [0, 0, 1, 1], [], []>} : vector<8x8xbf16>, vector<8x8xbf16>, vector<8x8xf32> -> vector<8x8xf32>
    %55 = arith.truncf %54 : vector<8x8xf32> to vector<8x8xbf16>
    %56 = vector.extract_strided_slice %17 {offsets = [8, 0], sizes = [8, 32], strides = [1, 1]} : vector<32x32xbf16> to vector<8x32xbf16>
    %cst_24 = arith.constant dense<0.000000e+00> : vector<8x32xf32>
    %57 = tpu.matmul %55, %56, %cst_24 {dimension_numbers = #tpu.dot_dimension_numbers<[1], [0], [0], [1], [0, 0, 1, 1], [], []>} : vector<8x8xbf16>, vector<8x32xbf16>, vector<8x32xf32> -> vector<8x32xf32>
    %58 = arith.addf %38, %57 : vector<8x32xf32>
    %59 = vector.extract_strided_slice %14 {offsets = [0, 16], sizes = [8, 8], strides = [1, 1]} : vector<8x32xbf16> to vector<8x8xbf16>
    %60 = vector.extract_strided_slice %15 {offsets = [0, 16], sizes = [8, 8], strides = [1, 1]} : vector<8x32xbf16> to vector<8x8xbf16>
    %cst_25 = arith.constant dense<0.000000e+00> : vector<8x8xf32>
    %61 = tpu.matmul %59, %60, %cst_25 {dimension_numbers = #tpu.dot_dimension_numbers<[1], [1], [0], [0], [0, 0, 1, 0], [], []>} : vector<8x8xbf16>, vector<8x8xbf16>, vector<8x8xf32> -> vector<8x8xf32>
    %cst_26 = arith.constant dense<0xFF800000> : vector<8xf32>
    %62 = vector.multi_reduction <maximumf>, %61, %cst_26 [1] : vector<8x8xf32> to vector<8xf32>
    %63 = vector.shape_cast %62 : vector<8xf32> to vector<8x1xf32>
    %64 = vector.broadcast %63 : vector<8x1xf32> to vector<8x8xf32>
    %65 = arith.subf %61, %64 : vector<8x8xf32>
    %66 = math.exp %65 : vector<8x8xf32>
    %cst_27 = arith.constant dense<0.000000e+00> : vector<8xf32>
    %67 = vector.multi_reduction <add>, %66, %cst_27 [1] : vector<8x8xf32> to vector<8xf32>
    %68 = vector.shape_cast %67 : vector<8xf32> to vector<8x1xf32>
    %69 = tpu.reciprocal %68 {approx = true} : vector<8x1xf32> -> vector<8x1xf32>
    %70 = vector.broadcast %69 : vector<8x1xf32> to vector<8x8xf32>
    %71 = arith.mulf %66, %70 : vector<8x8xf32>
    %72 = arith.truncf %71 : vector<8x8xf32> to vector<8x8xbf16>
    %73 = vector.extract_strided_slice %16 {offsets = [0, 16], sizes = [8, 8], strides = [1, 1]} : vector<8x32xbf16> to vector<8x8xbf16>
    %cst_28 = arith.constant dense<0.000000e+00> : vector<8x8xf32>
    %74 = tpu.matmul %72, %73, %cst_28 {dimension_numbers = #tpu.dot_dimension_numbers<[1], [0], [0], [1], [0, 0, 1, 1], [], []>} : vector<8x8xbf16>, vector<8x8xbf16>, vector<8x8xf32> -> vector<8x8xf32>
    %75 = arith.truncf %74 : vector<8x8xf32> to vector<8x8xbf16>
    %76 = vector.extract_strided_slice %17 {offsets = [16, 0], sizes = [8, 32], strides = [1, 1]} : vector<32x32xbf16> to vector<8x32xbf16>
    %cst_29 = arith.constant dense<0.000000e+00> : vector<8x32xf32>
    %77 = tpu.matmul %75, %76, %cst_29 {dimension_numbers = #tpu.dot_dimension_numbers<[1], [0], [0], [1], [0, 0, 1, 1], [], []>} : vector<8x8xbf16>, vector<8x32xbf16>, vector<8x32xf32> -> vector<8x32xf32>
    %78 = arith.addf %58, %77 : vector<8x32xf32>
    %79 = vector.extract_strided_slice %14 {offsets = [0, 24], sizes = [8, 8], strides = [1, 1]} : vector<8x32xbf16> to vector<8x8xbf16>
    %80 = vector.extract_strided_slice %15 {offsets = [0, 24], sizes = [8, 8], strides = [1, 1]} : vector<8x32xbf16> to vector<8x8xbf16>
    %cst_30 = arith.constant dense<0.000000e+00> : vector<8x8xf32>
    %81 = tpu.matmul %79, %80, %cst_30 {dimension_numbers = #tpu.dot_dimension_numbers<[1], [1], [0], [0], [0, 0, 1, 0], [], []>} : vector<8x8xbf16>, vector<8x8xbf16>, vector<8x8xf32> -> vector<8x8xf32>
    %cst_31 = arith.constant dense<0xFF800000> : vector<8xf32>
    %82 = vector.multi_reduction <maximumf>, %81, %cst_31 [1] : vector<8x8xf32> to vector<8xf32>
    %83 = vector.shape_cast %82 : vector<8xf32> to vector<8x1xf32>
    %84 = vector.broadcast %83 : vector<8x1xf32> to vector<8x8xf32>
    %85 = arith.subf %81, %84 : vector<8x8xf32>
    %86 = math.exp %85 : vector<8x8xf32>
    %cst_32 = arith.constant dense<0.000000e+00> : vector<8xf32>
    %87 = vector.multi_reduction <add>, %86, %cst_32 [1] : vector<8x8xf32> to vector<8xf32>
    %88 = vector.shape_cast %87 : vector<8xf32> to vector<8x1xf32>
    %89 = tpu.reciprocal %88 {approx = true} : vector<8x1xf32> -> vector<8x1xf32>
    %90 = vector.broadcast %89 : vector<8x1xf32> to vector<8x8xf32>
    %91 = arith.mulf %86, %90 : vector<8x8xf32>
    %92 = arith.truncf %91 : vector<8x8xf32> to vector<8x8xbf16>
    %93 = vector.extract_strided_slice %16 {offsets = [0, 24], sizes = [8, 8], strides = [1, 1]} : vector<8x32xbf16> to vector<8x8xbf16>
    %cst_33 = arith.constant dense<0.000000e+00> : vector<8x8xf32>
    %94 = tpu.matmul %92, %93, %cst_33 {dimension_numbers = #tpu.dot_dimension_numbers<[1], [0], [0], [1], [0, 0, 1, 1], [], []>} : vector<8x8xbf16>, vector<8x8xbf16>, vector<8x8xf32> -> vector<8x8xf32>
    %95 = arith.truncf %94 : vector<8x8xf32> to vector<8x8xbf16>
    %96 = vector.extract_strided_slice %17 {offsets = [24, 0], sizes = [8, 32], strides = [1, 1]} : vector<32x32xbf16> to vector<8x32xbf16>
    %cst_34 = arith.constant dense<0.000000e+00> : vector<8x32xf32>
    %97 = tpu.matmul %95, %96, %cst_34 {dimension_numbers = #tpu.dot_dimension_numbers<[1], [0], [0], [1], [0, 0, 1, 1], [], []>} : vector<8x8xbf16>, vector<8x32xbf16>, vector<8x32xf32> -> vector<8x32xf32>
    %98 = arith.addf %78, %97 : vector<8x32xf32>
    %c0_35 = arith.constant 0 : index
    %c0_36 = arith.constant 0 : index
    %99 = vector.load %arg7[%c0_35, %c0_36] : memref<1x32xf32, #tpu.memory_space<vmem>>, vector<1x32xf32>
    %100 = vector.broadcast %99 : vector<1x32xf32> to vector<8x32xf32>
    %101 = arith.addf %98, %100 : vector<8x32xf32>
    %102 = arith.extf %6 : vector<8x32xbf16> to vector<8x32xf32>
    %103 = arith.addf %101, %102 : vector<8x32xf32>
    %c0_37 = arith.constant 0 : index
    %c0_38 = arith.constant 0 : index
    %104 = vector.load %arg8[%c0_37, %c0_38] : memref<1x32xf32, #tpu.memory_space<vmem>>, vector<1x32xf32>
    %c0_39 = arith.constant 0 : index
    %c0_40 = arith.constant 0 : index
    %105 = vector.load %arg9[%c0_39, %c0_40] : memref<1x32xf32, #tpu.memory_space<vmem>>, vector<1x32xf32>
    %cst_41 = arith.constant dense<0.000000e+00> : vector<8xf32>
    %106 = vector.multi_reduction <add>, %103, %cst_41 [1] : vector<8x32xf32> to vector<8xf32>
    %107 = vector.shape_cast %106 : vector<8xf32> to vector<8x1xf32>
    %cst_42 = arith.constant 3.200000e+01 : f32
    %108 = vector.broadcast %cst_42 : f32 to vector<8x1xf32>
    %109 = arith.divf %107, %108 : vector<8x1xf32>
    %110 = vector.broadcast %109 : vector<8x1xf32> to vector<8x32xf32>
    %111 = arith.subf %103, %110 : vector<8x32xf32>
    %112 = arith.mulf %111, %111 : vector<8x32xf32>
    %cst_43 = arith.constant dense<0.000000e+00> : vector<8xf32>
    %113 = vector.multi_reduction <add>, %112, %cst_43 [1] : vector<8x32xf32> to vector<8xf32>
    %114 = vector.shape_cast %113 : vector<8xf32> to vector<8x1xf32>
    %cst_44 = arith.constant 3.200000e+01 : f32
    %115 = vector.broadcast %cst_44 : f32 to vector<8x1xf32>
    %116 = arith.divf %114, %115 : vector<8x1xf32>
    %117 = vector.broadcast %109 : vector<8x1xf32> to vector<8x32xf32>
    %118 = arith.subf %103, %117 : vector<8x32xf32>
    %cst_45 = arith.constant 9.99999974E-6 : f32
    %119 = vector.broadcast %cst_45 : f32 to vector<8x1xf32>
    %120 = arith.addf %116, %119 : vector<8x1xf32>
    %121 = math.rsqrt %120 : vector<8x1xf32>
    %122 = vector.broadcast %121 : vector<8x1xf32> to vector<8x32xf32>
    %123 = arith.mulf %118, %122 : vector<8x32xf32>
    %124 = vector.broadcast %104 : vector<1x32xf32> to vector<8x32xf32>
    %125 = arith.mulf %123, %124 : vector<8x32xf32>
    %126 = vector.broadcast %105 : vector<1x32xf32> to vector<8x32xf32>
    %127 = arith.addf %125, %126 : vector<8x32xf32>
    %128 = arith.truncf %127 : vector<8x32xf32> to vector<8x32xbf16>
    %c0_46 = arith.constant 0 : index
    %c0_47 = arith.constant 0 : index
    %c0_48 = arith.constant 0 : index
    %129 = vector.load %arg10[%c0_46, %c0_47, %c0_48] : memref<1x8x32xbf16, #tpu.memory_space<vmem>>, vector<1x8x32xbf16>
    %130 = vector.shape_cast %129 : vector<1x8x32xbf16> to vector<8x32xbf16>
    %131 = vector.shape_cast %128 : vector<8x32xbf16> to vector<1x8x32xbf16>
    tpu.vector_store %arg10[%c0_46, %c0_47, %c0_48], %131 {strides = array<i32>} : memref<1x8x32xbf16, #tpu.memory_space<vmem>>, vector<1x8x32xbf16>,
    return
  }
  func.func @transform_0(%arg0: i32, %arg1: i32) -> (i32, i32, i32) {
    %c0_i32 = arith.constant 0 : i32
    %c0_i32_0 = arith.constant 0 : i32
    %c0_i32_1 = arith.constant 0 : i32
    return %arg0, %c0_i32, %c0_i32_0 : i32, i32, i32
  }
  func.func @transform_1(%arg0: i32, %arg1: i32) -> (i32, i32, i32) {
    %c0_i32 = arith.constant 0 : i32
    %c0_i32_0 = arith.constant 0 : i32
    return %arg0, %arg1, %c0_i32 : i32, i32, i32
  }
  func.func @transform_2(%arg0: i32, %arg1: i32) -> (i32, i32) {
    %c0_i32 = arith.constant 0 : i32
    %c0_i32_0 = arith.constant 0 : i32
    %c0_i32_1 = arith.constant 0 : i32
    return %c0_i32, %c0_i32_0 : i32, i32
  }
  func.func @transform_3(%arg0: i32, %arg1: i32) -> (i32, i32) {
    %c0_i32 = arith.constant 0 : i32
    %c0_i32_0 = arith.constant 0 : i32
    %c0_i32_1 = arith.constant 0 : i32
    return %c0_i32, %c0_i32_0 : i32, i32
  }
  func.func @transform_4(%arg0: i32, %arg1: i32) -> (i32, i32) {
    %c0_i32 = arith.constant 0 : i32
    %c0_i32_0 = arith.constant 0 : i32
    %c0_i32_1 = arith.constant 0 : i32
    return %c0_i32, %c0_i32_0 : i32, i32
  }
  func.func @transform_5(%arg0: i32, %arg1: i32) -> (i32, i32) {
    %c0_i32 = arith.constant 0 : i32
    %c0_i32_0 = arith.constant 0 : i32
    %c0_i32_1 = arith.constant 0 : i32
    return %c0_i32, %c0_i32_0 : i32, i32
  }
  func.func @transform_6(%arg0: i32, %arg1: i32) -> (i32, i32) {
    %c0_i32 = arith.constant 0 : i32
    %c0_i32_0 = arith.constant 0 : i32
    %c0_i32_1 = arith.constant 0 : i32
    return %c0_i32, %c0_i32_0 : i32, i32
  }
  func.func @transform_7(%arg0: i32, %arg1: i32) -> (i32, i32) {
    %c0_i32 = arith.constant 0 : i32
    %c0_i32_0 = arith.constant 0 : i32
    %c0_i32_1 = arith.constant 0 : i32
    return %c0_i32, %c0_i32_0 : i32, i32
  }
  func.func @transform_8(%arg0: i32, %arg1: i32) -> (i32, i32, i32) {
    %c0_i32 = arith.constant 0 : i32
    %c0_i32_0 = arith.constant 0 : i32
    return %arg0, %arg1, %c0_i32 : i32, i32, i32
  }
}

module attributes {stable_mosaic.version = 11 : i64} {
  func.func @kernel(%arg0: i32, %arg1: i32, %arg2: memref<1x8x32xbf16, #tpu.memory_space<vmem>>, %arg3: memref<1x8x32xbf16, #tpu.memory_space<vmem>>, %arg4: memref<32x96xbf16, #tpu.memory_space<vmem>>, %arg5: memref<1x96xf32, #tpu.memory_space<vmem>>, %arg6: memref<32x32xbf16, #tpu.memory_space<vmem>>, %arg7: memref<1x32xf32, #tpu.memory_space<vmem>>, %arg8: memref<1x32xf32, #tpu.memory_space<vmem>>, %arg9: memref<1x32xf32, #tpu.memory_space<vmem>>, %arg10: memref<8x8xf32, #tpu.memory_space<vmem>>, %arg11: memref<1x8x32xbf16, #tpu.memory_space<vmem>>, %arg12: memref<8x32xbf16, #tpu.memory_space<vmem>>, %arg13: memref<8x32xbf16, #tpu.memory_space<vmem>>) attributes {dimension_semantics = [#tpu.dimension_semantics<parallel>, #tpu.dimension_semantics<arbitrary>], iteration_bounds = array<i64: 2, 1>, scalar_prefetch = 0 : i64, scratch_operands = 2 : i64, tpu.core_type = #tpu.core_type<tc>, window_params = [{transform_indices = @transform_0, window_bounds = array<i64: 1, 8, 32>}, {transform_indices = @transform_1, window_bounds = array<i64: 1, 8, 32>}, {pipeline_mode = #tpu.pipeline_mode<synchronous>, transform_indices = @transform_2, window_bounds = array<i64: 32, 96>}, {pipeline_mode = #tpu.pipeline_mode<synchronous>, transform_indices = @transform_3, window_bounds = array<i64: 1, 96>}, {pipeline_mode = #tpu.pipeline_mode<synchronous>, transform_indices = @transform_4, window_bounds = array<i64: 32, 32>}, {pipeline_mode = #tpu.pipeline_mode<synchronous>, transform_indices = @transform_5, window_bounds = array<i64: 1, 32>}, {pipeline_mode = #tpu.pipeline_mode<synchronous>, transform_indices = @transform_6, window_bounds = array<i64: 1, 32>}, {pipeline_mode = #tpu.pipeline_mode<synchronous>, transform_indices = @transform_7, window_bounds = array<i64: 1, 32>}, {transform_indices = @transform_8, window_bounds = array<i64: 8, 8>}, {transform_indices = @transform_9, window_bounds = array<i64: 1, 8, 32>}]} {
    %c0 = arith.constant 0 : index
    %c0_0 = arith.constant 0 : index
    %0 = vector.load %arg4[%c0, %c0_0] : memref<32x96xbf16, #tpu.memory_space<vmem>>, vector<32x96xbf16>
    %c0_1 = arith.constant 0 : index
    %c0_2 = arith.constant 0 : index
    %1 = vector.load %arg5[%c0_1, %c0_2] : memref<1x96xf32, #tpu.memory_space<vmem>>, vector<1x96xf32>
    %c0_i32 = arith.constant 0 : i32
    %2 = arith.cmpi eq, %arg1, %c0_i32 : i32
    %3 = arith.extui %2 : i1 to i32
    %c0_i32_3 = arith.constant 0 : i32
    %4 = arith.cmpi ne, %3, %c0_i32_3 : i32
    scf.if %4 {
      %c0_51 = arith.constant 0 : index
      %c0_52 = arith.constant 0 : index
      %c0_53 = arith.constant 0 : index
      %137 = vector.load %arg2[%c0_51, %c0_52, %c0_53] : memref<1x8x32xbf16, #tpu.memory_space<vmem>>, vector<1x8x32xbf16>
      %138 = vector.shape_cast %137 : vector<1x8x32xbf16> to vector<8x32xbf16>
      %139 = vector.extract_strided_slice %0 {offsets = [0, 32], sizes = [32, 32], strides = [1, 1]} : vector<32x96xbf16> to vector<32x32xbf16>
      %cst_54 = arith.constant dense<0.000000e+00> : vector<8x32xf32>
      %140 = tpu.matmul %138, %139, %cst_54 {dimension_numbers = #tpu.dot_dimension_numbers<[1], [0], [0], [1], [0, 0, 1, 1], [], []>} : vector<8x32xbf16>, vector<32x32xbf16>, vector<8x32xf32> -> vector<8x32xf32>
      %141 = vector.extract_strided_slice %1 {offsets = [0, 32], sizes = [1, 32], strides = [1, 1]} : vector<1x96xf32> to vector<1x32xf32>
      %142 = vector.broadcast %141 : vector<1x32xf32> to vector<8x32xf32>
      %143 = arith.addf %140, %142 : vector<8x32xf32>
      %144 = vector.extract_strided_slice %0 {offsets = [0, 64], sizes = [32, 32], strides = [1, 1]} : vector<32x96xbf16> to vector<32x32xbf16>
      %cst_55 = arith.constant dense<0.000000e+00> : vector<8x32xf32>
      %145 = tpu.matmul %138, %144, %cst_55 {dimension_numbers = #tpu.dot_dimension_numbers<[1], [0], [0], [1], [0, 0, 1, 1], [], []>} : vector<8x32xbf16>, vector<32x32xbf16>, vector<8x32xf32> -> vector<8x32xf32>
      %146 = vector.extract_strided_slice %1 {offsets = [0, 64], sizes = [1, 32], strides = [1, 1]} : vector<1x96xf32> to vector<1x32xf32>
      %147 = vector.broadcast %146 : vector<1x32xf32> to vector<8x32xf32>
      %148 = arith.addf %145, %147 : vector<8x32xf32>
      %149 = arith.truncf %143 : vector<8x32xf32> to vector<8x32xbf16>
      %c0_56 = arith.constant 0 : index
      %c0_57 = arith.constant 0 : index
      %150 = vector.load %arg12[%c0_56, %c0_57] : memref<8x32xbf16, #tpu.memory_space<vmem>>, vector<8x32xbf16>
      tpu.vector_store %arg12[%c0_56, %c0_57], %149 {strides = array<i32>} : memref<8x32xbf16, #tpu.memory_space<vmem>>, vector<8x32xbf16>,
      %151 = arith.truncf %148 : vector<8x32xf32> to vector<8x32xbf16>
      %c0_58 = arith.constant 0 : index
      %c0_59 = arith.constant 0 : index
      %152 = vector.load %arg13[%c0_58, %c0_59] : memref<8x32xbf16, #tpu.memory_space<vmem>>, vector<8x32xbf16>
      tpu.vector_store %arg13[%c0_58, %c0_59], %151 {strides = array<i32>} : memref<8x32xbf16, #tpu.memory_space<vmem>>, vector<8x32xbf16>,
    } else {
    }
    %c0_4 = arith.constant 0 : index
    %c0_5 = arith.constant 0 : index
    %c0_6 = arith.constant 0 : index
    %5 = vector.load %arg3[%c0_4, %c0_5, %c0_6] : memref<1x8x32xbf16, #tpu.memory_space<vmem>>, vector<1x8x32xbf16>
    %6 = vector.shape_cast %5 : vector<1x8x32xbf16> to vector<8x32xbf16>
    %7 = vector.extract_strided_slice %0 {offsets = [0, 0], sizes = [32, 32], strides = [1, 1]} : vector<32x96xbf16> to vector<32x32xbf16>
    %cst = arith.constant dense<0.000000e+00> : vector<8x32xf32>
    %8 = tpu.matmul %6, %7, %cst {dimension_numbers = #tpu.dot_dimension_numbers<[1], [0], [0], [1], [0, 0, 1, 1], [], []>} : vector<8x32xbf16>, vector<32x32xbf16>, vector<8x32xf32> -> vector<8x32xf32>
    %9 = vector.extract_strided_slice %1 {offsets = [0, 0], sizes = [1, 32], strides = [1, 1]} : vector<1x96xf32> to vector<1x32xf32>
    %10 = vector.broadcast %9 : vector<1x32xf32> to vector<8x32xf32>
    %11 = arith.addf %8, %10 : vector<8x32xf32>
    %cst_7 = arith.constant 0.353553385 : f32
    %12 = vector.broadcast %cst_7 : f32 to vector<8x32xf32>
    %13 = arith.mulf %11, %12 : vector<8x32xf32>
    %14 = arith.truncf %13 : vector<8x32xf32> to vector<8x32xbf16>
    %c0_8 = arith.constant 0 : index
    %c0_9 = arith.constant 0 : index
    %15 = vector.load %arg12[%c0_8, %c0_9] : memref<8x32xbf16, #tpu.memory_space<vmem>>, vector<8x32xbf16>
    %c0_10 = arith.constant 0 : index
    %c0_11 = arith.constant 0 : index
    %16 = vector.load %arg13[%c0_10, %c0_11] : memref<8x32xbf16, #tpu.memory_space<vmem>>, vector<8x32xbf16>
    %c0_12 = arith.constant 0 : index
    %c0_13 = arith.constant 0 : index
    %17 = vector.load %arg6[%c0_12, %c0_13] : memref<32x32xbf16, #tpu.memory_space<vmem>>, vector<32x32xbf16>
    %c0_14 = arith.constant 0 : index
    %c0_15 = arith.constant 0 : index
    %18 = vector.load %arg10[%c0_14, %c0_15] : memref<8x8xf32, #tpu.memory_space<vmem>>, vector<8x8xf32>
    %cst_16 = arith.constant 0.000000e+00 : f32
    %19 = vector.broadcast %cst_16 : f32 to vector<8x32xf32>
    %20 = vector.extract_strided_slice %14 {offsets = [0, 0], sizes = [8, 8], strides = [1, 1]} : vector<8x32xbf16> to vector<8x8xbf16>
    %21 = vector.extract_strided_slice %15 {offsets = [0, 0], sizes = [8, 8], strides = [1, 1]} : vector<8x32xbf16> to vector<8x8xbf16>
    %cst_17 = arith.constant dense<0.000000e+00> : vector<8x8xf32>
    %22 = tpu.matmul %20, %21, %cst_17 {dimension_numbers = #tpu.dot_dimension_numbers<[1], [1], [0], [0], [0, 0, 1, 0], [], []>} : vector<8x8xbf16>, vector<8x8xbf16>, vector<8x8xf32> -> vector<8x8xf32>
    %23 = arith.addf %22, %18 : vector<8x8xf32>
    %cst_18 = arith.constant dense<0xFF800000> : vector<8xf32>
    %24 = vector.multi_reduction <maximumf>, %23, %cst_18 [1] : vector<8x8xf32> to vector<8xf32>
    %25 = vector.shape_cast %24 : vector<8xf32> to vector<8x1xf32>
    %26 = vector.broadcast %25 : vector<8x1xf32> to vector<8x8xf32>
    %27 = arith.subf %23, %26 : vector<8x8xf32>
    %28 = math.exp %27 : vector<8x8xf32>
    %cst_19 = arith.constant dense<0.000000e+00> : vector<8xf32>
    %29 = vector.multi_reduction <add>, %28, %cst_19 [1] : vector<8x8xf32> to vector<8xf32>
    %30 = vector.shape_cast %29 : vector<8xf32> to vector<8x1xf32>
    %31 = tpu.reciprocal %30 {approx = true} : vector<8x1xf32> -> vector<8x1xf32>
    %32 = vector.broadcast %31 : vector<8x1xf32> to vector<8x8xf32>
    %33 = arith.mulf %28, %32 : vector<8x8xf32>
    %34 = arith.truncf %33 : vector<8x8xf32> to vector<8x8xbf16>
    %35 = vector.extract_strided_slice %16 {offsets = [0, 0], sizes = [8, 8], strides = [1, 1]} : vector<8x32xbf16> to vector<8x8xbf16>
    %cst_20 = arith.constant dense<0.000000e+00> : vector<8x8xf32>
    %36 = tpu.matmul %34, %35, %cst_20 {dimension_numbers = #tpu.dot_dimension_numbers<[1], [0], [0], [1], [0, 0, 1, 1], [], []>} : vector<8x8xbf16>, vector<8x8xbf16>, vector<8x8xf32> -> vector<8x8xf32>
    %37 = arith.truncf %36 : vector<8x8xf32> to vector<8x8xbf16>
    %38 = vector.extract_strided_slice %17 {offsets = [0, 0], sizes = [8, 32], strides = [1, 1]} : vector<32x32xbf16> to vector<8x32xbf16>
    %cst_21 = arith.constant dense<0.000000e+00> : vector<8x32xf32>
    %39 = tpu.matmul %37, %38, %cst_21 {dimension_numbers = #tpu.dot_dimension_numbers<[1], [0], [0], [1], [0, 0, 1, 1], [], []>} : vector<8x8xbf16>, vector<8x32xbf16>, vector<8x32xf32> -> vector<8x32xf32>
    %40 = arith.addf %19, %39 : vector<8x32xf32>
    %41 = vector.extract_strided_slice %14 {offsets = [0, 8], sizes = [8, 8], strides = [1, 1]} : vector<8x32xbf16> to vector<8x8xbf16>
    %42 = vector.extract_strided_slice %15 {offsets = [0, 8], sizes = [8, 8], strides = [1, 1]} : vector<8x32xbf16> to vector<8x8xbf16>
    %cst_22 = arith.constant dense<0.000000e+00> : vector<8x8xf32>
    %43 = tpu.matmul %41, %42, %cst_22 {dimension_numbers = #tpu.dot_dimension_numbers<[1], [1], [0], [0], [0, 0, 1, 0], [], []>} : vector<8x8xbf16>, vector<8x8xbf16>, vector<8x8xf32> -> vector<8x8xf32>
    %44 = arith.addf %43, %18 : vector<8x8xf32>
    %cst_23 = arith.constant dense<0xFF800000> : vector<8xf32>
    %45 = vector.multi_reduction <maximumf>, %44, %cst_23 [1] : vector<8x8xf32> to vector<8xf32>
    %46 = vector.shape_cast %45 : vector<8xf32> to vector<8x1xf32>
    %47 = vector.broadcast %46 : vector<8x1xf32> to vector<8x8xf32>
    %48 = arith.subf %44, %47 : vector<8x8xf32>
    %49 = math.exp %48 : vector<8x8xf32>
    %cst_24 = arith.constant dense<0.000000e+00> : vector<8xf32>
    %50 = vector.multi_reduction <add>, %49, %cst_24 [1] : vector<8x8xf32> to vector<8xf32>
    %51 = vector.shape_cast %50 : vector<8xf32> to vector<8x1xf32>
    %52 = tpu.reciprocal %51 {approx = true} : vector<8x1xf32> -> vector<8x1xf32>
    %53 = vector.broadcast %52 : vector<8x1xf32> to vector<8x8xf32>
    %54 = arith.mulf %49, %53 : vector<8x8xf32>
    %55 = arith.truncf %54 : vector<8x8xf32> to vector<8x8xbf16>
    %56 = vector.extract_strided_slice %16 {offsets = [0, 8], sizes = [8, 8], strides = [1, 1]} : vector<8x32xbf16> to vector<8x8xbf16>
    %cst_25 = arith.constant dense<0.000000e+00> : vector<8x8xf32>
    %57 = tpu.matmul %55, %56, %cst_25 {dimension_numbers = #tpu.dot_dimension_numbers<[1], [0], [0], [1], [0, 0, 1, 1], [], []>} : vector<8x8xbf16>, vector<8x8xbf16>, vector<8x8xf32> -> vector<8x8xf32>
    %58 = arith.truncf %57 : vector<8x8xf32> to vector<8x8xbf16>
    %59 = vector.extract_strided_slice %17 {offsets = [8, 0], sizes = [8, 32], strides = [1, 1]} : vector<32x32xbf16> to vector<8x32xbf16>
    %cst_26 = arith.constant dense<0.000000e+00> : vector<8x32xf32>
    %60 = tpu.matmul %58, %59, %cst_26 {dimension_numbers = #tpu.dot_dimension_numbers<[1], [0], [0], [1], [0, 0, 1, 1], [], []>} : vector<8x8xbf16>, vector<8x32xbf16>, vector<8x32xf32> -> vector<8x32xf32>
    %61 = arith.addf %40, %60 : vector<8x32xf32>
    %62 = vector.extract_strided_slice %14 {offsets = [0, 16], sizes = [8, 8], strides = [1, 1]} : vector<8x32xbf16> to vector<8x8xbf16>
    %63 = vector.extract_strided_slice %15 {offsets = [0, 16], sizes = [8, 8], strides = [1, 1]} : vector<8x32xbf16> to vector<8x8xbf16>
    %cst_27 = arith.constant dense<0.000000e+00> : vector<8x8xf32>
    %64 = tpu.matmul %62, %63, %cst_27 {dimension_numbers = #tpu.dot_dimension_numbers<[1], [1], [0], [0], [0, 0, 1, 0], [], []>} : vector<8x8xbf16>, vector<8x8xbf16>, vector<8x8xf32> -> vector<8x8xf32>
    %65 = arith.addf %64, %18 : vector<8x8xf32>
    %cst_28 = arith.constant dense<0xFF800000> : vector<8xf32>
    %66 = vector.multi_reduction <maximumf>, %65, %cst_28 [1] : vector<8x8xf32> to vector<8xf32>
    %67 = vector.shape_cast %66 : vector<8xf32> to vector<8x1xf32>
    %68 = vector.broadcast %67 : vector<8x1xf32> to vector<8x8xf32>
    %69 = arith.subf %65, %68 : vector<8x8xf32>
    %70 = math.exp %69 : vector<8x8xf32>
    %cst_29 = arith.constant dense<0.000000e+00> : vector<8xf32>
    %71 = vector.multi_reduction <add>, %70, %cst_29 [1] : vector<8x8xf32> to vector<8xf32>
    %72 = vector.shape_cast %71 : vector<8xf32> to vector<8x1xf32>
    %73 = tpu.reciprocal %72 {approx = true} : vector<8x1xf32> -> vector<8x1xf32>
    %74 = vector.broadcast %73 : vector<8x1xf32> to vector<8x8xf32>
    %75 = arith.mulf %70, %74 : vector<8x8xf32>
    %76 = arith.truncf %75 : vector<8x8xf32> to vector<8x8xbf16>
    %77 = vector.extract_strided_slice %16 {offsets = [0, 16], sizes = [8, 8], strides = [1, 1]} : vector<8x32xbf16> to vector<8x8xbf16>
    %cst_30 = arith.constant dense<0.000000e+00> : vector<8x8xf32>
    %78 = tpu.matmul %76, %77, %cst_30 {dimension_numbers = #tpu.dot_dimension_numbers<[1], [0], [0], [1], [0, 0, 1, 1], [], []>} : vector<8x8xbf16>, vector<8x8xbf16>, vector<8x8xf32> -> vector<8x8xf32>
    %79 = arith.truncf %78 : vector<8x8xf32> to vector<8x8xbf16>
    %80 = vector.extract_strided_slice %17 {offsets = [16, 0], sizes = [8, 32], strides = [1, 1]} : vector<32x32xbf16> to vector<8x32xbf16>
    %cst_31 = arith.constant dense<0.000000e+00> : vector<8x32xf32>
    %81 = tpu.matmul %79, %80, %cst_31 {dimension_numbers = #tpu.dot_dimension_numbers<[1], [0], [0], [1], [0, 0, 1, 1], [], []>} : vector<8x8xbf16>, vector<8x32xbf16>, vector<8x32xf32> -> vector<8x32xf32>
    %82 = arith.addf %61, %81 : vector<8x32xf32>
    %83 = vector.extract_strided_slice %14 {offsets = [0, 24], sizes = [8, 8], strides = [1, 1]} : vector<8x32xbf16> to vector<8x8xbf16>
    %84 = vector.extract_strided_slice %15 {offsets = [0, 24], sizes = [8, 8], strides = [1, 1]} : vector<8x32xbf16> to vector<8x8xbf16>
    %cst_32 = arith.constant dense<0.000000e+00> : vector<8x8xf32>
    %85 = tpu.matmul %83, %84, %cst_32 {dimension_numbers = #tpu.dot_dimension_numbers<[1], [1], [0], [0], [0, 0, 1, 0], [], []>} : vector<8x8xbf16>, vector<8x8xbf16>, vector<8x8xf32> -> vector<8x8xf32>
    %86 = arith.addf %85, %18 : vector<8x8xf32>
    %cst_33 = arith.constant dense<0xFF800000> : vector<8xf32>
    %87 = vector.multi_reduction <maximumf>, %86, %cst_33 [1] : vector<8x8xf32> to vector<8xf32>
    %88 = vector.shape_cast %87 : vector<8xf32> to vector<8x1xf32>
    %89 = vector.broadcast %88 : vector<8x1xf32> to vector<8x8xf32>
    %90 = arith.subf %86, %89 : vector<8x8xf32>
    %91 = math.exp %90 : vector<8x8xf32>
    %cst_34 = arith.constant dense<0.000000e+00> : vector<8xf32>
    %92 = vector.multi_reduction <add>, %91, %cst_34 [1] : vector<8x8xf32> to vector<8xf32>
    %93 = vector.shape_cast %92 : vector<8xf32> to vector<8x1xf32>
    %94 = tpu.reciprocal %93 {approx = true} : vector<8x1xf32> -> vector<8x1xf32>
    %95 = vector.broadcast %94 : vector<8x1xf32> to vector<8x8xf32>
    %96 = arith.mulf %91, %95 : vector<8x8xf32>
    %97 = arith.truncf %96 : vector<8x8xf32> to vector<8x8xbf16>
    %98 = vector.extract_strided_slice %16 {offsets = [0, 24], sizes = [8, 8], strides = [1, 1]} : vector<8x32xbf16> to vector<8x8xbf16>
    %cst_35 = arith.constant dense<0.000000e+00> : vector<8x8xf32>
    %99 = tpu.matmul %97, %98, %cst_35 {dimension_numbers = #tpu.dot_dimension_numbers<[1], [0], [0], [1], [0, 0, 1, 1], [], []>} : vector<8x8xbf16>, vector<8x8xbf16>, vector<8x8xf32> -> vector<8x8xf32>
    %100 = arith.truncf %99 : vector<8x8xf32> to vector<8x8xbf16>
    %101 = vector.extract_strided_slice %17 {offsets = [24, 0], sizes = [8, 32], strides = [1, 1]} : vector<32x32xbf16> to vector<8x32xbf16>
    %cst_36 = arith.constant dense<0.000000e+00> : vector<8x32xf32>
    %102 = tpu.matmul %100, %101, %cst_36 {dimension_numbers = #tpu.dot_dimension_numbers<[1], [0], [0], [1], [0, 0, 1, 1], [], []>} : vector<8x8xbf16>, vector<8x32xbf16>, vector<8x32xf32> -> vector<8x32xf32>
    %103 = arith.addf %82, %102 : vector<8x32xf32>
    %c0_37 = arith.constant 0 : index
    %c0_38 = arith.constant 0 : index
    %104 = vector.load %arg7[%c0_37, %c0_38] : memref<1x32xf32, #tpu.memory_space<vmem>>, vector<1x32xf32>
    %105 = vector.broadcast %104 : vector<1x32xf32> to vector<8x32xf32>
    %106 = arith.addf %103, %105 : vector<8x32xf32>
    %107 = arith.extf %6 : vector<8x32xbf16> to vector<8x32xf32>
    %108 = arith.addf %106, %107 : vector<8x32xf32>
    %c0_39 = arith.constant 0 : index
    %c0_40 = arith.constant 0 : index
    %109 = vector.load %arg8[%c0_39, %c0_40] : memref<1x32xf32, #tpu.memory_space<vmem>>, vector<1x32xf32>
    %c0_41 = arith.constant 0 : index
    %c0_42 = arith.constant 0 : index
    %110 = vector.load %arg9[%c0_41, %c0_42] : memref<1x32xf32, #tpu.memory_space<vmem>>, vector<1x32xf32>
    %cst_43 = arith.constant dense<0.000000e+00> : vector<8xf32>
    %111 = vector.multi_reduction <add>, %108, %cst_43 [1] : vector<8x32xf32> to vector<8xf32>
    %112 = vector.shape_cast %111 : vector<8xf32> to vector<8x1xf32>
    %cst_44 = arith.constant 3.200000e+01 : f32
    %113 = vector.broadcast %cst_44 : f32 to vector<8x1xf32>
    %114 = arith.divf %112, %113 : vector<8x1xf32>
    %115 = vector.broadcast %114 : vector<8x1xf32> to vector<8x32xf32>
    %116 = arith.subf %108, %115 : vector<8x32xf32>
    %117 = arith.mulf %116, %116 : vector<8x32xf32>
    %cst_45 = arith.constant dense<0.000000e+00> : vector<8xf32>
    %118 = vector.multi_reduction <add>, %117, %cst_45 [1] : vector<8x32xf32> to vector<8xf32>
    %119 = vector.shape_cast %118 : vector<8xf32> to vector<8x1xf32>
    %cst_46 = arith.constant 3.200000e+01 : f32
    %120 = vector.broadcast %cst_46 : f32 to vector<8x1xf32>
    %121 = arith.divf %119, %120 : vector<8x1xf32>
    %122 = vector.broadcast %114 : vector<8x1xf32> to vector<8x32xf32>
    %123 = arith.subf %108, %122 : vector<8x32xf32>
    %cst_47 = arith.constant 9.99999974E-6 : f32
    %124 = vector.broadcast %cst_47 : f32 to vector<8x1xf32>
    %125 = arith.addf %121, %124 : vector<8x1xf32>
    %126 = math.rsqrt %125 : vector<8x1xf32>
    %127 = vector.broadcast %126 : vector<8x1xf32> to vector<8x32xf32>
    %128 = arith.mulf %123, %127 : vector<8x32xf32>
    %129 = vector.broadcast %109 : vector<1x32xf32> to vector<8x32xf32>
    %130 = arith.mulf %128, %129 : vector<8x32xf32>
    %131 = vector.broadcast %110 : vector<1x32xf32> to vector<8x32xf32>
    %132 = arith.addf %130, %131 : vector<8x32xf32>
    %133 = arith.truncf %132 : vector<8x32xf32> to vector<8x32xbf16>
    %c0_48 = arith.constant 0 : index
    %c0_49 = arith.constant 0 : index
    %c0_50 = arith.constant 0 : index
    %134 = vector.load %arg11[%c0_48, %c0_49, %c0_50] : memref<1x8x32xbf16, #tpu.memory_space<vmem>>, vector<1x8x32xbf16>
    %135 = vector.shape_cast %134 : vector<1x8x32xbf16> to vector<8x32xbf16>
    %136 = vector.shape_cast %133 : vector<8x32xbf16> to vector<1x8x32xbf16>
    tpu.vector_store %arg11[%c0_48, %c0_49, %c0_50], %136 {strides = array<i32>} : memref<1x8x32xbf16, #tpu.memory_space<vmem>>, vector<1x8x32xbf16>,
    return
  }
  func.func @transform_0(%arg0: i32, %arg1: i32) -> (i32, i32, i32) {
    %c0_i32 = arith.constant 0 : i32
    %c0_i32_0 = arith.constant 0 : i32
    %c0_i32_1 = arith.constant 0 : i32
    return %arg0, %c0_i32, %c0_i32_0 : i32, i32, i32
  }
  func.func @transform_1(%arg0: i32, %arg1: i32) -> (i32, i32, i32) {
    %c0_i32 = arith.constant 0 : i32
    %c0_i32_0 = arith.constant 0 : i32
    return %arg0, %arg1, %c0_i32 : i32, i32, i32
  }
  func.func @transform_2(%arg0: i32, %arg1: i32) -> (i32, i32) {
    %c0_i32 = arith.constant 0 : i32
    %c0_i32_0 = arith.constant 0 : i32
    %c0_i32_1 = arith.constant 0 : i32
    return %c0_i32, %c0_i32_0 : i32, i32
  }
  func.func @transform_3(%arg0: i32, %arg1: i32) -> (i32, i32) {
    %c0_i32 = arith.constant 0 : i32
    %c0_i32_0 = arith.constant 0 : i32
    %c0_i32_1 = arith.constant 0 : i32
    return %c0_i32, %c0_i32_0 : i32, i32
  }
  func.func @transform_4(%arg0: i32, %arg1: i32) -> (i32, i32) {
    %c0_i32 = arith.constant 0 : i32
    %c0_i32_0 = arith.constant 0 : i32
    %c0_i32_1 = arith.constant 0 : i32
    return %c0_i32, %c0_i32_0 : i32, i32
  }
  func.func @transform_5(%arg0: i32, %arg1: i32) -> (i32, i32) {
    %c0_i32 = arith.constant 0 : i32
    %c0_i32_0 = arith.constant 0 : i32
    %c0_i32_1 = arith.constant 0 : i32
    return %c0_i32, %c0_i32_0 : i32, i32
  }
  func.func @transform_6(%arg0: i32, %arg1: i32) -> (i32, i32) {
    %c0_i32 = arith.constant 0 : i32
    %c0_i32_0 = arith.constant 0 : i32
    %c0_i32_1 = arith.constant 0 : i32
    return %c0_i32, %c0_i32_0 : i32, i32
  }
  func.func @transform_7(%arg0: i32, %arg1: i32) -> (i32, i32) {
    %c0_i32 = arith.constant 0 : i32
    %c0_i32_0 = arith.constant 0 : i32
    %c0_i32_1 = arith.constant 0 : i32
    return %c0_i32, %c0_i32_0 : i32, i32
  }
  func.func @transform_8(%arg0: i32, %arg1: i32) -> (i32, i32) {
    %c0_i32 = arith.constant 0 : i32
    %c0_i32_0 = arith.constant 0 : i32
    return %arg1, %c0_i32 : i32, i32
  }
  func.func @transform_9(%arg0: i32, %arg1: i32) -> (i32, i32, i32) {
    %c0_i32 = arith.constant 0 : i32
    %c0_i32_0 = arith.constant 0 : i32
    return %arg0, %arg1, %c0_i32 : i32, i32, i32
  }
}

module attributes {stable_mosaic.version = 11 : i64} {
  func.func @kernel(%arg0: i32, %arg1: i32, %arg2: memref<1x8x32xbf16, #tpu.memory_space<vmem>>, %arg3: memref<1x8x32xbf16, #tpu.memory_space<vmem>>, %arg4: memref<32x32xbf16, #tpu.memory_space<vmem>>, %arg5: memref<1x32xf32, #tpu.memory_space<vmem>>, %arg6: memref<32x64xbf16, #tpu.memory_space<vmem>>, %arg7: memref<1x64xf32, #tpu.memory_space<vmem>>, %arg8: memref<32x32xbf16, #tpu.memory_space<vmem>>, %arg9: memref<1x32xf32, #tpu.memory_space<vmem>>, %arg10: memref<1x32xf32, #tpu.memory_space<vmem>>, %arg11: memref<1x32xf32, #tpu.memory_space<vmem>>, %arg12: memref<1x8x32xbf16, #tpu.memory_space<vmem>>, %arg13: memref<8x32xbf16, #tpu.memory_space<vmem>>, %arg14: memref<8x32xbf16, #tpu.memory_space<vmem>>) attributes {dimension_semantics = [#tpu.dimension_semantics<parallel>, #tpu.dimension_semantics<arbitrary>], iteration_bounds = array<i64: 2, 1>, scalar_prefetch = 0 : i64, scratch_operands = 2 : i64, tpu.core_type = #tpu.core_type<tc>, window_params = [{transform_indices = @transform_0, window_bounds = array<i64: 1, 8, 32>}, {transform_indices = @transform_1, window_bounds = array<i64: 1, 8, 32>}, {pipeline_mode = #tpu.pipeline_mode<synchronous>, transform_indices = @transform_2, window_bounds = array<i64: 32, 32>}, {pipeline_mode = #tpu.pipeline_mode<synchronous>, transform_indices = @transform_3, window_bounds = array<i64: 1, 32>}, {pipeline_mode = #tpu.pipeline_mode<synchronous>, transform_indices = @transform_4, window_bounds = array<i64: 32, 64>}, {pipeline_mode = #tpu.pipeline_mode<synchronous>, transform_indices = @transform_5, window_bounds = array<i64: 1, 64>}, {pipeline_mode = #tpu.pipeline_mode<synchronous>, transform_indices = @transform_6, window_bounds = array<i64: 32, 32>}, {pipeline_mode = #tpu.pipeline_mode<synchronous>, transform_indices = @transform_7, window_bounds = array<i64: 1, 32>}, {pipeline_mode = #tpu.pipeline_mode<synchronous>, transform_indices = @transform_8, window_bounds = array<i64: 1, 32>}, {pipeline_mode = #tpu.pipeline_mode<synchronous>, transform_indices = @transform_9, window_bounds = array<i64: 1, 32>}, {transform_indices = @transform_10, window_bounds = array<i64: 1, 8, 32>}]} {
    %c0_i32 = arith.constant 0 : i32
    %0 = arith.cmpi eq, %arg1, %c0_i32 : i32
    %1 = arith.extui %0 : i1 to i32
    %c0_i32_0 = arith.constant 0 : i32
    %2 = arith.cmpi ne, %1, %c0_i32_0 : i32
    scf.if %2 {
      %c0_49 = arith.constant 0 : index
      %c0_50 = arith.constant 0 : index
      %c0_51 = arith.constant 0 : index
      %130 = vector.load %arg2[%c0_49, %c0_50, %c0_51] : memref<1x8x32xbf16, #tpu.memory_space<vmem>>, vector<1x8x32xbf16>
      %131 = vector.shape_cast %130 : vector<1x8x32xbf16> to vector<8x32xbf16>
      %c0_52 = arith.constant 0 : index
      %c0_53 = arith.constant 0 : index
      %132 = vector.load %arg6[%c0_52, %c0_53] : memref<32x64xbf16, #tpu.memory_space<vmem>>, vector<32x64xbf16>
      %c0_54 = arith.constant 0 : index
      %c0_55 = arith.constant 0 : index
      %133 = vector.load %arg7[%c0_54, %c0_55] : memref<1x64xf32, #tpu.memory_space<vmem>>, vector<1x64xf32>
      %134 = vector.extract_strided_slice %132 {offsets = [0, 0], sizes = [32, 32], strides = [1, 1]} : vector<32x64xbf16> to vector<32x32xbf16>
      %cst_56 = arith.constant dense<0.000000e+00> : vector<8x32xf32>
      %135 = tpu.matmul %131, %134, %cst_56 {dimension_numbers = #tpu.dot_dimension_numbers<[1], [0], [0], [1], [0, 0, 1, 1], [], []>} : vector<8x32xbf16>, vector<32x32xbf16>, vector<8x32xf32> -> vector<8x32xf32>
      %136 = vector.extract_strided_slice %133 {offsets = [0, 0], sizes = [1, 32], strides = [1, 1]} : vector<1x64xf32> to vector<1x32xf32>
      %137 = vector.broadcast %136 : vector<1x32xf32> to vector<8x32xf32>
      %138 = arith.addf %135, %137 : vector<8x32xf32>
      %139 = vector.extract_strided_slice %132 {offsets = [0, 32], sizes = [32, 32], strides = [1, 1]} : vector<32x64xbf16> to vector<32x32xbf16>
      %cst_57 = arith.constant dense<0.000000e+00> : vector<8x32xf32>
      %140 = tpu.matmul %131, %139, %cst_57 {dimension_numbers = #tpu.dot_dimension_numbers<[1], [0], [0], [1], [0, 0, 1, 1], [], []>} : vector<8x32xbf16>, vector<32x32xbf16>, vector<8x32xf32> -> vector<8x32xf32>
      %141 = vector.extract_strided_slice %133 {offsets = [0, 32], sizes = [1, 32], strides = [1, 1]} : vector<1x64xf32> to vector<1x32xf32>
      %142 = vector.broadcast %141 : vector<1x32xf32> to vector<8x32xf32>
      %143 = arith.addf %140, %142 : vector<8x32xf32>
      %144 = arith.truncf %138 : vector<8x32xf32> to vector<8x32xbf16>
      %c0_58 = arith.constant 0 : index
      %c0_59 = arith.constant 0 : index
      %145 = vector.load %arg13[%c0_58, %c0_59] : memref<8x32xbf16, #tpu.memory_space<vmem>>, vector<8x32xbf16>
      tpu.vector_store %arg13[%c0_58, %c0_59], %144 {strides = array<i32>} : memref<8x32xbf16, #tpu.memory_space<vmem>>, vector<8x32xbf16>,
      %146 = arith.truncf %143 : vector<8x32xf32> to vector<8x32xbf16>
      %c0_60 = arith.constant 0 : index
      %c0_61 = arith.constant 0 : index
      %147 = vector.load %arg14[%c0_60, %c0_61] : memref<8x32xbf16, #tpu.memory_space<vmem>>, vector<8x32xbf16>
      tpu.vector_store %arg14[%c0_60, %c0_61], %146 {strides = array<i32>} : memref<8x32xbf16, #tpu.memory_space<vmem>>, vector<8x32xbf16>,
    } else {
    }
    %c0 = arith.constant 0 : index
    %c0_1 = arith.constant 0 : index
    %c0_2 = arith.constant 0 : index
    %3 = vector.load %arg3[%c0, %c0_1, %c0_2] : memref<1x8x32xbf16, #tpu.memory_space<vmem>>, vector<1x8x32xbf16>
    %4 = vector.shape_cast %3 : vector<1x8x32xbf16> to vector<8x32xbf16>
    %c0_3 = arith.constant 0 : index
    %c0_4 = arith.constant 0 : index
    %5 = vector.load %arg4[%c0_3, %c0_4] : memref<32x32xbf16, #tpu.memory_space<vmem>>, vector<32x32xbf16>
    %cst = arith.constant dense<0.000000e+00> : vector<8x32xf32>
    %6 = tpu.matmul %4, %5, %cst {dimension_numbers = #tpu.dot_dimension_numbers<[1], [0], [0], [1], [0, 0, 1, 1], [], []>} : vector<8x32xbf16>, vector<32x32xbf16>, vector<8x32xf32> -> vector<8x32xf32>
    %c0_5 = arith.constant 0 : index
    %c0_6 = arith.constant 0 : index
    %7 = vector.load %arg5[%c0_5, %c0_6] : memref<1x32xf32, #tpu.memory_space<vmem>>, vector<1x32xf32>
    %8 = vector.broadcast %7 : vector<1x32xf32> to vector<8x32xf32>
    %9 = arith.addf %6, %8 : vector<8x32xf32>
    %cst_7 = arith.constant 0.353553385 : f32
    %10 = vector.broadcast %cst_7 : f32 to vector<8x32xf32>
    %11 = arith.mulf %9, %10 : vector<8x32xf32>
    %12 = arith.truncf %11 : vector<8x32xf32> to vector<8x32xbf16>
    %c0_8 = arith.constant 0 : index
    %c0_9 = arith.constant 0 : index
    %13 = vector.load %arg13[%c0_8, %c0_9] : memref<8x32xbf16, #tpu.memory_space<vmem>>, vector<8x32xbf16>
    %c0_10 = arith.constant 0 : index
    %c0_11 = arith.constant 0 : index
    %14 = vector.load %arg14[%c0_10, %c0_11] : memref<8x32xbf16, #tpu.memory_space<vmem>>, vector<8x32xbf16>
    %c0_12 = arith.constant 0 : index
    %c0_13 = arith.constant 0 : index
    %15 = vector.load %arg8[%c0_12, %c0_13] : memref<32x32xbf16, #tpu.memory_space<vmem>>, vector<32x32xbf16>
    %cst_14 = arith.constant 0.000000e+00 : f32
    %16 = vector.broadcast %cst_14 : f32 to vector<8x32xf32>
    %17 = vector.extract_strided_slice %12 {offsets = [0, 0], sizes = [8, 8], strides = [1, 1]} : vector<8x32xbf16> to vector<8x8xbf16>
    %18 = vector.extract_strided_slice %13 {offsets = [0, 0], sizes = [8, 8], strides = [1, 1]} : vector<8x32xbf16> to vector<8x8xbf16>
    %cst_15 = arith.constant dense<0.000000e+00> : vector<8x8xf32>
    %19 = tpu.matmul %17, %18, %cst_15 {dimension_numbers = #tpu.dot_dimension_numbers<[1], [1], [0], [0], [0, 0, 1, 0], [], []>} : vector<8x8xbf16>, vector<8x8xbf16>, vector<8x8xf32> -> vector<8x8xf32>
    %cst_16 = arith.constant dense<0xFF800000> : vector<8xf32>
    %20 = vector.multi_reduction <maximumf>, %19, %cst_16 [1] : vector<8x8xf32> to vector<8xf32>
    %21 = vector.shape_cast %20 : vector<8xf32> to vector<8x1xf32>
    %22 = vector.broadcast %21 : vector<8x1xf32> to vector<8x8xf32>
    %23 = arith.subf %19, %22 : vector<8x8xf32>
    %24 = math.exp %23 : vector<8x8xf32>
    %cst_17 = arith.constant dense<0.000000e+00> : vector<8xf32>
    %25 = vector.multi_reduction <add>, %24, %cst_17 [1] : vector<8x8xf32> to vector<8xf32>
    %26 = vector.shape_cast %25 : vector<8xf32> to vector<8x1xf32>
    %27 = tpu.reciprocal %26 {approx = true} : vector<8x1xf32> -> vector<8x1xf32>
    %28 = vector.broadcast %27 : vector<8x1xf32> to vector<8x8xf32>
    %29 = arith.mulf %24, %28 : vector<8x8xf32>
    %30 = arith.truncf %29 : vector<8x8xf32> to vector<8x8xbf16>
    %31 = vector.extract_strided_slice %14 {offsets = [0, 0], sizes = [8, 8], strides = [1, 1]} : vector<8x32xbf16> to vector<8x8xbf16>
    %cst_18 = arith.constant dense<0.000000e+00> : vector<8x8xf32>
    %32 = tpu.matmul %30, %31, %cst_18 {dimension_numbers = #tpu.dot_dimension_numbers<[1], [0], [0], [1], [0, 0, 1, 1], [], []>} : vector<8x8xbf16>, vector<8x8xbf16>, vector<8x8xf32> -> vector<8x8xf32>
    %33 = arith.truncf %32 : vector<8x8xf32> to vector<8x8xbf16>
    %34 = vector.extract_strided_slice %15 {offsets = [0, 0], sizes = [8, 32], strides = [1, 1]} : vector<32x32xbf16> to vector<8x32xbf16>
    %cst_19 = arith.constant dense<0.000000e+00> : vector<8x32xf32>
    %35 = tpu.matmul %33, %34, %cst_19 {dimension_numbers = #tpu.dot_dimension_numbers<[1], [0], [0], [1], [0, 0, 1, 1], [], []>} : vector<8x8xbf16>, vector<8x32xbf16>, vector<8x32xf32> -> vector<8x32xf32>
    %36 = arith.addf %16, %35 : vector<8x32xf32>
    %37 = vector.extract_strided_slice %12 {offsets = [0, 8], sizes = [8, 8], strides = [1, 1]} : vector<8x32xbf16> to vector<8x8xbf16>
    %38 = vector.extract_strided_slice %13 {offsets = [0, 8], sizes = [8, 8], strides = [1, 1]} : vector<8x32xbf16> to vector<8x8xbf16>
    %cst_20 = arith.constant dense<0.000000e+00> : vector<8x8xf32>
    %39 = tpu.matmul %37, %38, %cst_20 {dimension_numbers = #tpu.dot_dimension_numbers<[1], [1], [0], [0], [0, 0, 1, 0], [], []>} : vector<8x8xbf16>, vector<8x8xbf16>, vector<8x8xf32> -> vector<8x8xf32>
    %cst_21 = arith.constant dense<0xFF800000> : vector<8xf32>
    %40 = vector.multi_reduction <maximumf>, %39, %cst_21 [1] : vector<8x8xf32> to vector<8xf32>
    %41 = vector.shape_cast %40 : vector<8xf32> to vector<8x1xf32>
    %42 = vector.broadcast %41 : vector<8x1xf32> to vector<8x8xf32>
    %43 = arith.subf %39, %42 : vector<8x8xf32>
    %44 = math.exp %43 : vector<8x8xf32>
    %cst_22 = arith.constant dense<0.000000e+00> : vector<8xf32>
    %45 = vector.multi_reduction <add>, %44, %cst_22 [1] : vector<8x8xf32> to vector<8xf32>
    %46 = vector.shape_cast %45 : vector<8xf32> to vector<8x1xf32>
    %47 = tpu.reciprocal %46 {approx = true} : vector<8x1xf32> -> vector<8x1xf32>
    %48 = vector.broadcast %47 : vector<8x1xf32> to vector<8x8xf32>
    %49 = arith.mulf %44, %48 : vector<8x8xf32>
    %50 = arith.truncf %49 : vector<8x8xf32> to vector<8x8xbf16>
    %51 = vector.extract_strided_slice %14 {offsets = [0, 8], sizes = [8, 8], strides = [1, 1]} : vector<8x32xbf16> to vector<8x8xbf16>
    %cst_23 = arith.constant dense<0.000000e+00> : vector<8x8xf32>
    %52 = tpu.matmul %50, %51, %cst_23 {dimension_numbers = #tpu.dot_dimension_numbers<[1], [0], [0], [1], [0, 0, 1, 1], [], []>} : vector<8x8xbf16>, vector<8x8xbf16>, vector<8x8xf32> -> vector<8x8xf32>
    %53 = arith.truncf %52 : vector<8x8xf32> to vector<8x8xbf16>
    %54 = vector.extract_strided_slice %15 {offsets = [8, 0], sizes = [8, 32], strides = [1, 1]} : vector<32x32xbf16> to vector<8x32xbf16>
    %cst_24 = arith.constant dense<0.000000e+00> : vector<8x32xf32>
    %55 = tpu.matmul %53, %54, %cst_24 {dimension_numbers = #tpu.dot_dimension_numbers<[1], [0], [0], [1], [0, 0, 1, 1], [], []>} : vector<8x8xbf16>, vector<8x32xbf16>, vector<8x32xf32> -> vector<8x32xf32>
    %56 = arith.addf %36, %55 : vector<8x32xf32>
    %57 = vector.extract_strided_slice %12 {offsets = [0, 16], sizes = [8, 8], strides = [1, 1]} : vector<8x32xbf16> to vector<8x8xbf16>
    %58 = vector.extract_strided_slice %13 {offsets = [0, 16], sizes = [8, 8], strides = [1, 1]} : vector<8x32xbf16> to vector<8x8xbf16>
    %cst_25 = arith.constant dense<0.000000e+00> : vector<8x8xf32>
    %59 = tpu.matmul %57, %58, %cst_25 {dimension_numbers = #tpu.dot_dimension_numbers<[1], [1], [0], [0], [0, 0, 1, 0], [], []>} : vector<8x8xbf16>, vector<8x8xbf16>, vector<8x8xf32> -> vector<8x8xf32>
    %cst_26 = arith.constant dense<0xFF800000> : vector<8xf32>
    %60 = vector.multi_reduction <maximumf>, %59, %cst_26 [1] : vector<8x8xf32> to vector<8xf32>
    %61 = vector.shape_cast %60 : vector<8xf32> to vector<8x1xf32>
    %62 = vector.broadcast %61 : vector<8x1xf32> to vector<8x8xf32>
    %63 = arith.subf %59, %62 : vector<8x8xf32>
    %64 = math.exp %63 : vector<8x8xf32>
    %cst_27 = arith.constant dense<0.000000e+00> : vector<8xf32>
    %65 = vector.multi_reduction <add>, %64, %cst_27 [1] : vector<8x8xf32> to vector<8xf32>
    %66 = vector.shape_cast %65 : vector<8xf32> to vector<8x1xf32>
    %67 = tpu.reciprocal %66 {approx = true} : vector<8x1xf32> -> vector<8x1xf32>
    %68 = vector.broadcast %67 : vector<8x1xf32> to vector<8x8xf32>
    %69 = arith.mulf %64, %68 : vector<8x8xf32>
    %70 = arith.truncf %69 : vector<8x8xf32> to vector<8x8xbf16>
    %71 = vector.extract_strided_slice %14 {offsets = [0, 16], sizes = [8, 8], strides = [1, 1]} : vector<8x32xbf16> to vector<8x8xbf16>
    %cst_28 = arith.constant dense<0.000000e+00> : vector<8x8xf32>
    %72 = tpu.matmul %70, %71, %cst_28 {dimension_numbers = #tpu.dot_dimension_numbers<[1], [0], [0], [1], [0, 0, 1, 1], [], []>} : vector<8x8xbf16>, vector<8x8xbf16>, vector<8x8xf32> -> vector<8x8xf32>
    %73 = arith.truncf %72 : vector<8x8xf32> to vector<8x8xbf16>
    %74 = vector.extract_strided_slice %15 {offsets = [16, 0], sizes = [8, 32], strides = [1, 1]} : vector<32x32xbf16> to vector<8x32xbf16>
    %cst_29 = arith.constant dense<0.000000e+00> : vector<8x32xf32>
    %75 = tpu.matmul %73, %74, %cst_29 {dimension_numbers = #tpu.dot_dimension_numbers<[1], [0], [0], [1], [0, 0, 1, 1], [], []>} : vector<8x8xbf16>, vector<8x32xbf16>, vector<8x32xf32> -> vector<8x32xf32>
    %76 = arith.addf %56, %75 : vector<8x32xf32>
    %77 = vector.extract_strided_slice %12 {offsets = [0, 24], sizes = [8, 8], strides = [1, 1]} : vector<8x32xbf16> to vector<8x8xbf16>
    %78 = vector.extract_strided_slice %13 {offsets = [0, 24], sizes = [8, 8], strides = [1, 1]} : vector<8x32xbf16> to vector<8x8xbf16>
    %cst_30 = arith.constant dense<0.000000e+00> : vector<8x8xf32>
    %79 = tpu.matmul %77, %78, %cst_30 {dimension_numbers = #tpu.dot_dimension_numbers<[1], [1], [0], [0], [0, 0, 1, 0], [], []>} : vector<8x8xbf16>, vector<8x8xbf16>, vector<8x8xf32> -> vector<8x8xf32>
    %cst_31 = arith.constant dense<0xFF800000> : vector<8xf32>
    %80 = vector.multi_reduction <maximumf>, %79, %cst_31 [1] : vector<8x8xf32> to vector<8xf32>
    %81 = vector.shape_cast %80 : vector<8xf32> to vector<8x1xf32>
    %82 = vector.broadcast %81 : vector<8x1xf32> to vector<8x8xf32>
    %83 = arith.subf %79, %82 : vector<8x8xf32>
    %84 = math.exp %83 : vector<8x8xf32>
    %cst_32 = arith.constant dense<0.000000e+00> : vector<8xf32>
    %85 = vector.multi_reduction <add>, %84, %cst_32 [1] : vector<8x8xf32> to vector<8xf32>
    %86 = vector.shape_cast %85 : vector<8xf32> to vector<8x1xf32>
    %87 = tpu.reciprocal %86 {approx = true} : vector<8x1xf32> -> vector<8x1xf32>
    %88 = vector.broadcast %87 : vector<8x1xf32> to vector<8x8xf32>
    %89 = arith.mulf %84, %88 : vector<8x8xf32>
    %90 = arith.truncf %89 : vector<8x8xf32> to vector<8x8xbf16>
    %91 = vector.extract_strided_slice %14 {offsets = [0, 24], sizes = [8, 8], strides = [1, 1]} : vector<8x32xbf16> to vector<8x8xbf16>
    %cst_33 = arith.constant dense<0.000000e+00> : vector<8x8xf32>
    %92 = tpu.matmul %90, %91, %cst_33 {dimension_numbers = #tpu.dot_dimension_numbers<[1], [0], [0], [1], [0, 0, 1, 1], [], []>} : vector<8x8xbf16>, vector<8x8xbf16>, vector<8x8xf32> -> vector<8x8xf32>
    %93 = arith.truncf %92 : vector<8x8xf32> to vector<8x8xbf16>
    %94 = vector.extract_strided_slice %15 {offsets = [24, 0], sizes = [8, 32], strides = [1, 1]} : vector<32x32xbf16> to vector<8x32xbf16>
    %cst_34 = arith.constant dense<0.000000e+00> : vector<8x32xf32>
    %95 = tpu.matmul %93, %94, %cst_34 {dimension_numbers = #tpu.dot_dimension_numbers<[1], [0], [0], [1], [0, 0, 1, 1], [], []>} : vector<8x8xbf16>, vector<8x32xbf16>, vector<8x32xf32> -> vector<8x32xf32>
    %96 = arith.addf %76, %95 : vector<8x32xf32>
    %c0_35 = arith.constant 0 : index
    %c0_36 = arith.constant 0 : index
    %97 = vector.load %arg9[%c0_35, %c0_36] : memref<1x32xf32, #tpu.memory_space<vmem>>, vector<1x32xf32>
    %98 = vector.broadcast %97 : vector<1x32xf32> to vector<8x32xf32>
    %99 = arith.addf %96, %98 : vector<8x32xf32>
    %100 = arith.extf %4 : vector<8x32xbf16> to vector<8x32xf32>
    %101 = arith.addf %99, %100 : vector<8x32xf32>
    %c0_37 = arith.constant 0 : index
    %c0_38 = arith.constant 0 : index
    %102 = vector.load %arg10[%c0_37, %c0_38] : memref<1x32xf32, #tpu.memory_space<vmem>>, vector<1x32xf32>
    %c0_39 = arith.constant 0 : index
    %c0_40 = arith.constant 0 : index
    %103 = vector.load %arg11[%c0_39, %c0_40] : memref<1x32xf32, #tpu.memory_space<vmem>>, vector<1x32xf32>
    %cst_41 = arith.constant dense<0.000000e+00> : vector<8xf32>
    %104 = vector.multi_reduction <add>, %101, %cst_41 [1] : vector<8x32xf32> to vector<8xf32>
    %105 = vector.shape_cast %104 : vector<8xf32> to vector<8x1xf32>
    %cst_42 = arith.constant 3.200000e+01 : f32
    %106 = vector.broadcast %cst_42 : f32 to vector<8x1xf32>
    %107 = arith.divf %105, %106 : vector<8x1xf32>
    %108 = vector.broadcast %107 : vector<8x1xf32> to vector<8x32xf32>
    %109 = arith.subf %101, %108 : vector<8x32xf32>
    %110 = arith.mulf %109, %109 : vector<8x32xf32>
    %cst_43 = arith.constant dense<0.000000e+00> : vector<8xf32>
    %111 = vector.multi_reduction <add>, %110, %cst_43 [1] : vector<8x32xf32> to vector<8xf32>
    %112 = vector.shape_cast %111 : vector<8xf32> to vector<8x1xf32>
    %cst_44 = arith.constant 3.200000e+01 : f32
    %113 = vector.broadcast %cst_44 : f32 to vector<8x1xf32>
    %114 = arith.divf %112, %113 : vector<8x1xf32>
    %115 = vector.broadcast %107 : vector<8x1xf32> to vector<8x32xf32>
    %116 = arith.subf %101, %115 : vector<8x32xf32>
    %cst_45 = arith.constant 9.99999974E-6 : f32
    %117 = vector.broadcast %cst_45 : f32 to vector<8x1xf32>
    %118 = arith.addf %114, %117 : vector<8x1xf32>
    %119 = math.rsqrt %118 : vector<8x1xf32>
    %120 = vector.broadcast %119 : vector<8x1xf32> to vector<8x32xf32>
    %121 = arith.mulf %116, %120 : vector<8x32xf32>
    %122 = vector.broadcast %102 : vector<1x32xf32> to vector<8x32xf32>
    %123 = arith.mulf %121, %122 : vector<8x32xf32>
    %124 = vector.broadcast %103 : vector<1x32xf32> to vector<8x32xf32>
    %125 = arith.addf %123, %124 : vector<8x32xf32>
    %126 = arith.truncf %125 : vector<8x32xf32> to vector<8x32xbf16>
    %c0_46 = arith.constant 0 : index
    %c0_47 = arith.constant 0 : index
    %c0_48 = arith.constant 0 : index
    %127 = vector.load %arg12[%c0_46, %c0_47, %c0_48] : memref<1x8x32xbf16, #tpu.memory_space<vmem>>, vector<1x8x32xbf16>
    %128 = vector.shape_cast %127 : vector<1x8x32xbf16> to vector<8x32xbf16>
    %129 = vector.shape_cast %126 : vector<8x32xbf16> to vector<1x8x32xbf16>
    tpu.vector_store %arg12[%c0_46, %c0_47, %c0_48], %129 {strides = array<i32>} : memref<1x8x32xbf16, #tpu.memory_space<vmem>>, vector<1x8x32xbf16>,
    return
  }
  func.func @transform_0(%arg0: i32, %arg1: i32) -> (i32, i32, i32) {
    %c0_i32 = arith.constant 0 : i32
    %c0_i32_0 = arith.constant 0 : i32
    %c0_i32_1 = arith.constant 0 : i32
    return %arg0, %c0_i32, %c0_i32_0 : i32, i32, i32
  }
  func.func @transform_1(%arg0: i32, %arg1: i32) -> (i32, i32, i32) {
    %c0_i32 = arith.constant 0 : i32
    %c0_i32_0 = arith.constant 0 : i32
    return %arg0, %arg1, %c0_i32 : i32, i32, i32
  }
  func.func @transform_2(%arg0: i32, %arg1: i32) -> (i32, i32) {
    %c0_i32 = arith.constant 0 : i32
    %c0_i32_0 = arith.constant 0 : i32
    %c0_i32_1 = arith.constant 0 : i32
    return %c0_i32, %c0_i32_0 : i32, i32
  }
  func.func @transform_3(%arg0: i32, %arg1: i32) -> (i32, i32) {
    %c0_i32 = arith.constant 0 : i32
    %c0_i32_0 = arith.constant 0 : i32
    %c0_i32_1 = arith.constant 0 : i32
    return %c0_i32, %c0_i32_0 : i32, i32
  }
  func.func @transform_4(%arg0: i32, %arg1: i32) -> (i32, i32) {
    %c0_i32 = arith.constant 0 : i32
    %c0_i32_0 = arith.constant 0 : i32
    %c0_i32_1 = arith.constant 0 : i32
    return %c0_i32, %c0_i32_0 : i32, i32
  }
  func.func @transform_5(%arg0: i32, %arg1: i32) -> (i32, i32) {
    %c0_i32 = arith.constant 0 : i32
    %c0_i32_0 = arith.constant 0 : i32
    %c0_i32_1 = arith.constant 0 : i32
    return %c0_i32, %c0_i32_0 : i32, i32
  }
  func.func @transform_6(%arg0: i32, %arg1: i32) -> (i32, i32) {
    %c0_i32 = arith.constant 0 : i32
    %c0_i32_0 = arith.constant 0 : i32
    %c0_i32_1 = arith.constant 0 : i32
    return %c0_i32, %c0_i32_0 : i32, i32
  }
  func.func @transform_7(%arg0: i32, %arg1: i32) -> (i32, i32) {
    %c0_i32 = arith.constant 0 : i32
    %c0_i32_0 = arith.constant 0 : i32
    %c0_i32_1 = arith.constant 0 : i32
    return %c0_i32, %c0_i32_0 : i32, i32
  }
  func.func @transform_8(%arg0: i32, %arg1: i32) -> (i32, i32) {
    %c0_i32 = arith.constant 0 : i32
    %c0_i32_0 = arith.constant 0 : i32
    %c0_i32_1 = arith.constant 0 : i32
    return %c0_i32, %c0_i32_0 : i32, i32
  }
  func.func @transform_9(%arg0: i32, %arg1: i32) -> (i32, i32) {
    %c0_i32 = arith.constant 0 : i32
    %c0_i32_0 = arith.constant 0 : i32
    %c0_i32_1 = arith.constant 0 : i32
    return %c0_i32, %c0_i32_0 : i32, i32
  }
  func.func @transform_10(%arg0: i32, %arg1: i32) -> (i32, i32, i32) {
    %c0_i32 = arith.constant 0 : i32
    %c0_i32_0 = arith.constant 0 : i32
    return %arg0, %arg1, %c0_i32 : i32, i32, i32
  }
}

</mosaic_0001>

<bundles_post_ra>
// kernel: detr_transformer.11
= control target key start
LH: loop header
LB: loop body
LE: loop exit
PB: predicated region body
PF: predicated region fallthrough
CT: control target
= control target key end

     0   :  { %vm54_vm0 = vcmask 261120   ;;  %vm111_vm1 = vcmask 523264   ;;  %v253_v27 = vmov 32.0   ;;  %vm198_vm7 = vcmask 257024   ;;  %s341_s1 = inlined_call_operand.vmem [shape: bf16[32,64], index: 1, kind: input, shape index: {}]   ;;  %s342_s2 = inlined_call_operand.vmem [shape: f32[1,64], index: 2, kind: input, shape index: {}]   ;;  %s343_s0 = inlined_call_operand.vmem [shape: bf16[16,32], index: 0, kind: input, shape index: {}]   ;;  %s344_s4 = inlined_call_operand.vmem [shape: f32[1,32], index: 4, kind: input, shape index: {}]   ;;  %s345_s3 = inlined_call_operand.vmem [shape: bf16[64,32], index: 3, kind: input, shape index: {}]   ;;  %s346_s5 = inlined_call_operand.vmem [shape: f32[1,32], index: 5, kind: input, shape index: {}]   ;;  %s347_s6 = inlined_call_operand.vmem [shape: f32[1,32], index: 6, kind: input, shape index: {}]   ;;  %s348_s7 = inlined_call_operand.vmem [shape: bf16[16,32], index: 7, kind: output, shape index: {}]  }
   0x1   :  { %v237_v0 = vld [vmem:[%s341_s1 + $0x8] sm:$0xff]  ;;  %v236_v1 = vld [vmem:[%s341_s1] sm:$0xff]  ;;  %v241_v3 = vld [vmem:[%s345_s3 + $0x18] sm:$0xff]  ;;  %247 = vrcp.f32 %v253_v27 }
   0x2   :  { %64 = vmatpush.bf16.msra.mxu0 %v237_v0  ;;  %v235_v2 = vld [vmem:[%s343_s0] sm:$0xff]  ;;  %119 = vmatpush.bf16.msra.mxu1 %v241_v3  ;;  %v240_v4 = vld [vmem:[%s345_s3 + $0x10] sm:$0xff]  ;;  %v239_v5 = vld [vmem:[%s345_s3 + $0x8] sm:$0xff] }
   0x3   :  { %v238_v6 = vld [vmem:[%s345_s3] sm:$0xff] }
   0x4   :  { %v243_v8 = vld [vmem:[%s342_s2] ss:$0 sm:$0xff] }
   0x5   :  { %v27_v15 = vld [vmem:[%s343_s0] sm:$0xff]  }
   0x6   :  { %65 = vmatpush.bf16.msra.mxu0 %v236_v1  ;;  %120 = vmatpush.bf16.msra.mxu1 %v240_v4  ;;  %v244_v16 = vld [vmem:[%s344_s4] ss:$0 sm:$0xff]  ;;  %v129_v17 = vunpack.c.l.bf16 %v27_v15  ;;  %v130_v22 = vunpack.c.h.bf16 %v27_v15 }
   0x7   :  { %v248_v28 = vpop.eup %247  ;;  %v245_v58 = vld [vmem:[%s346_s5] ss:$0 sm:$0xff] }
   0x8   :  { %v142_v29 = vmul.f32 32.0, %v248_v28  ;;  %vm146_vm2 = vweird.f32 %v248_v28  ;;  %v246_v61 = vld [vmem:[%s347_s6] ss:$0 sm:$0xff] }
   0x9   :  { %217 = vmatmul.msk.bf16.vlgmr.msra.gmra.mxu0 %vm54_vm0, %v235_v2 }
   0xa   :  { %121 = vmatpush.bf16.msra.mxu1 %v239_v5  ;;  %v143_v30 = vsub.f32 1.0, %v142_v29 }
   0xc   :  { %v144_v31 = vmul.f32 %v248_v28, %v143_v30 }
   0xe   :  { %122 = vmatpush.bf16.msra.mxu1 %v238_v6  ;;  %v145_v32 = vadd.f32 %v248_v28, %v144_v31 }
  0x10   :  { %v147_v33 = vsel %vm146_vm2, %v248_v28, %v145_v32 }
  0x86   :  { %v67_v7 = vpop.f32.mrf.mxu0 }
  0x87   :  { %v68_v9 = vadd.f32 %v243_v8, %v67_v7 }
  0x89   :  { %v72_v12 = vmax.f32 %v68_v9, 0.0 }
  0x8e   :  { %v69_v10 = vpop.f32.mrf.mxu0 }
  0x8f   :  { %v70_v11 = vadd.f32 %v243_v8, %v69_v10 }
  0x91   :  { %v73_v13 = vmax.f32 %v70_v11, 0.0 }
  0x93   :  { %v74_v14 = vpack.c.bf16 %v73_v13, %v72_v12 }
  0x95   :  { %234 = vmatmul.msk.bf16.vlgmr.msra.gmra.mxu1 %vm111_vm1, %v74_v14 }
 0x112   :  { %v124_v18 = vpop.f32.mrf.mxu1 }
 0x113   :  { %v125_v19 = vadd.f32 %v244_v16, %v124_v18 }
 0x115   :  { %v131_v20 = vadd.f32 %v129_v17, %v125_v19 }
 0x117   :  { %v135_v21 = vsel %vm54_vm0, %v131_v20, 0.0 }
 0x118   :  { %136 = vadd.xlane.f32.xlu0 %v135_v21 }
 0x11a   :  { %v126_v23 = vpop.f32.mrf.mxu1 }
 0x11b   :  { %v127_v24 = vadd.f32 %v244_v16, %v126_v23 }
 0x11d   :  { %v132_v25 = vadd.f32 %v130_v22, %v127_v24 }
 0x11f   :  { %v138_v26 = vsel %vm54_vm0, %v132_v25, 0.0 }
 0x120   :  { %139 = vadd.xlane.f32.xlu0 %v138_v26 }
 0x18b   :  { %v137_v34 = vpop.xlane.xlu0 %136 }
 0x18c   :  { %v148_v35 = vmul.f32 %v147_v33, %v137_v34 }
 0x18e   :  { %v150_v36 = vsub.f32 %v131_v20, %v148_v35 }
 0x190   :  { %v152_v37 = vmul.f32 %v150_v36, %v150_v36 }
 0x192   :  { %v154_v38 = vsel %vm54_vm0, %v152_v37, 0.0 }
 0x193   :  { %155 = vadd.xlane.f32.xlu1 %v154_v38  ;;  %v140_v39 = vpop.xlane.xlu0 %139 }
 0x194   :  { %v149_v40 = vmul.f32 %v147_v33, %v140_v39 }
 0x196   :  { %v151_v41 = vsub.f32 %v132_v25, %v149_v40 }
 0x198   :  { %v153_v42 = vmul.f32 %v151_v41, %v151_v41 }
 0x19a   :  { %v157_v43 = vsel %vm54_vm0, %v153_v42, 0.0 }
 0x19b   :  { %158 = vadd.xlane.f32.xlu1 %v157_v43 }
 0x206   :  { %v156_v44 = vpop.xlane.xlu1 %155 }
 0x207   :  { %v160_v45 = vmul.f32 %v156_v44, %v147_v33 }
 0x209   :  { %v162_v46 = vadd.f32 1e-05, %v160_v45 }
 0x20b   :  { %249 = vrsqrt.f32 %v162_v46  ;;  %vm170_vm4 = vweird.f32 %v162_v46 }
 0x20e   :  { %v159_v47 = vpop.xlane.xlu1 %158 }
 0x20f   :  { %v161_v48 = vmul.f32 %v159_v47, %v147_v33 }
 0x211   :  { %v250_v49 = vpop.eup %249  ;;  %v163_v50 = vadd.f32 1e-05, %v161_v48 }
 0x212   :  { %v165_v51 = vmul.f32 %v250_v49, %v162_v46  ;;  %vm171_vm3 = vweird.f32 %v250_v49 }
 0x213   :  { %251 = vrsqrt.f32 %v163_v50  ;;  %vm172_vm5 = vmor %vm170_vm4, %vm171_vm3  ;;  %vm180_vm8 = vweird.f32 %v163_v50 }
 0x214   :  { %v166_v52 = vmul.f32 %v250_v49, %v165_v51 }
 0x216   :  { %v167_v53 = vmul.f32 0.5, %v166_v52 }
 0x218   :  { %v168_v54 = vsub.f32 1.5, %v167_v53 }
 0x219   :  { %v252_v55 = vpop.eup %251 }
 0x21a   :  { %v169_v56 = vmul.f32 %v250_v49, %v168_v54  ;;  %v175_v57 = vmul.f32 %v252_v55, %v163_v50  ;;  %vm181_vm6 = vweird.f32 %v252_v55 }
 0x21b   :  { %vm182_vm9 = vmor %vm180_vm8, %vm181_vm6 }
 0x21c   :  { %v173_v59 = vsel %vm172_vm5, %v250_v49, %v169_v56  ;;  %v176_v60 = vmul.f32 %v252_v55, %v175_v57 }
 0x21d   :  { %v184_v62 = vmul.f32 %v173_v59, %v150_v36 }
 0x21e   :  { %v177_v63 = vmul.f32 0.5, %v176_v60 }
 0x21f   :  { %v189_v0 = vmul.f32 %v245_v58, %v184_v62 }
 0x220   :  { %v178_v1 = vsub.f32 1.5, %v177_v63 }
 0x221   :  { %v194_v2 = vadd.f32 %v246_v61, %v189_v0 }
 0x222   :  { %v179_v3 = vmul.f32 %v252_v55, %v178_v1 }
 0x223   :  { %v196_v4 = vpack.c.bf16 %v194_v2, %v194_v2 }
 0x224   :  { %v183_v5 = vsel %vm182_vm9, %v252_v55, %v179_v3 }
 0x225   :  { %199 = vst.msk [vmem:[%s348_s7] sm:$0xf] %vm198_vm7, %v196_v4  ;;  %v185_v6 = vmul.f32 %v183_v5, %v151_v41 }
 0x227   :  { %v190_v7 = vmul.f32 %v245_v58, %v185_v6 }
 0x229   :  { %v195_v8 = vadd.f32 %v246_v61, %v190_v7 }
 0x22b   :  { %v197_v9 = vpack.c.bf16 %v195_v8, %v195_v8 }
 0x22d   :  { %200 = vst.msk [vmem:[%s348_s7 + $0x4] sm:$0xf] %vm198_vm7, %v197_v9 }

// kernel: detr_transformer.13
= control target key start
LH: loop header
LB: loop body
LE: loop exit
PB: predicated region body
PF: predicated region fallthrough
CT: control target
= control target key end

     0   :  { %12 = vsyncpa [#allocation3], 0  ;;  %s466_s0 = inlined_call_operand.vmem [shape: bf16[16,32], index: 0, kind: input, shape index: {}]   ;;  %s467_s1 = inlined_call_operand.vmem [shape: bf16[32,64], index: 1, kind: input, shape index: {}]   ;;  %s468_s2 = inlined_call_operand.vmem [shape: f32[1,64], index: 2, kind: input, shape index: {}]   ;;  %s469_s3 = inlined_call_operand.vmem [shape: bf16[64,32], index: 3, kind: input, shape index: {}]   ;;  %s470_s4 = inlined_call_operand.hbm [shape: f32[1,32], index: 4, kind: input, shape index: {}]   ;;  %s471_s5 = inlined_call_operand.hbm [shape: f32[1,32], index: 5, kind: input, shape index: {}]   ;;  %s472_s6 = inlined_call_operand.hbm [shape: f32[1,32], index: 6, kind: input, shape index: {}]   ;;  %s473_s7 = inlined_call_operand.vmem [shape: bf16[16,32], index: 7, kind: output, shape index: {}]  }
   0x1   :  { %13 = vsyncpa [#allocation5], 0  ;;  %s38_s26 = sshll.u32 %s471_s5, 4  ;;  %s375_s27 = smov [#allocation4]   ;;  %s39_s26 = int_to_ptr.hbm [resolvable:$true] %s38_s26 }
   0x2   :  { %s40_s28 = sshll.u32 %s375_s27, 4  ;;  %s27_s8 = sshll.u32 %s470_s4, 4  ;;  %s41_s28 = int_to_ptr.vmem [resolvable:$true] %s40_s28  ;;  %s28_s8 = int_to_ptr.hbm [resolvable:$true] %s27_s8 }
   0x3   :  { %43 = dma.hbm_to_vmem [thread:$0]  %s39_s26, 16, %s41_s28, [#allocation5]  }
   0x4   :  { %s376_s9 = smov [#allocation2]   ;;  %s49_s13 = sshll.u32 %s472_s6, 4  ;;  %s50_s13 = int_to_ptr.hbm [resolvable:$true] %s49_s13 }
   0x5   :  { %s29_s10 = sshll.u32 %s376_s9, 4  ;;  %s377_s5 = smov [#allocation6]   ;;  %s30_s10 = int_to_ptr.vmem [resolvable:$true] %s29_s10 }
   0x6   :  { %32 = dma.hbm_to_vmem [thread:$0]  %s28_s8, 16, %s30_s10, [#allocation3]  }
   0x7   :  { %s51_s14 = sshll.u32 %s377_s5, 4  ;;  %s52_s14 = int_to_ptr.vmem [resolvable:$true] %s51_s14 }
   0x8   :  { %54 = dma.hbm_to_vmem [thread:$0]  %s50_s13, 16, %s52_s14, [#allocation5]  }
   0x9   :  { %371 = dma.done.wait [#allocation3], 16  }
   0xa   :  { %372 = vsyncadd [#allocation3], 4294967280 }
   0xb   :  { %373 = dma.done.wait [#allocation5], 32  }
   0xc   :  { %374 = vsyncadd [#allocation5], 4294967264  ;;  %v280_v0 = vld [vmem:[%s467_s1 + $0x8] sm:$0xff]  ;;  %v279_v1 = vld [vmem:[%s467_s1] sm:$0xff]  ;;  %vm95_vm0 = vcmask 261120   ;;  %vm152_vm1 = vcmask 523264  }
   0xd   :  { %105 = vmatpush.bf16.msra.mxu0 %v280_v0  ;;  %v278_v2 = vld [vmem:[%s466_s0] sm:$0xff]  ;;  %v284_v3 = vld [vmem:[%s469_s3 + $0x18] sm:$0xff]  ;;  %v283_v4 = vld [vmem:[%s469_s3 + $0x10] sm:$0xff]  ;;  %v378_v27 = vmov 32.0   ;;  %vm239_vm7 = vcmask 257024  }
   0xe   :  { %160 = vmatpush.bf16.msra.mxu1 %v284_v3  ;;  %v282_v5 = vld [vmem:[%s469_s3 + $0x8] sm:$0xff]  ;;  %v281_v6 = vld [vmem:[%s469_s3] sm:$0xff]  ;;  %293 = vrcp.f32 %v378_v27 }
   0xf   :  { %v289_v8 = vld [vmem:[%s468_s2] ss:$0 sm:$0xff]  ;;  %v291_v58 = vld [vmem:[#allocation4] ss:$0 sm:$0xff]  ;;  %v292_v61 = vld [vmem:[#allocation6] ss:$0 sm:$0xff] }
  0x10   :  { %v68_v15 = vld [vmem:[%s466_s0] sm:$0xff]  }
  0x11   :  { %106 = vmatpush.bf16.msra.mxu0 %v279_v1  ;;  %v290_v16 = vld [vmem:[#allocation2] ss:$0 sm:$0xff]  ;;  %v170_v17 = vunpack.c.l.bf16 %v68_v15  ;;  %v171_v22 = vunpack.c.h.bf16 %v68_v15 }
  0x12   :  { %161 = vmatpush.bf16.msra.mxu1 %v283_v4 }
  0x14   :  { %260 = vmatmul.msk.bf16.vlgmr.msra.gmra.mxu0 %vm95_vm0, %v278_v2  ;;  %v294_v28 = vpop.eup %293 }
  0x15   :  { %v183_v29 = vmul.f32 32.0, %v294_v28  ;;  %vm187_vm2 = vweird.f32 %v294_v28 }
  0x16   :  { %162 = vmatpush.bf16.msra.mxu1 %v282_v5 }
  0x17   :  { %v184_v30 = vsub.f32 1.0, %v183_v29 }
  0x19   :  { %v185_v31 = vmul.f32 %v294_v28, %v184_v30 }
  0x1a   :  { %163 = vmatpush.bf16.msra.mxu1 %v281_v6 }
  0x1b   :  { %v186_v32 = vadd.f32 %v294_v28, %v185_v31 }
  0x1d   :  { %v188_v33 = vsel %vm187_vm2, %v294_v28, %v186_v32 }
  0x91   :  { %v108_v7 = vpop.f32.mrf.mxu0 }
  0x92   :  { %v109_v9 = vadd.f32 %v289_v8, %v108_v7 }
  0x94   :  { %v113_v12 = vmax.f32 %v109_v9, 0.0 }
  0x99   :  { %v110_v10 = vpop.f32.mrf.mxu0 }
  0x9a   :  { %v111_v11 = vadd.f32 %v289_v8, %v110_v10 }
  0x9c   :  { %v114_v13 = vmax.f32 %v111_v11, 0.0 }
  0x9e   :  { %v115_v14 = vpack.c.bf16 %v114_v13, %v113_v12 }
  0xa0   :  { %277 = vmatmul.msk.bf16.vlgmr.msra.gmra.mxu1 %vm152_vm1, %v115_v14 }
 0x11d   :  { %v165_v18 = vpop.f32.mrf.mxu1 }
 0x11e   :  { %v166_v19 = vadd.f32 %v290_v16, %v165_v18 }
 0x120   :  { %v172_v20 = vadd.f32 %v170_v17, %v166_v19 }
 0x122   :  { %v176_v21 = vsel %vm95_vm0, %v172_v20, 0.0 }
 0x123   :  { %177 = vadd.xlane.f32.xlu0 %v176_v21 }
 0x125   :  { %v167_v23 = vpop.f32.mrf.mxu1 }
 0x126   :  { %v168_v24 = vadd.f32 %v290_v16, %v167_v23 }
 0x128   :  { %v173_v25 = vadd.f32 %v171_v22, %v168_v24 }
 0x12a   :  { %v179_v26 = vsel %vm95_vm0, %v173_v25, 0.0 }
 0x12b   :  { %180 = vadd.xlane.f32.xlu0 %v179_v26 }
 0x196   :  { %v178_v34 = vpop.xlane.xlu0 %177 }
 0x197   :  { %v189_v35 = vmul.f32 %v188_v33, %v178_v34 }
 0x199   :  { %v191_v36 = vsub.f32 %v172_v20, %v189_v35 }
 0x19b   :  { %v193_v37 = vmul.f32 %v191_v36, %v191_v36 }
 0x19d   :  { %v195_v38 = vsel %vm95_vm0, %v193_v37, 0.0 }
 0x19e   :  { %196 = vadd.xlane.f32.xlu1 %v195_v38  ;;  %v181_v39 = vpop.xlane.xlu0 %180 }
 0x19f   :  { %v190_v40 = vmul.f32 %v188_v33, %v181_v39 }
 0x1a1   :  { %v192_v41 = vsub.f32 %v173_v25, %v190_v40 }
 0x1a3   :  { %v194_v42 = vmul.f32 %v192_v41, %v192_v41 }
 0x1a5   :  { %v198_v43 = vsel %vm95_vm0, %v194_v42, 0.0 }
 0x1a6   :  { %199 = vadd.xlane.f32.xlu1 %v198_v43 }
 0x211   :  { %v197_v44 = vpop.xlane.xlu1 %196 }
 0x212   :  { %v201_v45 = vmul.f32 %v197_v44, %v188_v33 }
 0x214   :  { %v203_v46 = vadd.f32 1e-05, %v201_v45 }
 0x216   :  { %295 = vrsqrt.f32 %v203_v46  ;;  %vm211_vm4 = vweird.f32 %v203_v46 }
 0x219   :  { %v200_v47 = vpop.xlane.xlu1 %199 }
 0x21a   :  { %v202_v48 = vmul.f32 %v200_v47, %v188_v33 }
 0x21c   :  { %v296_v49 = vpop.eup %295  ;;  %v204_v50 = vadd.f32 1e-05, %v202_v48 }
 0x21d   :  { %v206_v51 = vmul.f32 %v296_v49, %v203_v46  ;;  %vm212_vm3 = vweird.f32 %v296_v49 }
 0x21e   :  { %297 = vrsqrt.f32 %v204_v50  ;;  %vm213_vm5 = vmor %vm211_vm4, %vm212_vm3  ;;  %vm221_vm8 = vweird.f32 %v204_v50 }
 0x21f   :  { %v207_v52 = vmul.f32 %v296_v49, %v206_v51 }
 0x221   :  { %v208_v53 = vmul.f32 0.5, %v207_v52 }
 0x223   :  { %v209_v54 = vsub.f32 1.5, %v208_v53 }
 0x224   :  { %v298_v55 = vpop.eup %297 }
 0x225   :  { %v210_v56 = vmul.f32 %v296_v49, %v209_v54  ;;  %v216_v57 = vmul.f32 %v298_v55, %v204_v50  ;;  %vm222_vm6 = vweird.f32 %v298_v55 }
 0x226   :  { %vm223_vm9 = vmor %vm221_vm8, %vm222_vm6 }
 0x227   :  { %v214_v59 = vsel %vm213_vm5, %v296_v49, %v210_v56  ;;  %v217_v60 = vmul.f32 %v298_v55, %v216_v57 }
 0x228   :  { %v225_v62 = vmul.f32 %v214_v59, %v191_v36 }
 0x229   :  { %v218_v63 = vmul.f32 0.5, %v217_v60 }
 0x22a   :  { %v230_v0 = vmul.f32 %v291_v58, %v225_v62 }
 0x22b   :  { %v219_v1 = vsub.f32 1.5, %v218_v63 }
 0x22c   :  { %v235_v2 = vadd.f32 %v292_v61, %v230_v0 }
 0x22d   :  { %v220_v3 = vmul.f32 %v298_v55, %v219_v1 }
 0x22e   :  { %v237_v4 = vpack.c.bf16 %v235_v2, %v235_v2 }
 0x22f   :  { %v224_v5 = vsel %vm223_vm9, %v298_v55, %v220_v3 }
 0x230   :  { %240 = vst.msk [vmem:[%s473_s7] sm:$0xf] %vm239_vm7, %v237_v4  ;;  %v226_v6 = vmul.f32 %v224_v5, %v192_v41 }
 0x232   :  { %v231_v7 = vmul.f32 %v291_v58, %v226_v6 }
 0x234   :  { %v236_v8 = vadd.f32 %v292_v61, %v231_v7 }
 0x236   :  { %v238_v9 = vpack.c.bf16 %v236_v8, %v236_v8 }
 0x238   :  { %241 = vst.msk [vmem:[%s473_s7 + $0x4] sm:$0xf] %vm239_vm7, %v238_v9 }
 0x239   :  { %246 = vsyncpa [#allocation3], 1 }
 0x23a   :  { %247 = vsyncpa [#allocation5], 1 }

// kernel: detr_transformer.10
= control target key start
LH: loop header
LB: loop body
LE: loop exit
PB: predicated region body
PF: predicated region fallthrough
CT: control target
= control target key end

     0   :  { %s1086_s27 = smov 0   ;;  %s1088_s28 = smov 0   ;;  %s1219_s0 = inlined_call_operand.vmem [shape: bf16[2,8,32], index: 0, kind: input, shape index: {}, may-alias: {0,1}]   ;;  %s1220_s1 = inlined_call_operand.vmem [shape: bf16[2,8,32], index: 1, kind: input, shape index: {}, may-alias: {0,1}]   ;;  %s1221_s2 = inlined_call_operand.vmem [shape: bf16[32,96], index: 2, kind: input, shape index: {}]   ;;  %s1222_s3 = inlined_call_operand.vmem [shape: f32[1,96], index: 3, kind: input, shape index: {}]   ;;  %s1223_s4 = inlined_call_operand.vmem [shape: bf16[32,32], index: 4, kind: input, shape index: {}]   ;;  %s1224_s5 = inlined_call_operand.vmem [shape: f32[1,32], index: 5, kind: input, shape index: {}]   ;;  %s1225_s6 = inlined_call_operand.vmem [shape: f32[1,32], index: 6, kind: input, shape index: {}]   ;;  %s1226_s7 = inlined_call_operand.vmem [shape: f32[1,32], index: 7, kind: input, shape index: {}]   ;;  %s1227_s8 = inlined_call_operand.vmem [shape: bf16[2,8,32], index: 8, kind: output, shape index: {}]  }
   0x1   :  { %s1090_s29 = smov 0  }
   0x2 LB: > { %s30_s30 = sadd.s32 1, %s1029_s28  ;;  %p916_p0 = scmp.ge.s32.totalorder %s1033_s29, 1  ;;  %s1033_s29 = sphi %s1090_s29, %s18_s29   ;;  %s1029_s28 = sphi %s1088_s28, %s1229_s28   ;;  %s1025_s27 = sphi %s1086_s27, %s1228_s27  }
   0x3   : > { %p32_p1 = scmp.ge.s32.totalorder %s30_s30, 2  ;;  %p289_p2 = scmp.lt.s32.totalorder %s1033_s29, 3 }
   0x5   : > { %s1231_s30 = smov (%p32_p1, %s30_s30), 0  ;;  %p290_p3 = pnand %p916_p0, %p289_p2 }
   0x6   : > { %s1035_s11 = smov (!%p290_p3), 96   ;;  %p331_p4 = scmp.lt.s32.totalorder (!%p290_p3), %s1025_s27, 1 }
   0x7   : > { %293 = sbr.rel (%p290_p3) target bundleno = 1737 (0x6c9), region = 52  ;;  %s1037_s9 = smov (!%p290_p3), 120  }
   0x8   : > { %s1038_s10 = smov (!%p290_p3), 112  }
   0xc   : > { %v956_v0 = vld [vmem:[%s1221_s2 + $0x8] sm:$0xff]  ;;  %v954_v1 = vld [vmem:[%s1221_s2] sm:$0xff]  ;;  %s1233_s27 = smov (!%p331_p4, %s1025_s27), 1  ;;  %vm381_vm0 = vcmask 261120   ;;  %vm421_vm1 = vcmask 257024   ;;  %vm466_vm2 = vcmask 64512  }
   0xd   : > { %374 = vrot.lane.b32.xlu0 %v956_v0, %s1035_s11  ;;  %v955_v2 = vld [vmem:[%s1221_s2 + $0x8] sm:$0xff]  ;;  %s1113_s16 = sshll.u32 %s1233_s27, 2  ;;  %v953_v3 = vld [vmem:[%s1221_s2] sm:$0xff]  ;;  %s1036_s27 = smov 64   ;;  %vm501_vm3 = vcmask 1043456  }
   0xe   : > { %451 = vmatpush.bf16.msra.mxu2 %v955_v2  ;;  %s341_s21 = scalar_lea.vmem %s1220_s1, %s1113_s16  ;;  %v987_v5 = vld [vmem:[%s1222_s3] ss:$0 sm:$0xff]  ;;  %s334_s26 = scalar_lea.vmem %s1219_s0, %s1113_s16  ;;  %398 = vrot.lane.b32.xlu2 %v954_v1, %s1036_s27 }
   0xf   : > { %v1122_v4 = vld [vmem:[%s341_s21] sm:$0xf]  ;;  %378 = vrot.lane.b32.xlu1 %v987_v5, %s1035_s11 }
  0x10   : > { %v359_v8 = vld [vmem:[%s334_s26] sm:$0xf] }
  0x11   : > { %v462_v55 = vld [vmem:[%s1223_s4] sm:$0xf] }
  0x12   : > { %452 = vmatpush.bf16.msra.mxu2 %v953_v3  ;;  %v608_v57 = vsel %vm501_vm3, %v462_v55, 0 }
  0x15   : > { %372 = vrot.lane.b32.xlu0 %v954_v1, %s1035_s11  ;;  %938 = vmatmul.msk.bf16.vlgmr.msra.gmra.mxu2 %vm381_vm0, %v1122_v4  ;;  %s1039_s11 = smov 104  }
  0x17   : > { %400 = vrot.lane.b32.xlu1 %v956_v0, %s1036_s27 }
  0x1d   : > { %404 = vrot.lane.b32.xlu0 %v987_v5, %s1036_s27 }
  0x68   : > { %v399_v25 = vpop.permute.xlu2 %398 }
  0x7f   : > { %v375_v6 = vpop.permute.xlu0 %374 }
  0x80   : > { %391 = vmatpush.bf16.msra.mxu0 %v375_v6 }
  0x81   : > { %v379_v11 = vpop.permute.xlu1 %378 }
  0x87   : > { %v373_v7 = vpop.permute.xlu0 %372 }
  0x88   : > { %392 = vmatpush.bf16.msra.mxu0 %v373_v7 }
  0x89   : > { %v401_v24 = vpop.permute.xlu1 %400 }
  0x8a   : > { %413 = vmatpush.bf16.msra.mxu1 %v401_v24 }
  0x8b   : > { %928 = vmatmul.msk.bf16.vlgmr.msra.gmra.mxu0 %vm381_vm0, %v359_v8 }
  0x8e   : > { %414 = vmatpush.bf16.msra.mxu1 %v399_v25 }
  0x8f   : > { %v405_v27 = vpop.permute.xlu0 %404 }
  0x91   : > { %929 = vmatmul.msk.bf16.vlgmr.msra.gmra.mxu1 %vm381_vm0, %v359_v8 }
  0x98   : > { %v454_v9 = vpop.f32.mrf.mxu2 }
  0x99   : > { %v455_v15 = vadd.f32 %v987_v5, %v454_v9 }
  0x9b   : > { %v458_v17 = vmul.f32 0.35355338, %v455_v15 }
  0x9d   : > { %v459_v19 = vpack.c.bf16 %v458_v17, %v458_v17 }
  0x9f   : > { %v520_v23 = vunpack.c.l.b16 %v459_v19 }
  0xa0   : > { %v456_v10 = vpop.f32.mrf.mxu2 }
  0xa1   : > { %v521_v26 = vpack.c.b16 %v520_v23, %v520_v23 }
 0x108   : > { %v394_v12 = vpop.f32.mrf.mxu0 }
 0x109   : > { %v395_v13 = vadd.f32 %v394_v12, %v379_v11 }
 0x10b   : > { %v420_v14 = vpack.c.bf16 %v395_v13, %v395_v13 }
 0x10d   : > { %422 = vst.msk [vmem:[#allocation2] sm:$0xf] %vm421_vm1, %v420_v14 }
 0x10e   : > { %v416_v33 = vpop.f32.mrf.mxu1 }
 0x10f   : > { %v417_v34 = vadd.f32 %v416_v33, %v405_v27 }
 0x110   : > { %v396_v16 = vpop.f32.mrf.mxu0 }
 0x111   : > { %v423_v37 = vpack.c.bf16 %v417_v34, %v417_v34 }
 0x113   : > { %424 = vst.msk [vmem:[#allocation3] sm:$0xf] %vm421_vm1, %v423_v37  ;;  %v463_v37 = vld [vmem:[%s1223_s4 + $0x4] sm:$0xf] }
 0x114   : > { %v460_v18 = vld [vmem:[#allocation2] sm:$0xf] }
 0x115   : > { %v471_v20 = vsel %vm466_vm2, %v460_v18, 0  ;;  %v525_v21 = vunpack.c.l.b16 %v460_v18 }
 0x116   : > { %480 = vmatpush.bf16.xpose.msra.mxu3 %v471_v20  ;;  %v418_v39 = vpop.f32.mrf.mxu1 }
 0x117   : > { %v526_v22 = vpack.c.b16 %v525_v21, %v525_v21  ;;  %v589_v39 = vsel %vm501_vm3, %v463_v37, 0 }
 0x119   : > { %527 = vrot.lane.b32.xlu0 %v526_v22, %s1037_s9 }
 0x11a   : > { %v461_v52 = vld [vmem:[#allocation3] sm:$0xf] }
 0x11b   : > { %v503_v53 = vsel %vm501_vm3, %v461_v52, 0  ;;  %v561_v54 = vunpack.c.l.b16 %v461_v52 }
 0x11c   : > { %512 = vmatpush.bf16.msrb.mxu0 %v503_v53  ;;  %v465_v53 = vld [vmem:[%s1223_s4 + $0xc] sm:$0xf] }
 0x11d   : > { %939 = vmatmul.msk.bf16.vlgmr.msra.gmra.mxu3 %vm466_vm2, %v459_v19  ;;  %v562_v56 = vpack.c.b16 %v561_v54, %v561_v54  ;;  %v761_v54 = vsel %vm501_vm3, %v465_v53, 0 }
 0x11e   : > { %598 = vmatpush.bf16.msrb.mxu3 %v589_v39 }
 0x120   : > { %617 = vmatpush.bf16.msra.mxu0 %v608_v57 }
 0x121   : > { %522 = vrot.lane.b32.xlu0 %v521_v26, %s1037_s9 }
 0x129   : > { %625 = vrot.lane.b32.xlu0 %v526_v22, %s1038_s10 }
 0x131   : > { %623 = vrot.lane.b32.xlu0 %v521_v26, %s1038_s10 }
 0x139   : > { %700 = vrot.lane.b32.xlu0 %v521_v26, %s1039_s11 }
 0x18b   : > { %v528_v28 = vpop.permute.xlu0 %527 }
 0x18c   : > { %v533_v29 = vsel %vm466_vm2, %v528_v28, 0 }
 0x18d   : > { %542 = vmatpush.bf16.xpose.msrb.mxu1 %v533_v29 }
 0x193   : > { %v523_v30 = vpop.permute.xlu0 %522 }
 0x194   : > { %941 = vmatmul.msk.bf16.vlgmr.msrb.gmra.mxu1 %vm466_vm2, %v523_v30 }
 0x19b   : > { %v626_v31 = vpop.permute.xlu0 %625 }
 0x19c   : > { %v631_v32 = vsel %vm466_vm2, %v626_v31, 0 }
 0x19d   : > { %640 = vmatpush.bf16.xpose.msra.mxu1 %v631_v32 }
 0x1a0   : > { %v482_v35 = vpop.f32.mrf.mxu3 }
 0x1a1   : > { %v486_v36 = vsel %vm466_vm2, %v482_v35, -inf }
 0x1a2   : > { %487 = vmax.xlane.f32.xlu2 %v486_v36 }
 0x1a3   : > { %v624_v38 = vpop.permute.xlu0 %623 }
 0x1a4   : > { %945 = vmatmul.msk.bf16.vlgmr.msra.gmra.mxu1 %vm466_vm2, %v624_v38 }
 0x1a8   : > { %v484_v40 = vpop.f32.mrf.mxu3 }
 0x1ab   : > { %v701_v9 = vpop.permute.xlu0 %700 }
 0x1ba   : > { %702 = vrot.lane.b32.xlu2 %v526_v22, %s1039_s11 }
 0x211   : > { %v544_v41 = vpop.f32.mrf.mxu1 }
 0x212   : > { %v548_v51 = vsel %vm466_vm2, %v544_v41, -inf }
 0x215   : > { %v488_v42 = vpop.xlane.xlu2 %487 }
 0x216   : > { %v489_v43 = vsub.f32 %v482_v35, %v488_v42 }
 0x218   : > { %v490_v44 = vmul.f32 1.442695, %v489_v43 }
 0x219   : > { %v546_v45 = vpop.f32.mrf.mxu1 }
 0x21a   : > { %991 = vpow2.f32 %v490_v44 }
 0x21d   : > { %v703_v62 = vpop.permute.xlu2 %702 }
 0x21e   : > { %v708_v2 = vsel %vm466_vm2, %v703_v62, 0 }
 0x220   : > { %v992_v46 = vpop.eup %991 }
 0x221   : > { %v642_v47 = vpop.f32.mrf.mxu1  ;;  %v492_v48 = vsel %vm466_vm2, %v992_v46, 0.0 }
 0x222   : > { %493 = vadd.xlane.f32.xlu1 %v492_v48  ;;  %v646_v49 = vsel %vm466_vm2, %v642_v47, -inf  ;;  %v464_v48 = vld [vmem:[%s1223_s4 + $0x8] sm:$0xf] }
 0x223   : > { %647 = vmax.xlane.f32.xlu0 %v646_v49  ;;  %v684_v49 = vsel %vm501_vm3, %v464_v48, 0 }
 0x224   : > { %693 = vmatpush.bf16.msra.mxu3 %v684_v49 }
 0x229   : > { %v644_v50 = vpop.f32.mrf.mxu1 }
 0x22a   : > { %549 = vmax.xlane.f32.xlu1 %v548_v51 }
 0x237   : > { %658 = vrot.lane.b32.xlu0 %v562_v56, %s1038_s10  ;;  %s348_s10 = scalar_lea.vmem %s1227_s8, %s1113_s16 }
 0x295   : > { %v494_v58 = vpop.xlane.xlu1 %493 }
 0x296   : > { %993 = vrcp.f32 %v494_v58  ;;  %v648_v15 = vpop.xlane.xlu0 %647 }
 0x297   : > { %v649_v16 = vsub.f32 %v642_v47, %v648_v15 }
 0x299   : > { %v650_v17 = vmul.f32 1.442695, %v649_v16 }
 0x29c   : > { %v994_v59 = vpop.eup %993 }
 0x29d   : > { %v496_v60 = vmul.f32 %v994_v59, %v992_v46  ;;  %v550_v61 = vpop.xlane.xlu1 %549 }
 0x29e   : > { %v551_v63 = vsub.f32 %v544_v41, %v550_v61 }
 0x29f   : > { %v497_v0 = vpack.c.bf16 %v496_v60, %v496_v60 }
 0x2a0   : > { %v552_v1 = vmul.f32 1.442695, %v551_v63 }
 0x2a1   : > { %940 = vmatmul.msk.bf16.vlgmr.msrb.gmra.mxu0 %vm466_vm2, %v497_v0  ;;  %v988_v0 = vld [vmem:[%s1224_s5] ss:$0 sm:$0xff] }
 0x2a2   : > { %995 = vpow2.f32 %v552_v1  ;;  %717 = vmatpush.bf16.xpose.msrb.mxu0 %v708_v2  ;;  %v782_v2 = vunpack.c.l.bf16 %v1122_v4 }
 0x2a3   : > { %997 = vpow2.f32 %v650_v17 }
 0x2a8   : > { %v996_v3 = vpop.eup %995 }
 0x2a9   : > { %v554_v5 = vsel %vm466_vm2, %v996_v3, 0.0  ;;  %v998_v18 = vpop.eup %997  ;;  %v659_v27 = vpop.permute.xlu0 %658 }
 0x2aa   : > { %555 = vadd.xlane.f32.xlu2 %v554_v5  ;;  %v652_v19 = vsel %vm466_vm2, %v998_v18, 0.0  ;;  %v664_v31 = vsel %vm501_vm3, %v659_v27, 0 }
 0x31d   : > { %v556_v24 = vpop.xlane.xlu2 %555 }
 0x31e   : > { %v514_v6 = vpop.f32.mrf.mxu0 }
 0x31f   : > { %v518_v7 = vpack.c.bf16 %v514_v6, %v514_v6 }
 0x321   : > { %944 = vmatmul.msk.bf16.vlgmr.msra.gmra.mxu0 %vm466_vm2, %v518_v7 }
 0x326   : > { %v516_v8 = vpop.f32.mrf.mxu0 }
 0x331   : > { %948 = vmatmul.msk.bf16.vlgmr.msrb.gmra.mxu0 %vm466_vm2, %v701_v9  ;;  %v1040_v9 = vmov 32.0  }
 0x39e   : > { %v1164_v10 = vpop.f32.mrf.mxu0 }
 0x3a6   : > { %v621_v11 = vpop.f32.mrf.mxu0 }
 0x3ae   : > { %v719_v12 = vpop.f32.mrf.mxu0 }
 0x3af   : > { %v723_v13 = vsel %vm466_vm2, %v719_v12, -inf }
 0x3b0   : > { %724 = vmax.xlane.f32.xlu1 %v723_v13 }
 0x3b6   : > { %v721_v14 = vpop.f32.mrf.mxu0 }
 0x3c9   : > { %563 = vrot.lane.b32.xlu1 %v562_v56, %s1037_s9 }
 0x3f3   : > { %653 = vadd.xlane.f32.xlu1 %v652_v19 }
 0x423   : > { %v725_v20 = vpop.xlane.xlu1 %724 }
 0x424   : > { %v726_v21 = vsub.f32 %v719_v12, %v725_v20 }
 0x426   : > { %v727_v22 = vmul.f32 1.442695, %v726_v21 }
 0x428   : > { %999 = vpow2.f32 %v727_v22 }
 0x429   : > { %1001 = vrcp.f32 %v556_v24 }
 0x42e   : > { %v1000_v23 = vpop.eup %999 }
 0x42f   : > { %v729_v25 = vsel %vm466_vm2, %v1000_v23, 0.0  ;;  %v1002_v26 = vpop.eup %1001 }
 0x430   : > { %730 = vadd.xlane.f32.xlu2 %v729_v25  ;;  %v558_v28 = vmul.f32 %v1002_v26, %v996_v3 }
 0x432   : > { %v559_v32 = vpack.c.bf16 %v558_v28, %v558_v28 }
 0x43b   : > { %v564_v29 = vpop.permute.xlu1 %563 }
 0x43c   : > { %v569_v30 = vsel %vm501_vm3, %v564_v29, 0  ;;  %v989_v29 = vld [vmem:[%s1225_s6] ss:$0 sm:$0xff] }
 0x43d   : > { %578 = vmatpush.bf16.msrb.mxu2 %v569_v30 }
 0x440   : > { %942 = vmatmul.msk.bf16.vlgmr.msrb.gmra.mxu2 %vm466_vm2, %v559_v32 }
 0x441   : > { %673 = vmatpush.bf16.msra.mxu2 %v664_v31  ;;  %v990_v31 = vld [vmem:[%s1226_s7] ss:$0 sm:$0xff] }
 0x445   : > { %770 = vmatpush.bf16.msrb.mxu2 %v761_v54 }
 0x448   : > { %735 = vrot.lane.b32.xlu2 %v562_v56, %s1039_s11 }
 0x466   : > { %v654_v33 = vpop.xlane.xlu1 %653 }
 0x467   : > { %1003 = vrcp.f32 %v654_v33 }
 0x46d   : > { %v1004_v34 = vpop.eup %1003 }
 0x46e   : > { %v656_v35 = vmul.f32 %v1004_v34, %v998_v18 }
 0x470   : > { %v657_v36 = vpack.c.bf16 %v656_v35, %v656_v35 }
 0x472   : > { %946 = vmatmul.msk.bf16.vlgmr.msra.gmra.mxu2 %vm466_vm2, %v657_v36 }
 0x4a3   : > { %v731_v38 = vpop.xlane.xlu2 %730 }
 0x4a4   : > { %1005 = vrcp.f32 %v731_v38 }
 0x4a5   : > { %1007 = vrcp.f32 %v1040_v9 }
 0x4aa   : > { %v1006_v40 = vpop.eup %1005 }
 0x4ab   : > { %v733_v41 = vmul.f32 %v1006_v40, %v1000_v23  ;;  %v736_v42 = vpop.permute.xlu2 %735  ;;  %v1008_v11 = vpop.eup %1007 }
 0x4ac   : > { %v741_v43 = vsel %vm501_vm3, %v736_v42, 0  ;;  %v790_v12 = vmul.f32 32.0, %v1008_v11  ;;  %vm794_vm4 = vweird.f32 %v1008_v11 }
 0x4ad   : > { %v734_v44 = vpack.c.bf16 %v733_v41, %v733_v41  ;;  %750 = vmatpush.bf16.msrb.mxu1 %v741_v43 }
 0x4b0   : > { %949 = vmatmul.msk.bf16.vlgmr.msrb.gmra.mxu1 %vm466_vm2, %v734_v44 }
 0x4c3   : > { %v580_v45 = vpop.f32.mrf.mxu2 }
 0x4c4   : > { %v584_v46 = vpack.c.bf16 %v580_v45, %v580_v45 }
 0x4c6   : > { %943 = vmatmul.msk.bf16.vlgmr.msrb.gmra.mxu3 %vm466_vm2, %v584_v46 }
 0x4cb   : > { %v582_v47 = vpop.f32.mrf.mxu2 }
 0x4f5   : > { %v675_v50 = vpop.f32.mrf.mxu2 }
 0x4f6   : > { %v679_v51 = vpack.c.bf16 %v675_v50, %v675_v50 }
 0x4f8   : > { %947 = vmatmul.msk.bf16.vlgmr.msra.gmra.mxu3 %vm466_vm2, %v679_v51 }
 0x4fd   : > { %v677_v52 = vpop.f32.mrf.mxu2 }
 0x52d   : > { %v752_v55 = vpop.f32.mrf.mxu1 }
 0x52e   : > { %v756_v56 = vpack.c.bf16 %v752_v55, %v752_v55 }
 0x530   : > { %950 = vmatmul.msk.bf16.vlgmr.msrb.gmra.mxu2 %vm466_vm2, %v756_v56 }
 0x535   : > { %v754_v57 = vpop.f32.mrf.mxu1 }
 0x549   : > { %v600_v58 = vpop.f32.mrf.mxu3 }
 0x54a   : > { %v620_v62 = vadd.f32 %v1164_v10, %v600_v58  ;;  %v791_v10 = vsub.f32 1.0, %v790_v12 }
 0x54c   : > { %v792_v13 = vmul.f32 %v1008_v11, %v791_v10 }
 0x54e   : > { %v793_v14 = vadd.f32 %v1008_v11, %v792_v13 }
 0x550   : > { %v795_v15 = vsel %vm794_vm4, %v1008_v11, %v793_v14 }
 0x551   : > { %v602_v59 = vpop.f32.mrf.mxu3 }
 0x57b   : > { %v695_v60 = vpop.f32.mrf.mxu3 }
 0x57c   : > { %v699_v63 = vadd.f32 %v695_v60, %v620_v62 }
 0x583   : > { %v697_v61 = vpop.f32.mrf.mxu3 }
 0x5b3   : > { %v772_v1 = vpop.f32.mrf.mxu2 }
 0x5b4   : > { %v776_v3 = vadd.f32 %v772_v1, %v699_v63 }
 0x5b6   : > { %v781_v5 = vadd.f32 %v988_v0, %v776_v3 }
 0x5b8   : > { %v783_v6 = vadd.f32 %v782_v2, %v781_v5 }
 0x5ba   : > { %v786_v7 = vsel %vm381_vm0, %v783_v6, 0.0 }
 0x5bb   : > { %v774_v8 = vpop.f32.mrf.mxu2  ;;  %787 = vadd.xlane.f32.xlu0 %v786_v7 }
 0x62e   : > { %v788_v16 = vpop.xlane.xlu0 %787 }
 0x62f   : > { %v796_v17 = vmul.f32 %v795_v15, %v788_v16 }
 0x631   : > { %v797_v18 = vsub.f32 %v783_v6, %v796_v17 }
 0x633   : > { %v798_v4 = vmul.f32 %v797_v18, %v797_v18 }
 0x635   : > { %v799_v19 = vsel %vm381_vm0, %v798_v4, 0.0 }
 0x636   : > { %800 = vadd.xlane.f32.xlu1 %v799_v19 }
 0x6a9   : > { %v801_v20 = vpop.xlane.xlu1 %800 }
 0x6aa   : > { %v802_v21 = vmul.f32 %v801_v20, %v795_v15 }
 0x6ac   : > { %v803_v22 = vadd.f32 1e-05, %v802_v21 }
 0x6ae   : > { %1009 = vrsqrt.f32 %v803_v22  ;;  %vm810_vm6 = vweird.f32 %v803_v22 }
 0x6b4   : > { %v1010_v23 = vpop.eup %1009 }
 0x6b5   : > { %v805_v24 = vmul.f32 %v1010_v23, %v803_v22  ;;  %vm811_vm5 = vweird.f32 %v1010_v23 }
 0x6b6   : > { %vm812_vm7 = vmor %vm810_vm6, %vm811_vm5 }
 0x6b7   : > { %v806_v25 = vmul.f32 %v1010_v23, %v805_v24 }
 0x6b9   : > { %v807_v26 = vmul.f32 0.5, %v806_v25 }
 0x6bb   : > { %v808_v27 = vsub.f32 1.5, %v807_v26 }
 0x6bd   : > { %v809_v28 = vmul.f32 %v1010_v23, %v808_v27 }
 0x6bf   : > { %v813_v30 = vsel %vm812_vm7, %v1010_v23, %v809_v28 }
 0x6c0   : > { %v814_v32 = vmul.f32 %v813_v30, %v797_v18 }
 0x6c2   : > { %v818_v33 = vmul.f32 %v989_v29, %v814_v32 }
 0x6c4   : > { %v822_v34 = vadd.f32 %v990_v31, %v818_v33 }
 0x6c6   : > { %v823_v35 = vpack.c.bf16 %v822_v34, %v822_v34 }
 0x6c8   : > { %825 = vst.msk [vmem:[%s348_s10] sm:$0xf] %vm421_vm1, %v823_v35 }
 0x6c9 PF: > { %s18_s29 = sadd.s32 1, %s1033_s29   ;;  %s1228_s27 = smov %s1029_s28 }
 0x6ca   : > { %p15_p5 = scmp.ge.s32.totalorder %s18_s29, 4   ;;  %s1229_s28 = smov %s1231_s30 }
 0x6cc   :  { %17 = sbr.rel (!%p15_p5) target bundleno = 2 (0x2), region = 89 }

// kernel: detr_transformer.12
= control target key start
LH: loop header
LB: loop body
LE: loop exit
PB: predicated region body
PF: predicated region fallthrough
CT: control target
= control target key end

     0   :  { %13 = vsyncpa [#allocation5], 0  ;;  %s1168_s27 = smov 0   ;;  %s1170_s28 = smov 0   ;;  %s1297_s0 = inlined_call_operand.vmem [shape: bf16[2,8,32], index: 0, kind: input, shape index: {}, may-alias: {0,1}]   ;;  %s1298_s1 = inlined_call_operand.vmem [shape: bf16[2,8,32], index: 1, kind: input, shape index: {}, may-alias: {0,1}]   ;;  %s1299_s2 = inlined_call_operand.vmem [shape: bf16[32,96], index: 2, kind: input, shape index: {}]   ;;  %s1300_s3 = inlined_call_operand.vmem [shape: f32[1,96], index: 3, kind: input, shape index: {}]   ;;  %s1301_s4 = inlined_call_operand.hbm [shape: bf16[32,32], index: 4, kind: input, shape index: {}]   ;;  %s1302_s5 = inlined_call_operand.vmem [shape: f32[1,32], index: 5, kind: input, shape index: {}]   ;;  %s1303_s6 = inlined_call_operand.vmem [shape: f32[1,32], index: 6, kind: input, shape index: {}]   ;;  %s1304_s7 = inlined_call_operand.vmem [shape: f32[1,32], index: 7, kind: input, shape index: {}]   ;;  %s1305_s8 = inlined_call_operand.vmem [shape: bf16[2,8,32], index: 8, kind: output, shape index: {}]  }
   0x1   :  { %s1172_s29 = smov 0  }
   0x2 LB: > { %s942_s30 = sadd.s32 4294967295, %s1112_s29   ;;  %s31_s9 = sadd.s32 1, %s1108_s28  ;;  %s1112_s29 = sphi %s1172_s29, %s19_s29   ;;  %s1108_s28 = sphi %s1170_s28, %s1307_s28   ;;  %s1104_s27 = sphi %s1168_s27, %s1306_s27  }
   0x3   : > { %p33_p0 = scmp.ge.s32.totalorder %s31_s9, 2  ;;  %p944_p1 = scmp.ge.s32.totalorder %s1112_s29, 1 }
   0x4   : > { %p244_p2 = scmp.lt.s32.totalorder %s1112_s29, 3  ;;  %p997_p4 = scmp.eq.s32.totalorder %s942_s30, 0 }
   0x5   : > { %s1309_s9 = smov (%p33_p0, %s31_s9), 0  ;;  %s261_s12 = sshll.u32 %s1301_s4, 4  ;;  %s262_s12 = int_to_ptr.hbm [resolvable:$true] %s261_s12 }
   0x6   : > { %p245_p3 = pnand %p944_p1, %p244_p2  ;;  %s1114_s13 = smov [#allocation4]  }
   0x7   : > { %s263_s14 = sshll.u32 %s1114_s13, 4  ;;  %s1115_s15 = smov 64   ;;  %s264_s14 = int_to_ptr.vmem [resolvable:$true] %s263_s14 }
   0x8   : > { %p993_p5 = pneg %p245_p3  ;;  %s1116_s16 = smov 4  }
   0x9   : > { %305 = sbr.rel (%p245_p3) target bundleno = 1740 (0x6cc), region = 52 }
   0xa   : > { %p994_p6 = pnand %p997_p4, %p993_p5 }
   0xc   : > { %996 = dma.hbm_to_vmem [thread:$0]  (!%p994_p6), %s262_s12, 256, %s264_s14, [#allocation5], %s1115_s15, %s1115_s15, %s1116_s16  }
   0xe   : > { %1099 = dma.done.wait (%p997_p4), [#allocation5], 256  }
   0xf   : > { %1101 = vsyncadd (%p997_p4), [#allocation5], 4294967040  ;;  %v988_v0 = vld [vmem:[%s1299_s2 + $0x8] sm:$0xff]  ;;  %s1117_s19 = smov 96   ;;  %v986_v1 = vld [vmem:[%s1299_s2] sm:$0xff]  ;;  %p348_p7 = scmp.lt.s32.totalorder %s1104_s27, 1 }
  0x10   : > { %391 = vrot.lane.b32.xlu0 %v988_v0, %s1117_s19  ;;  %v987_v2 = vld [vmem:[%s1299_s2 + $0x8] sm:$0xff]  ;;  %v985_v3 = vld [vmem:[%s1299_s2] sm:$0xff]  ;;  %vm398_vm0 = vcmask 261120   ;;  %s1118_s16 = smov 64   ;;  %vm438_vm1 = vcmask 257024   ;;  %vm483_vm2 = vcmask 64512  }
  0x11   : > { %s1311_s27 = smov (!%p348_p7, %s1104_s27), 1  ;;  %468 = vmatpush.bf16.msra.mxu2 %v987_v2  ;;  %v1032_v5 = vld [vmem:[%s1300_s3] ss:$0 sm:$0xff]  ;;  %415 = vrot.lane.b32.xlu2 %v986_v1, %s1118_s16  ;;  %s1119_s17 = smov 120   ;;  %vm518_vm3 = vcmask 1043456  }
  0x12   : > { %s1203_s24 = sshll.u32 %s1311_s27, 2  ;;  %395 = vrot.lane.b32.xlu1 %v1032_v5, %s1117_s19  ;;  %s1120_s18 = smov 112   ;;  %v479_v55 = vld [vmem:[#allocation4] sm:$0xf] }
  0x13   : > { %s358_s11 = scalar_lea.vmem %s1298_s1, %s1203_s24  ;;  %s351_s15 = scalar_lea.vmem %s1297_s0, %s1203_s24  ;;  %v625_v57 = vsel %vm518_vm3, %v479_v55, 0 }
  0x14   : > { %v1212_v4 = vld [vmem:[%s358_s11] sm:$0xf]  ;;  %s365_s11 = scalar_lea.vmem %s1305_s8, %s1203_s24 }
  0x15   : > { %469 = vmatpush.bf16.msra.mxu2 %v985_v3  ;;  %v376_v8 = vld [vmem:[%s351_s15] sm:$0xf] }
  0x18   : > { %389 = vrot.lane.b32.xlu0 %v986_v1, %s1117_s19  ;;  %970 = vmatmul.msk.bf16.vlgmr.msra.gmra.mxu2 %vm398_vm0, %v1212_v4  ;;  %s1121_s19 = smov 104  }
  0x1a   : > { %417 = vrot.lane.b32.xlu1 %v988_v0, %s1118_s16 }
  0x20   : > { %421 = vrot.lane.b32.xlu0 %v1032_v5, %s1118_s16 }
  0x6b   : > { %v416_v25 = vpop.permute.xlu2 %415 }
  0x82   : > { %v392_v6 = vpop.permute.xlu0 %391 }
  0x83   : > { %408 = vmatpush.bf16.msra.mxu0 %v392_v6 }
  0x84   : > { %v396_v11 = vpop.permute.xlu1 %395 }
  0x8a   : > { %v390_v7 = vpop.permute.xlu0 %389 }
  0x8b   : > { %409 = vmatpush.bf16.msra.mxu0 %v390_v7 }
  0x8c   : > { %v418_v24 = vpop.permute.xlu1 %417 }
  0x8d   : > { %430 = vmatpush.bf16.msra.mxu1 %v418_v24 }
  0x8e   : > { %960 = vmatmul.msk.bf16.vlgmr.msra.gmra.mxu0 %vm398_vm0, %v376_v8 }
  0x91   : > { %431 = vmatpush.bf16.msra.mxu1 %v416_v25 }
  0x92   : > { %v422_v27 = vpop.permute.xlu0 %421 }
  0x94   : > { %961 = vmatmul.msk.bf16.vlgmr.msra.gmra.mxu1 %vm398_vm0, %v376_v8 }
  0x9b   : > { %v471_v9 = vpop.f32.mrf.mxu2 }
  0x9c   : > { %v472_v15 = vadd.f32 %v1032_v5, %v471_v9 }
  0x9e   : > { %v475_v17 = vmul.f32 0.35355338, %v472_v15 }
  0xa0   : > { %v476_v19 = vpack.c.bf16 %v475_v17, %v475_v17 }
  0xa2   : > { %v537_v23 = vunpack.c.l.b16 %v476_v19 }
  0xa3   : > { %v473_v10 = vpop.f32.mrf.mxu2 }
  0xa4   : > { %v538_v26 = vpack.c.b16 %v537_v23, %v537_v23 }
 0x10b   : > { %v411_v12 = vpop.f32.mrf.mxu0 }
 0x10c   : > { %v412_v13 = vadd.f32 %v411_v12, %v396_v11 }
 0x10e   : > { %v437_v14 = vpack.c.bf16 %v412_v13, %v412_v13 }
 0x110   : > { %439 = vst.msk [vmem:[#allocation2] sm:$0xf] %vm438_vm1, %v437_v14 }
 0x111   : > { %v433_v33 = vpop.f32.mrf.mxu1 }
 0x112   : > { %v434_v34 = vadd.f32 %v433_v33, %v422_v27 }
 0x113   : > { %v413_v16 = vpop.f32.mrf.mxu0 }
 0x114   : > { %v440_v37 = vpack.c.bf16 %v434_v34, %v434_v34 }
 0x116   : > { %441 = vst.msk [vmem:[#allocation3] sm:$0xf] %vm438_vm1, %v440_v37  ;;  %v480_v37 = vld [vmem:[#allocation4 + $0x4] sm:$0xf] }
 0x117   : > { %v477_v18 = vld [vmem:[#allocation2] sm:$0xf] }
 0x118   : > { %v488_v20 = vsel %vm483_vm2, %v477_v18, 0  ;;  %v542_v21 = vunpack.c.l.b16 %v477_v18 }
 0x119   : > { %497 = vmatpush.bf16.xpose.msra.mxu3 %v488_v20  ;;  %v435_v39 = vpop.f32.mrf.mxu1 }
 0x11a   : > { %v543_v22 = vpack.c.b16 %v542_v21, %v542_v21  ;;  %v606_v39 = vsel %vm518_vm3, %v480_v37, 0 }
 0x11c   : > { %544 = vrot.lane.b32.xlu0 %v543_v22, %s1119_s17 }
 0x11d   : > { %v478_v52 = vld [vmem:[#allocation3] sm:$0xf] }
 0x11e   : > { %v520_v53 = vsel %vm518_vm3, %v478_v52, 0  ;;  %v578_v54 = vunpack.c.l.b16 %v478_v52 }
 0x11f   : > { %529 = vmatpush.bf16.msrb.mxu0 %v520_v53  ;;  %v482_v53 = vld [vmem:[#allocation4 + $0xc] sm:$0xf] }
 0x120   : > { %971 = vmatmul.msk.bf16.vlgmr.msra.gmra.mxu3 %vm483_vm2, %v476_v19  ;;  %v579_v56 = vpack.c.b16 %v578_v54, %v578_v54  ;;  %v778_v54 = vsel %vm518_vm3, %v482_v53, 0 }
 0x121   : > { %615 = vmatpush.bf16.msrb.mxu3 %v606_v39 }
 0x123   : > { %634 = vmatpush.bf16.msra.mxu0 %v625_v57 }
 0x124   : > { %539 = vrot.lane.b32.xlu0 %v538_v26, %s1119_s17 }
 0x12c   : > { %642 = vrot.lane.b32.xlu0 %v543_v22, %s1120_s18 }
 0x134   : > { %640 = vrot.lane.b32.xlu0 %v538_v26, %s1120_s18 }
 0x13c   : > { %717 = vrot.lane.b32.xlu0 %v538_v26, %s1121_s19 }
 0x18e   : > { %v545_v28 = vpop.permute.xlu0 %544 }
 0x18f   : > { %v550_v29 = vsel %vm483_vm2, %v545_v28, 0 }
 0x190   : > { %559 = vmatpush.bf16.xpose.msrb.mxu1 %v550_v29 }
 0x196   : > { %v540_v30 = vpop.permute.xlu0 %539 }
 0x197   : > { %973 = vmatmul.msk.bf16.vlgmr.msrb.gmra.mxu1 %vm483_vm2, %v540_v30 }
 0x19e   : > { %v643_v31 = vpop.permute.xlu0 %642 }
 0x19f   : > { %v648_v32 = vsel %vm483_vm2, %v643_v31, 0 }
 0x1a0   : > { %657 = vmatpush.bf16.xpose.msra.mxu1 %v648_v32 }
 0x1a3   : > { %v499_v35 = vpop.f32.mrf.mxu3 }
 0x1a4   : > { %v503_v36 = vsel %vm483_vm2, %v499_v35, -inf }
 0x1a5   : > { %504 = vmax.xlane.f32.xlu2 %v503_v36 }
 0x1a6   : > { %v641_v38 = vpop.permute.xlu0 %640 }
 0x1a7   : > { %977 = vmatmul.msk.bf16.vlgmr.msra.gmra.mxu1 %vm483_vm2, %v641_v38 }
 0x1ab   : > { %v501_v40 = vpop.f32.mrf.mxu3 }
 0x1ae   : > { %v718_v9 = vpop.permute.xlu0 %717 }
 0x1bd   : > { %719 = vrot.lane.b32.xlu2 %v543_v22, %s1121_s19 }
 0x214   : > { %v561_v41 = vpop.f32.mrf.mxu1 }
 0x215   : > { %v565_v51 = vsel %vm483_vm2, %v561_v41, -inf }
 0x218   : > { %v505_v42 = vpop.xlane.xlu2 %504 }
 0x219   : > { %v506_v43 = vsub.f32 %v499_v35, %v505_v42 }
 0x21b   : > { %v507_v44 = vmul.f32 1.442695, %v506_v43 }
 0x21c   : > { %v563_v45 = vpop.f32.mrf.mxu1 }
 0x21d   : > { %1036 = vpow2.f32 %v507_v44 }
 0x220   : > { %v720_v62 = vpop.permute.xlu2 %719 }
 0x221   : > { %v725_v2 = vsel %vm483_vm2, %v720_v62, 0 }
 0x223   : > { %v1037_v46 = vpop.eup %1036 }
 0x224   : > { %v659_v47 = vpop.f32.mrf.mxu1  ;;  %v509_v48 = vsel %vm483_vm2, %v1037_v46, 0.0 }
 0x225   : > { %510 = vadd.xlane.f32.xlu1 %v509_v48  ;;  %v663_v49 = vsel %vm483_vm2, %v659_v47, -inf  ;;  %v481_v48 = vld [vmem:[#allocation4 + $0x8] sm:$0xf] }
 0x226   : > { %664 = vmax.xlane.f32.xlu0 %v663_v49  ;;  %v701_v49 = vsel %vm518_vm3, %v481_v48, 0 }
 0x227   : > { %710 = vmatpush.bf16.msra.mxu3 %v701_v49 }
 0x22c   : > { %v661_v50 = vpop.f32.mrf.mxu1 }
 0x22d   : > { %566 = vmax.xlane.f32.xlu1 %v565_v51 }
 0x23a   : > { %675 = vrot.lane.b32.xlu0 %v579_v56, %s1120_s18 }
 0x298   : > { %v511_v58 = vpop.xlane.xlu1 %510 }
 0x299   : > { %1038 = vrcp.f32 %v511_v58  ;;  %v665_v15 = vpop.xlane.xlu0 %664 }
 0x29a   : > { %v666_v16 = vsub.f32 %v659_v47, %v665_v15 }
 0x29c   : > { %v667_v17 = vmul.f32 1.442695, %v666_v16 }
 0x29f   : > { %v1039_v59 = vpop.eup %1038 }
 0x2a0   : > { %v513_v60 = vmul.f32 %v1039_v59, %v1037_v46  ;;  %v567_v61 = vpop.xlane.xlu1 %566 }
 0x2a1   : > { %v568_v63 = vsub.f32 %v561_v41, %v567_v61 }
 0x2a2   : > { %v514_v0 = vpack.c.bf16 %v513_v60, %v513_v60 }
 0x2a3   : > { %v569_v1 = vmul.f32 1.442695, %v568_v63 }
 0x2a4   : > { %972 = vmatmul.msk.bf16.vlgmr.msrb.gmra.mxu0 %vm483_vm2, %v514_v0  ;;  %v1033_v0 = vld [vmem:[%s1302_s5] ss:$0 sm:$0xff] }
 0x2a5   : > { %1040 = vpow2.f32 %v569_v1  ;;  %734 = vmatpush.bf16.xpose.msrb.mxu0 %v725_v2  ;;  %v799_v2 = vunpack.c.l.bf16 %v1212_v4 }
 0x2a6   : > { %1042 = vpow2.f32 %v667_v17 }
 0x2ab   : > { %v1041_v3 = vpop.eup %1040 }
 0x2ac   : > { %v571_v5 = vsel %vm483_vm2, %v1041_v3, 0.0  ;;  %v1043_v18 = vpop.eup %1042  ;;  %v676_v27 = vpop.permute.xlu0 %675 }
 0x2ad   : > { %572 = vadd.xlane.f32.xlu2 %v571_v5  ;;  %v669_v19 = vsel %vm483_vm2, %v1043_v18, 0.0  ;;  %v681_v31 = vsel %vm518_vm3, %v676_v27, 0 }
 0x320   : > { %v573_v24 = vpop.xlane.xlu2 %572 }
 0x321   : > { %v531_v6 = vpop.f32.mrf.mxu0 }
 0x322   : > { %v535_v7 = vpack.c.bf16 %v531_v6, %v531_v6 }
 0x324   : > { %976 = vmatmul.msk.bf16.vlgmr.msra.gmra.mxu0 %vm483_vm2, %v535_v7 }
 0x329   : > { %v533_v8 = vpop.f32.mrf.mxu0 }
 0x334   : > { %980 = vmatmul.msk.bf16.vlgmr.msrb.gmra.mxu0 %vm483_vm2, %v718_v9  ;;  %v1122_v9 = vmov 32.0  }
 0x3a1   : > { %v1251_v10 = vpop.f32.mrf.mxu0 }
 0x3a9   : > { %v638_v11 = vpop.f32.mrf.mxu0 }
 0x3b1   : > { %v736_v12 = vpop.f32.mrf.mxu0 }
 0x3b2   : > { %v740_v13 = vsel %vm483_vm2, %v736_v12, -inf }
 0x3b3   : > { %741 = vmax.xlane.f32.xlu1 %v740_v13 }
 0x3b9   : > { %v738_v14 = vpop.f32.mrf.mxu0 }
 0x3cc   : > { %580 = vrot.lane.b32.xlu1 %v579_v56, %s1119_s17 }
 0x3f6   : > { %670 = vadd.xlane.f32.xlu1 %v669_v19 }
 0x426   : > { %v742_v20 = vpop.xlane.xlu1 %741 }
 0x427   : > { %v743_v21 = vsub.f32 %v736_v12, %v742_v20 }
 0x429   : > { %v744_v22 = vmul.f32 1.442695, %v743_v21 }
 0x42b   : > { %1044 = vpow2.f32 %v744_v22 }
 0x42c   : > { %1046 = vrcp.f32 %v573_v24 }
 0x431   : > { %v1045_v23 = vpop.eup %1044 }
 0x432   : > { %v746_v25 = vsel %vm483_vm2, %v1045_v23, 0.0  ;;  %v1047_v26 = vpop.eup %1046 }
 0x433   : > { %747 = vadd.xlane.f32.xlu2 %v746_v25  ;;  %v575_v28 = vmul.f32 %v1047_v26, %v1041_v3 }
 0x435   : > { %v576_v32 = vpack.c.bf16 %v575_v28, %v575_v28 }
 0x43e   : > { %v581_v29 = vpop.permute.xlu1 %580 }
 0x43f   : > { %v586_v30 = vsel %vm518_vm3, %v581_v29, 0  ;;  %v1034_v29 = vld [vmem:[%s1303_s6] ss:$0 sm:$0xff] }
 0x440   : > { %595 = vmatpush.bf16.msrb.mxu2 %v586_v30 }
 0x443   : > { %974 = vmatmul.msk.bf16.vlgmr.msrb.gmra.mxu2 %vm483_vm2, %v576_v32 }
 0x444   : > { %690 = vmatpush.bf16.msra.mxu2 %v681_v31  ;;  %v1035_v31 = vld [vmem:[%s1304_s7] ss:$0 sm:$0xff] }
 0x448   : > { %787 = vmatpush.bf16.msrb.mxu2 %v778_v54 }
 0x44b   : > { %752 = vrot.lane.b32.xlu2 %v579_v56, %s1121_s19 }
 0x469   : > { %v671_v33 = vpop.xlane.xlu1 %670 }
 0x46a   : > { %1048 = vrcp.f32 %v671_v33 }
 0x470   : > { %v1049_v34 = vpop.eup %1048 }
 0x471   : > { %v673_v35 = vmul.f32 %v1049_v34, %v1043_v18 }
 0x473   : > { %v674_v36 = vpack.c.bf16 %v673_v35, %v673_v35 }
 0x475   : > { %978 = vmatmul.msk.bf16.vlgmr.msra.gmra.mxu2 %vm483_vm2, %v674_v36 }
 0x4a6   : > { %v748_v38 = vpop.xlane.xlu2 %747 }
 0x4a7   : > { %1050 = vrcp.f32 %v748_v38 }
 0x4a8   : > { %1052 = vrcp.f32 %v1122_v9 }
 0x4ad   : > { %v1051_v40 = vpop.eup %1050 }
 0x4ae   : > { %v750_v41 = vmul.f32 %v1051_v40, %v1045_v23  ;;  %v753_v42 = vpop.permute.xlu2 %752  ;;  %v1053_v11 = vpop.eup %1052 }
 0x4af   : > { %v758_v43 = vsel %vm518_vm3, %v753_v42, 0  ;;  %v807_v12 = vmul.f32 32.0, %v1053_v11  ;;  %vm811_vm4 = vweird.f32 %v1053_v11 }
 0x4b0   : > { %v751_v44 = vpack.c.bf16 %v750_v41, %v750_v41  ;;  %767 = vmatpush.bf16.msrb.mxu1 %v758_v43 }
 0x4b3   : > { %981 = vmatmul.msk.bf16.vlgmr.msrb.gmra.mxu1 %vm483_vm2, %v751_v44 }
 0x4c6   : > { %v597_v45 = vpop.f32.mrf.mxu2 }
 0x4c7   : > { %v601_v46 = vpack.c.bf16 %v597_v45, %v597_v45 }
 0x4c9   : > { %975 = vmatmul.msk.bf16.vlgmr.msrb.gmra.mxu3 %vm483_vm2, %v601_v46 }
 0x4ce   : > { %v599_v47 = vpop.f32.mrf.mxu2 }
 0x4f8   : > { %v692_v50 = vpop.f32.mrf.mxu2 }
 0x4f9   : > { %v696_v51 = vpack.c.bf16 %v692_v50, %v692_v50 }
 0x4fb   : > { %979 = vmatmul.msk.bf16.vlgmr.msra.gmra.mxu3 %vm483_vm2, %v696_v51 }
 0x500   : > { %v694_v52 = vpop.f32.mrf.mxu2 }
 0x530   : > { %v769_v55 = vpop.f32.mrf.mxu1 }
 0x531   : > { %v773_v56 = vpack.c.bf16 %v769_v55, %v769_v55 }
 0x533   : > { %982 = vmatmul.msk.bf16.vlgmr.msrb.gmra.mxu2 %vm483_vm2, %v773_v56 }
 0x538   : > { %v771_v57 = vpop.f32.mrf.mxu1 }
 0x54c   : > { %v617_v58 = vpop.f32.mrf.mxu3 }
 0x54d   : > { %v637_v62 = vadd.f32 %v1251_v10, %v617_v58  ;;  %v808_v10 = vsub.f32 1.0, %v807_v12 }
 0x54f   : > { %v809_v13 = vmul.f32 %v1053_v11, %v808_v10 }
 0x551   : > { %v810_v14 = vadd.f32 %v1053_v11, %v809_v13 }
 0x553   : > { %v812_v15 = vsel %vm811_vm4, %v1053_v11, %v810_v14 }
 0x554   : > { %v619_v59 = vpop.f32.mrf.mxu3 }
 0x57e   : > { %v712_v60 = vpop.f32.mrf.mxu3 }
 0x57f   : > { %v716_v63 = vadd.f32 %v712_v60, %v637_v62 }
 0x586   : > { %v714_v61 = vpop.f32.mrf.mxu3 }
 0x5b6   : > { %v789_v1 = vpop.f32.mrf.mxu2 }
 0x5b7   : > { %v793_v3 = vadd.f32 %v789_v1, %v716_v63 }
 0x5b9   : > { %v798_v5 = vadd.f32 %v1033_v0, %v793_v3 }
 0x5bb   : > { %v800_v6 = vadd.f32 %v799_v2, %v798_v5 }
 0x5bd   : > { %v803_v7 = vsel %vm398_vm0, %v800_v6, 0.0 }
 0x5be   : > { %v791_v8 = vpop.f32.mrf.mxu2  ;;  %804 = vadd.xlane.f32.xlu0 %v803_v7 }
 0x631   : > { %v805_v16 = vpop.xlane.xlu0 %804 }
 0x632   : > { %v813_v17 = vmul.f32 %v812_v15, %v805_v16 }
 0x634   : > { %v814_v18 = vsub.f32 %v800_v6, %v813_v17 }
 0x636   : > { %v815_v4 = vmul.f32 %v814_v18, %v814_v18 }
 0x638   : > { %v816_v19 = vsel %vm398_vm0, %v815_v4, 0.0 }
 0x639   : > { %817 = vadd.xlane.f32.xlu1 %v816_v19 }
 0x6ac   : > { %v818_v20 = vpop.xlane.xlu1 %817 }
 0x6ad   : > { %v819_v21 = vmul.f32 %v818_v20, %v812_v15 }
 0x6af   : > { %v820_v22 = vadd.f32 1e-05, %v819_v21 }
 0x6b1   : > { %1054 = vrsqrt.f32 %v820_v22  ;;  %vm827_vm6 = vweird.f32 %v820_v22 }
 0x6b7   : > { %v1055_v23 = vpop.eup %1054 }
 0x6b8   : > { %v822_v24 = vmul.f32 %v1055_v23, %v820_v22  ;;  %vm828_vm5 = vweird.f32 %v1055_v23 }
 0x6b9   : > { %vm829_vm7 = vmor %vm827_vm6, %vm828_vm5 }
 0x6ba   : > { %v823_v25 = vmul.f32 %v1055_v23, %v822_v24 }
 0x6bc   : > { %v824_v26 = vmul.f32 0.5, %v823_v25 }
 0x6be   : > { %v825_v27 = vsub.f32 1.5, %v824_v26 }
 0x6c0   : > { %v826_v28 = vmul.f32 %v1055_v23, %v825_v27 }
 0x6c2   : > { %v830_v30 = vsel %vm829_vm7, %v1055_v23, %v826_v28 }
 0x6c3   : > { %v831_v32 = vmul.f32 %v830_v30, %v814_v18 }
 0x6c5   : > { %v835_v33 = vmul.f32 %v1034_v29, %v831_v32 }
 0x6c7   : > { %v839_v34 = vadd.f32 %v1035_v31, %v835_v33 }
 0x6c9   : > { %v840_v35 = vpack.c.bf16 %v839_v34, %v839_v34 }
 0x6cb   : > { %842 = vst.msk [vmem:[%s365_s11] sm:$0xf] %vm438_vm1, %v840_v35 }
 0x6cc PF: > { %s19_s29 = sadd.s32 1, %s1112_s29   ;;  %s1306_s27 = smov %s1108_s28 }
 0x6cd   : > { %p16_p8 = scmp.ge.s32.totalorder %s19_s29, 4   ;;  %s1307_s28 = smov %s1309_s9 }
 0x6cf   :  { %18 = sbr.rel (!%p16_p8) target bundleno = 2 (0x2), region = 94 }
 0x6d4   :  { %868 = vsyncpa [#allocation5], 1 }
 0x6d5   :  { %870 = vsyncpa [#allocation5 + $0x1], 1 }

// kernel: detr_transformer.14
= control target key start
LH: loop header
LB: loop body
LE: loop exit
PB: predicated region body
PF: predicated region fallthrough
CT: control target
= control target key end

     0   :  { %14 = vsyncpa [#allocation5], 0  ;;  %s1688_s0 = inlined_call_operand.vmem [shape: bf16[2,8,32], index: 0, kind: input, shape index: {}, may-alias: {0,1}]   ;;  %s1689_s1 = inlined_call_operand.vmem [shape: bf16[2,8,32], index: 1, kind: input, shape index: {}, may-alias: {0,1}]   ;;  %s1690_s2 = inlined_call_operand.vmem [shape: bf16[32,96], index: 2, kind: input, shape index: {}]   ;;  %s1691_s3 = inlined_call_operand.hbm [shape: f32[1,96], index: 3, kind: input, shape index: {}]   ;;  %s1692_s4 = inlined_call_operand.hbm [shape: bf16[32,32], index: 4, kind: input, shape index: {}]   ;;  %s1693_s5 = inlined_call_operand.hbm [shape: f32[1,32], index: 5, kind: input, shape index: {}]   ;;  %s1694_s6 = inlined_call_operand.hbm [shape: f32[1,32], index: 6, kind: input, shape index: {}]   ;;  %s1695_s7 = inlined_call_operand.hbm [shape: f32[1,32], index: 7, kind: input, shape index: {}]   ;;  %s1696_s8 = inlined_call_operand.vmem [shape: f32[8,8], index: 8, kind: input, shape index: {}]   ;;  %s1697_s9 = inlined_call_operand.vmem [shape: bf16[2,8,32], index: 9, kind: output, shape index: {}]  }
   0x1   :  { %15 = vsyncpa [#allocation7], 0 }
   0x2   :  { %16 = vsyncpa [#allocation10], 0  ;;  %s1510_s30 = smov 0   ;;  %s1512_s10 = smov 0  }
   0x3   :  { %s1514_s11 = smov 0  }
   0x4 LB: > { %s299_s14 = sshll.u32 %s1692_s4, 4  ;;  %s1098_s15 = sadd.s32 4294967295, %s1445_s11   ;;  %s1445_s11 = sphi %s1514_s11, %s22_s11   ;;  %s1441_s10 = sphi %s1512_s10, %s1702_s10   ;;  %s1437_s30 = sphi %s1510_s30, %s1701_s30   ;;  %s300_s14 = int_to_ptr.hbm [resolvable:$true] %s299_s14 }
   0x5   : > { %p1100_p0 = scmp.ge.s32.totalorder %s1445_s11, 1  ;;  %p273_p1 = scmp.lt.s32.totalorder %s1445_s11, 3 }
   0x6   : > { %p1531_p2 = scmp.eq.s32.totalorder %s1098_s15, 0  ;;  %s1447_s18 = smov [#allocation6]  }
   0x7   : > { %p1535_p3 = pnand %p1100_p0, %p273_p1  ;;  %s301_s19 = sshll.u32 %s1447_s18, 4  ;;  %s302_s19 = int_to_ptr.vmem [resolvable:$true] %s301_s19 }
   0x8   : > { %s326_s22 = sshll.u32 %s1694_s6, 4  ;;  %s1448_s24 = smov [#allocation9]   ;;  %s327_s22 = int_to_ptr.hbm [resolvable:$true] %s326_s22 }
   0x9   : > { %p1174_p4 = pneg %p1535_p3  ;;  %s328_s25 = sshll.u32 %s1448_s24, 4  ;;  %s329_s25 = int_to_ptr.vmem [resolvable:$true] %s328_s25 }
   0xa   : > { %s1449_s26 = smov 64   ;;  %s1450_s27 = smov 4  }
   0xb   : > { %p1546_p5 = pnand %p1531_p2, %p1174_p4  ;;  %s288_s12 = sshll.u32 %s1691_s3, 4  ;;  %s289_s12 = int_to_ptr.hbm [resolvable:$true] %s288_s12 }
   0xc   : > { %s34_s13 = sadd.s32 1, %s1441_s10  ;;  %s1451_s15 = smov [#allocation4]  }
   0xd   : > { %1180 = dma.hbm_to_vmem [thread:$0]  (!%p1546_p5), %s300_s14, 256, %s302_s19, [#allocation7], %s1449_s26, %s1449_s26, %s1450_s27  }
   0xe   : > { %1186 = dma.hbm_to_vmem [thread:$0]  (!%p1546_p5), %s327_s22, 16, %s329_s25, [#allocation10]  }
   0xf   : > { %p36_p6 = scmp.ge.s32.totalorder %s34_s13, 2  ;;  %s290_s18 = sshll.u32 %s1451_s15, 4  ;;  %s291_s18 = int_to_ptr.vmem [resolvable:$true] %s290_s18 }
  0x10   : > { %s314_s24 = sshll.u32 %s1693_s5, 4  ;;  %s338_s22 = sshll.u32 %s1695_s7, 4  ;;  %s315_s24 = int_to_ptr.hbm [resolvable:$true] %s314_s24  ;;  %s339_s22 = int_to_ptr.hbm [resolvable:$true] %s338_s22 }
  0x11   : > { %s1704_s13 = smov (%p36_p6, %s34_s13), 0  ;;  %s1452_s25 = smov [#allocation8]  }
  0x12   : > { %1177 = dma.hbm_to_vmem [thread:$0]  (!%p1546_p5), %s289_s12, 16, %s291_s18, [#allocation5]  }
  0x13   : > { %s316_s26 = sshll.u32 %s1452_s25, 4  ;;  %s1453_s27 = smov [#allocation11]   ;;  %s317_s26 = int_to_ptr.vmem [resolvable:$true] %s316_s26 }
  0x14   : > { %1183 = dma.hbm_to_vmem [thread:$0]  (!%p1546_p5), %s315_s24, 16, %s317_s26, [#allocation7]  }
  0x15   : > { %s340_s28 = sshll.u32 %s1453_s27, 4  ;;  %377 = sbr.rel (%p1535_p3) target bundleno = 1760 (0x6e0), region = 56  ;;  %s341_s28 = int_to_ptr.vmem [resolvable:$true] %s340_s28 }
  0x16   : > { %1189 = dma.hbm_to_vmem [thread:$0]  (!%p1546_p5), %s339_s22, 16, %s341_s28, [#allocation10]  }
  0x1a   : > { %1424 = dma.done.wait (%p1531_p2), [#allocation5], 16  }
  0x1b   : > { %1426 = vsyncadd (%p1531_p2), [#allocation5], 4294967280 }
  0x1c   : > { %1428 = dma.done.wait (%p1531_p2), [#allocation7], 272  }
  0x1d   : > { %1430 = vsyncadd (%p1531_p2), [#allocation7], 4294967024 }
  0x1e   : > { %1432 = dma.done.wait (%p1531_p2), [#allocation10], 32  }
  0x1f   : > { %1434 = vsyncadd (%p1531_p2), [#allocation10], 4294967264  ;;  %v1153_v0 = vld [vmem:[%s1690_s2 + $0x8] sm:$0xff]  ;;  %s1454_s29 = smov 96   ;;  %v1151_v1 = vld [vmem:[%s1690_s2] sm:$0xff]  ;;  %p446_p7 = scmp.lt.s32.totalorder %s1437_s30, 1 }
  0x20   : > { %493 = vrot.lane.b32.xlu0 %v1153_v0, %s1454_s29  ;;  %v1152_v2 = vld [vmem:[%s1690_s2 + $0x8] sm:$0xff]  ;;  %v1150_v3 = vld [vmem:[%s1690_s2] sm:$0xff]  ;;  %vm500_vm0 = vcmask 261120   ;;  %s1455_s27 = smov 64   ;;  %vm540_vm1 = vcmask 257024   ;;  %vm586_vm2 = vcmask 64512  }
  0x21   : > { %s1706_s30 = smov (!%p446_p7, %s1437_s30), 1  ;;  %570 = vmatpush.bf16.msra.mxu2 %v1152_v2  ;;  %v1237_v5 = vld [vmem:[#allocation4] ss:$0 sm:$0xff]  ;;  %517 = vrot.lane.b32.xlu2 %v1151_v1, %s1455_s27  ;;  %s1456_s28 = smov 120   ;;  %v1630_v33 = vld [vmem:[%s1696_s8] sm:$0xff]  ;;  %vm621_vm3 = vcmask 1043456  }
  0x22   : > { %s1597_s16 = sshll.u32 %s1706_s30, 2  ;;  %497 = vrot.lane.b32.xlu1 %v1237_v5, %s1454_s29  ;;  %s1457_s17 = smov 112   ;;  %v581_v59 = vld [vmem:[#allocation6] sm:$0xf] }
  0x23   : > { %s456_s22 = scalar_lea.vmem %s1689_s1, %s1597_s16  ;;  %s449_s26 = scalar_lea.vmem %s1688_s0, %s1597_s16  ;;  %v728_v61 = vsel %vm621_vm3, %v581_v59, 0 }
  0x24   : > { %v1606_v4 = vld [vmem:[%s456_s22] sm:$0xf]  ;;  %s1458_s23 = smov 104   ;;  %s467_s20 = scalar_lea.vmem %s1697_s9, %s1597_s16 }
  0x25   : > { %571 = vmatpush.bf16.msra.mxu2 %v1150_v3  ;;  %v478_v8 = vld [vmem:[%s449_s26] sm:$0xf] }
  0x28   : > { %491 = vrot.lane.b32.xlu0 %v1151_v1, %s1454_s29  ;;  %1135 = vmatmul.msk.bf16.vlgmr.msra.gmra.mxu2 %vm500_vm0, %v1606_v4 }
  0x2a   : > { %519 = vrot.lane.b32.xlu1 %v1153_v0, %s1455_s27 }
  0x30   : > { %523 = vrot.lane.b32.xlu0 %v1237_v5, %s1455_s27 }
  0x7b   : > { %v518_v25 = vpop.permute.xlu2 %517 }
  0x92   : > { %v494_v6 = vpop.permute.xlu0 %493 }
  0x93   : > { %510 = vmatpush.bf16.msra.mxu0 %v494_v6 }
  0x94   : > { %v498_v11 = vpop.permute.xlu1 %497 }
  0x9a   : > { %v492_v7 = vpop.permute.xlu0 %491 }
  0x9b   : > { %511 = vmatpush.bf16.msra.mxu0 %v492_v7 }
  0x9c   : > { %v520_v24 = vpop.permute.xlu1 %519 }
  0x9d   : > { %532 = vmatpush.bf16.msra.mxu1 %v520_v24 }
  0x9e   : > { %1125 = vmatmul.msk.bf16.vlgmr.msra.gmra.mxu0 %vm500_vm0, %v478_v8 }
  0xa1   : > { %533 = vmatpush.bf16.msra.mxu1 %v518_v25 }
  0xa2   : > { %v524_v27 = vpop.permute.xlu0 %523 }
  0xa4   : > { %1126 = vmatmul.msk.bf16.vlgmr.msra.gmra.mxu1 %vm500_vm0, %v478_v8 }
  0xab   : > { %v573_v9 = vpop.f32.mrf.mxu2 }
  0xac   : > { %v574_v15 = vadd.f32 %v1237_v5, %v573_v9 }
  0xae   : > { %v577_v17 = vmul.f32 0.35355338, %v574_v15 }
  0xb0   : > { %v578_v19 = vpack.c.bf16 %v577_v17, %v577_v17 }
  0xb2   : > { %v640_v23 = vunpack.c.l.b16 %v578_v19 }
  0xb3   : > { %v575_v10 = vpop.f32.mrf.mxu2 }
  0xb4   : > { %v641_v26 = vpack.c.b16 %v640_v23, %v640_v23 }
 0x11b   : > { %v513_v12 = vpop.f32.mrf.mxu0 }
 0x11c   : > { %v514_v13 = vadd.f32 %v513_v12, %v498_v11 }
 0x11e   : > { %v539_v14 = vpack.c.bf16 %v514_v13, %v514_v13 }
 0x120   : > { %541 = vst.msk [vmem:[#allocation2] sm:$0xf] %vm540_vm1, %v539_v14 }
 0x121   : > { %v535_v34 = vpop.f32.mrf.mxu1 }
 0x122   : > { %v536_v35 = vadd.f32 %v535_v34, %v524_v27 }
 0x123   : > { %v515_v16 = vpop.f32.mrf.mxu0 }
 0x124   : > { %v542_v38 = vpack.c.bf16 %v536_v35, %v536_v35 }
 0x126   : > { %543 = vst.msk [vmem:[#allocation3] sm:$0xf] %vm540_vm1, %v542_v38 }
 0x127   : > { %v579_v18 = vld [vmem:[#allocation2] sm:$0xf] }
 0x128   : > { %v591_v20 = vsel %vm586_vm2, %v579_v18, 0  ;;  %v645_v21 = vunpack.c.l.b16 %v579_v18 }
 0x129   : > { %600 = vmatpush.bf16.xpose.msra.mxu3 %v591_v20  ;;  %v537_v41 = vpop.f32.mrf.mxu1 }
 0x12a   : > { %v646_v22 = vpack.c.b16 %v645_v21, %v645_v21 }
 0x12c   : > { %647 = vrot.lane.b32.xlu0 %v646_v22, %s1456_s28 }
 0x12d   : > { %v580_v56 = vld [vmem:[#allocation3] sm:$0xf] }
 0x12e   : > { %v623_v57 = vsel %vm621_vm3, %v580_v56, 0  ;;  %v681_v58 = vunpack.c.l.b16 %v580_v56 }
 0x12f   : > { %632 = vmatpush.bf16.msrb.mxu0 %v623_v57 }
 0x130   : > { %1136 = vmatmul.msk.bf16.vlgmr.msra.gmra.mxu3 %vm586_vm2, %v578_v19  ;;  %v682_v60 = vpack.c.b16 %v681_v58, %v681_v58  ;;  %v584_v58 = vld [vmem:[#allocation6 + $0xc] sm:$0xf] }
 0x131   : > { %v881_v59 = vsel %vm621_vm3, %v584_v58, 0 }
 0x133   : > { %737 = vmatpush.bf16.msra.mxu0 %v728_v61 }
 0x134   : > { %642 = vrot.lane.b32.xlu0 %v641_v26, %s1456_s28 }
 0x13c   : > { %745 = vrot.lane.b32.xlu0 %v646_v22, %s1457_s17 }
 0x144   : > { %743 = vrot.lane.b32.xlu0 %v641_v26, %s1457_s17 }
 0x14c   : > { %820 = vrot.lane.b32.xlu0 %v641_v26, %s1458_s23 }
 0x19e   : > { %v648_v28 = vpop.permute.xlu0 %647 }
 0x19f   : > { %v653_v29 = vsel %vm586_vm2, %v648_v28, 0 }
 0x1a0   : > { %662 = vmatpush.bf16.xpose.msrb.mxu1 %v653_v29 }
 0x1a6   : > { %v643_v30 = vpop.permute.xlu0 %642 }
 0x1a7   : > { %1138 = vmatmul.msk.bf16.vlgmr.msrb.gmra.mxu1 %vm586_vm2, %v643_v30 }
 0x1ae   : > { %v746_v31 = vpop.permute.xlu0 %745 }
 0x1af   : > { %v751_v32 = vsel %vm586_vm2, %v746_v31, 0 }
 0x1b0   : > { %760 = vmatpush.bf16.xpose.msra.mxu1 %v751_v32 }
 0x1b3   : > { %v602_v36 = vpop.f32.mrf.mxu3 }
 0x1b4   : > { %v603_v37 = vadd.f32 %v602_v36, %v1630_v33 }
 0x1b6   : > { %v744_v39 = vpop.permute.xlu0 %743  ;;  %v606_v40 = vsel %vm586_vm2, %v603_v37, -inf }
 0x1b7   : > { %1142 = vmatmul.msk.bf16.vlgmr.msra.gmra.mxu1 %vm586_vm2, %v744_v39  ;;  %607 = vmax.xlane.f32.xlu2 %v606_v40 }
 0x1bb   : > { %v604_v42 = vpop.f32.mrf.mxu3 }
 0x1bc   : > { %v582_v42 = vld [vmem:[#allocation6 + $0x4] sm:$0xf] }
 0x1be   : > { %v821_v13 = vpop.permute.xlu0 %820 }
 0x1cf   : > { %822 = vrot.lane.b32.xlu2 %v646_v22, %s1458_s23 }
 0x224   : > { %v664_v43 = vpop.f32.mrf.mxu1 }
 0x225   : > { %v665_v53 = vadd.f32 %v664_v43, %v1630_v33 }
 0x227   : > { %v668_v55 = vsel %vm586_vm2, %v665_v53, -inf }
 0x22a   : > { %v608_v44 = vpop.xlane.xlu2 %607 }
 0x22b   : > { %v609_v45 = vsub.f32 %v603_v37, %v608_v44  ;;  %v709_v44 = vsel %vm621_vm3, %v582_v42, 0 }
 0x22c   : > { %v666_v46 = vpop.f32.mrf.mxu1  ;;  %718 = vmatpush.bf16.msrb.mxu3 %v709_v44 }
 0x22d   : > { %v610_v47 = vmul.f32 1.442695, %v609_v45 }
 0x22f   : > { %1241 = vpow2.f32 %v610_v47 }
 0x232   : > { %v823_v2 = vpop.permute.xlu2 %822 }
 0x233   : > { %v828_v7 = vsel %vm586_vm2, %v823_v2, 0 }
 0x234   : > { %v762_v48 = vpop.f32.mrf.mxu1 }
 0x235   : > { %v1242_v49 = vpop.eup %1241  ;;  %v763_v50 = vadd.f32 %v762_v48, %v1630_v33 }
 0x236   : > { %v612_v51 = vsel %vm586_vm2, %v1242_v49, 0.0 }
 0x237   : > { %613 = vadd.xlane.f32.xlu1 %v612_v51  ;;  %v766_v52 = vsel %vm586_vm2, %v763_v50, -inf }
 0x238   : > { %767 = vmax.xlane.f32.xlu0 %v766_v52 }
 0x23c   : > { %v764_v54 = vpop.f32.mrf.mxu1 }
 0x23f   : > { %669 = vmax.xlane.f32.xlu1 %v668_v55 }
 0x24c   : > { %778 = vrot.lane.b32.xlu0 %v682_v60, %s1457_s17 }
 0x2aa   : > { %v614_v62 = vpop.xlane.xlu1 %613 }
 0x2ab   : > { %1243 = vrcp.f32 %v614_v62  ;;  %v768_v20 = vpop.xlane.xlu0 %767 }
 0x2ac   : > { %v769_v21 = vsub.f32 %v763_v50, %v768_v20 }
 0x2ae   : > { %v770_v22 = vmul.f32 1.442695, %v769_v21 }
 0x2b1   : > { %v1244_v63 = vpop.eup %1243 }
 0x2b2   : > { %v616_v0 = vmul.f32 %v1244_v63, %v1242_v49  ;;  %v670_v1 = vpop.xlane.xlu1 %669 }
 0x2b3   : > { %v671_v3 = vsub.f32 %v665_v53, %v670_v1  ;;  %v583_v53 = vld [vmem:[#allocation6 + $0x8] sm:$0xf] }
 0x2b4   : > { %v617_v5 = vpack.c.bf16 %v616_v0, %v616_v0  ;;  %v804_v54 = vsel %vm621_vm3, %v583_v53, 0 }
 0x2b5   : > { %v672_v6 = vmul.f32 1.442695, %v671_v3  ;;  %813 = vmatpush.bf16.msra.mxu3 %v804_v54 }
 0x2b6   : > { %1137 = vmatmul.msk.bf16.vlgmr.msrb.gmra.mxu0 %vm586_vm2, %v617_v5 }
 0x2b7   : > { %1245 = vpow2.f32 %v672_v6  ;;  %837 = vmatpush.bf16.xpose.msrb.mxu0 %v828_v7  ;;  %v1238_v6 = vld [vmem:[#allocation8] ss:$0 sm:$0xff] }
 0x2b8   : > { %1247 = vpow2.f32 %v770_v22 }
 0x2bd   : > { %v1246_v8 = vpop.eup %1245 }
 0x2be   : > { %v674_v9 = vsel %vm586_vm2, %v1246_v8, 0.0  ;;  %v1248_v23 = vpop.eup %1247  ;;  %v779_v32 = vpop.permute.xlu0 %778 }
 0x2bf   : > { %675 = vadd.xlane.f32.xlu2 %v674_v9  ;;  %v772_v24 = vsel %vm586_vm2, %v1248_v23, 0.0  ;;  %v784_v36 = vsel %vm621_vm3, %v779_v32, 0 }
 0x332   : > { %v676_v29 = vpop.xlane.xlu2 %675 }
 0x333   : > { %v634_v10 = vpop.f32.mrf.mxu0 }
 0x334   : > { %v638_v11 = vpack.c.bf16 %v634_v10, %v634_v10 }
 0x336   : > { %1141 = vmatmul.msk.bf16.vlgmr.msra.gmra.mxu0 %vm586_vm2, %v638_v11 }
 0x33b   : > { %v636_v12 = vpop.f32.mrf.mxu0 }
 0x346   : > { %1145 = vmatmul.msk.bf16.vlgmr.msrb.gmra.mxu0 %vm586_vm2, %v821_v13 }
 0x3b3   : > { %v1650_v14 = vpop.f32.mrf.mxu0 }
 0x3bb   : > { %v741_v15 = vpop.f32.mrf.mxu0 }
 0x3bc   : > { %v1459_v15 = vmov 32.0  }
 0x3c3   : > { %v839_v16 = vpop.f32.mrf.mxu0 }
 0x3c4   : > { %v840_v17 = vadd.f32 %v839_v16, %v1630_v33 }
 0x3c6   : > { %v843_v18 = vsel %vm586_vm2, %v840_v17, -inf }
 0x3c7   : > { %844 = vmax.xlane.f32.xlu1 %v843_v18 }
 0x3cb   : > { %v841_v19 = vpop.f32.mrf.mxu0 }
 0x3e0   : > { %683 = vrot.lane.b32.xlu1 %v682_v60, %s1456_s28 }
 0x40a   : > { %773 = vadd.xlane.f32.xlu1 %v772_v24 }
 0x43a   : > { %v845_v25 = vpop.xlane.xlu1 %844 }
 0x43b   : > { %v846_v26 = vsub.f32 %v840_v17, %v845_v25 }
 0x43d   : > { %v847_v27 = vmul.f32 1.442695, %v846_v26 }
 0x43f   : > { %1249 = vpow2.f32 %v847_v27 }
 0x440   : > { %1251 = vrcp.f32 %v676_v29 }
 0x445   : > { %v1250_v28 = vpop.eup %1249 }
 0x446   : > { %v849_v30 = vsel %vm586_vm2, %v1250_v28, 0.0  ;;  %v1252_v31 = vpop.eup %1251 }
 0x447   : > { %850 = vadd.xlane.f32.xlu2 %v849_v30  ;;  %v678_v33 = vmul.f32 %v1252_v31, %v1246_v8  ;;  %v902_v8 = vunpack.c.l.bf16 %v1606_v4 }
 0x449   : > { %v679_v37 = vpack.c.bf16 %v678_v33, %v678_v33 }
 0x452   : > { %v684_v34 = vpop.permute.xlu1 %683 }
 0x453   : > { %v689_v35 = vsel %vm621_vm3, %v684_v34, 0  ;;  %v1239_v34 = vld [vmem:[#allocation9] ss:$0 sm:$0xff] }
 0x454   : > { %698 = vmatpush.bf16.msrb.mxu2 %v689_v35 }
 0x457   : > { %1139 = vmatmul.msk.bf16.vlgmr.msrb.gmra.mxu2 %vm586_vm2, %v679_v37 }
 0x458   : > { %793 = vmatpush.bf16.msra.mxu2 %v784_v36  ;;  %v1240_v36 = vld [vmem:[#allocation11] ss:$0 sm:$0xff] }
 0x45c   : > { %890 = vmatpush.bf16.msrb.mxu2 %v881_v59 }
 0x45f   : > { %855 = vrot.lane.b32.xlu2 %v682_v60, %s1458_s23 }
 0x47d   : > { %v774_v38 = vpop.xlane.xlu1 %773 }
 0x47e   : > { %1253 = vrcp.f32 %v774_v38 }
 0x484   : > { %v1254_v39 = vpop.eup %1253 }
 0x485   : > { %v776_v40 = vmul.f32 %v1254_v39, %v1248_v23 }
 0x487   : > { %v777_v41 = vpack.c.bf16 %v776_v40, %v776_v40 }
 0x489   : > { %1143 = vmatmul.msk.bf16.vlgmr.msra.gmra.mxu2 %vm586_vm2, %v777_v41 }
 0x4ba   : > { %v851_v43 = vpop.xlane.xlu2 %850 }
 0x4bb   : > { %1255 = vrcp.f32 %v851_v43 }
 0x4bc   : > { %1257 = vrcp.f32 %v1459_v15 }
 0x4c1   : > { %v1256_v45 = vpop.eup %1255 }
 0x4c2   : > { %v853_v46 = vmul.f32 %v1256_v45, %v1250_v28  ;;  %v856_v47 = vpop.permute.xlu2 %855  ;;  %v1258_v16 = vpop.eup %1257 }
 0x4c3   : > { %v861_v48 = vsel %vm621_vm3, %v856_v47, 0  ;;  %v910_v17 = vmul.f32 32.0, %v1258_v16  ;;  %vm914_vm4 = vweird.f32 %v1258_v16 }
 0x4c4   : > { %v854_v49 = vpack.c.bf16 %v853_v46, %v853_v46  ;;  %870 = vmatpush.bf16.msrb.mxu1 %v861_v48 }
 0x4c5   : > { %v911_v18 = vsub.f32 1.0, %v910_v17 }
 0x4c7   : > { %1146 = vmatmul.msk.bf16.vlgmr.msrb.gmra.mxu1 %vm586_vm2, %v854_v49  ;;  %v912_v19 = vmul.f32 %v1258_v16, %v911_v18 }
 0x4c9   : > { %v913_v20 = vadd.f32 %v1258_v16, %v912_v19 }
 0x4da   : > { %v700_v50 = vpop.f32.mrf.mxu2 }
 0x4db   : > { %v704_v51 = vpack.c.bf16 %v700_v50, %v700_v50 }
 0x4dd   : > { %1140 = vmatmul.msk.bf16.vlgmr.msrb.gmra.mxu3 %vm586_vm2, %v704_v51 }
 0x4e2   : > { %v702_v52 = vpop.f32.mrf.mxu2 }
 0x50c   : > { %v795_v55 = vpop.f32.mrf.mxu2 }
 0x50d   : > { %v799_v56 = vpack.c.bf16 %v795_v55, %v795_v55 }
 0x50f   : > { %1144 = vmatmul.msk.bf16.vlgmr.msra.gmra.mxu3 %vm586_vm2, %v799_v56 }
 0x514   : > { %v797_v57 = vpop.f32.mrf.mxu2 }
 0x544   : > { %v872_v60 = vpop.f32.mrf.mxu1 }
 0x545   : > { %v876_v61 = vpack.c.bf16 %v872_v60, %v872_v60 }
 0x547   : > { %1147 = vmatmul.msk.bf16.vlgmr.msrb.gmra.mxu2 %vm586_vm2, %v876_v61 }
 0x54c   : > { %v874_v62 = vpop.f32.mrf.mxu1 }
 0x560   : > { %v720_v63 = vpop.f32.mrf.mxu3 }
 0x561   : > { %v740_v3 = vadd.f32 %v1650_v14, %v720_v63  ;;  %v915_v14 = vsel %vm914_vm4, %v1258_v16, %v913_v20 }
 0x568   : > { %v722_v0 = vpop.f32.mrf.mxu3 }
 0x592   : > { %v815_v1 = vpop.f32.mrf.mxu3 }
 0x593   : > { %v819_v5 = vadd.f32 %v815_v1, %v740_v3 }
 0x59a   : > { %v817_v2 = vpop.f32.mrf.mxu3 }
 0x5ca   : > { %v892_v7 = vpop.f32.mrf.mxu2 }
 0x5cb   : > { %v896_v9 = vadd.f32 %v892_v7, %v819_v5 }
 0x5cd   : > { %v901_v10 = vadd.f32 %v1238_v6, %v896_v9 }
 0x5cf   : > { %v903_v11 = vadd.f32 %v902_v8, %v901_v10 }
 0x5d1   : > { %v906_v12 = vsel %vm500_vm0, %v903_v11, 0.0 }
 0x5d2   : > { %907 = vadd.xlane.f32.xlu0 %v906_v12  ;;  %v894_v13 = vpop.f32.mrf.mxu2 }
 0x645   : > { %v908_v21 = vpop.xlane.xlu0 %907 }
 0x646   : > { %v916_v22 = vmul.f32 %v915_v14, %v908_v21 }
 0x648   : > { %v917_v23 = vsub.f32 %v903_v11, %v916_v22 }
 0x64a   : > { %v918_v4 = vmul.f32 %v917_v23, %v917_v23 }
 0x64c   : > { %v919_v24 = vsel %vm500_vm0, %v918_v4, 0.0 }
 0x64d   : > { %920 = vadd.xlane.f32.xlu1 %v919_v24 }
 0x6c0   : > { %v921_v25 = vpop.xlane.xlu1 %920 }
 0x6c1   : > { %v922_v26 = vmul.f32 %v921_v25, %v915_v14 }
 0x6c3   : > { %v923_v27 = vadd.f32 1e-05, %v922_v26 }
 0x6c5   : > { %1259 = vrsqrt.f32 %v923_v27  ;;  %vm930_vm6 = vweird.f32 %v923_v27 }
 0x6cb   : > { %v1260_v28 = vpop.eup %1259 }
 0x6cc   : > { %v925_v29 = vmul.f32 %v1260_v28, %v923_v27  ;;  %vm931_vm5 = vweird.f32 %v1260_v28 }
 0x6cd   : > { %vm932_vm7 = vmor %vm930_vm6, %vm931_vm5 }
 0x6ce   : > { %v926_v30 = vmul.f32 %v1260_v28, %v925_v29 }
 0x6d0   : > { %v927_v31 = vmul.f32 0.5, %v926_v30 }
 0x6d2   : > { %v928_v32 = vsub.f32 1.5, %v927_v31 }
 0x6d4   : > { %v929_v33 = vmul.f32 %v1260_v28, %v928_v32 }
 0x6d6   : > { %v933_v35 = vsel %vm932_vm7, %v1260_v28, %v929_v33 }
 0x6d7   : > { %v934_v37 = vmul.f32 %v933_v35, %v917_v23 }
 0x6d9   : > { %v938_v38 = vmul.f32 %v1239_v34, %v934_v37 }
 0x6db   : > { %v942_v39 = vadd.f32 %v1240_v36, %v938_v38 }
 0x6dd   : > { %v943_v40 = vpack.c.bf16 %v942_v39, %v942_v39 }
 0x6df   : > { %945 = vst.msk [vmem:[%s467_s20] sm:$0xf] %vm540_vm1, %v943_v40 }
 0x6e0 PF: > { %s22_s11 = sadd.s32 1, %s1445_s11   ;;  %s1701_s30 = smov %s1441_s10 }
 0x6e1   : > { %p19_p8 = scmp.ge.s32.totalorder %s22_s11, 4   ;;  %s1702_s10 = smov %s1704_s13 }
 0x6e3   :  { %21 = sbr.rel (!%p19_p8) target bundleno = 4 (0x4), region = 117 }
 0x6e8   :  { %971 = vsyncpa [#allocation5], 1 }
 0x6e9   :  { %973 = vsyncpa [#allocation5 + $0x1], 1 }
 0x6ea   :  { %974 = vsyncpa [#allocation7], 1 }
 0x6eb   :  { %975 = vsyncpa [#allocation10], 1 }

// kernel: detr_transformer.15
= control target key start
LH: loop header
LB: loop body
LE: loop exit
PB: predicated region body
PF: predicated region fallthrough
CT: control target
= control target key end

     0   :  { %s1825_s0 = inlined_call_operand.vmem [shape: bf16[2,8,32], index: 0, kind: input, shape index: {}]   ;;  %s1826_s1 = inlined_call_operand.vmem [shape: bf16[2,8,32], index: 1, kind: input, shape index: {}]   ;;  %s1827_s2 = inlined_call_operand.hbm [shape: bf16[32,32], index: 2, kind: input, shape index: {}]   ;;  %s1828_s3 = inlined_call_operand.vmem [shape: f32[1,32], index: 3, kind: input, shape index: {}]   ;;  %s1829_s4 = inlined_call_operand.hbm [shape: bf16[32,64], index: 4, kind: input, shape index: {}]   ;;  %s1830_s5 = inlined_call_operand.hbm [shape: f32[1,64], index: 5, kind: input, shape index: {}]   ;;  %s1831_s6 = inlined_call_operand.hbm [shape: bf16[32,32], index: 6, kind: input, shape index: {}]   ;;  %s1832_s7 = inlined_call_operand.hbm [shape: f32[1,32], index: 7, kind: input, shape index: {}]   ;;  %s1833_s8 = inlined_call_operand.hbm [shape: f32[1,32], index: 8, kind: input, shape index: {}]   ;;  %s1834_s9 = inlined_call_operand.hbm [shape: f32[1,32], index: 9, kind: input, shape index: {}]   ;;  %s1835_s10 = inlined_call_operand.vmem [shape: bf16[2,8,32], index: 10, kind: output, shape index: {}]  }
   0x1   :  { %1836 = sst [smem:[#allocation19_spill]] %s1827_s2 }
   0x2   :  { %1837 = sst [smem:[#allocation20_spill]] %s1829_s4 }
   0x3   :  { %15 = vsyncpa [#allocation5], 0 }
   0x4   :  { %16 = vsyncpa [#allocation7], 0 }
   0x5   :  { %17 = vsyncpa [#allocation10], 0 }
   0x6   :  { %18 = vsyncpa [#allocation13], 0  ;;  %s1648_s13 = smov 0   ;;  %s1650_s14 = smov 0  }
   0x7   :  { %s1652_s15 = smov 0  }
   0x8 LB: > { %s1143_s16 = sadd.s32 4294967295, %s1577_s15   ;;  %p1145_p0 = scmp.ge.s32.totalorder %s1577_s15, 1  ;;  %s1577_s15 = sphi %s1652_s15, %s24_s15   ;;  %s1573_s14 = sphi %s1650_s14, %s1844_s14   ;;  %s1569_s13 = sphi %s1648_s13, %s1843_s13  }
   0x9   : > { %p291_p1 = scmp.lt.s32.totalorder %s1577_s15, 3  ;;  %p1666_p2 = scmp.eq.s32.totalorder %s1143_s16, 0 }
   0xa   : > { %s1839_s4 = sld [smem:[#allocation20_spill]]  ;;  %s345_s24 = sshll.u32 %s1831_s6, 4  ;;  %s346_s24 = int_to_ptr.hbm [resolvable:$true] %s345_s24 }
   0xb   : > { %p1673_p3 = pnand %p1145_p0, %p291_p1  ;;  %s1579_s25 = smov [#allocation6]  }
   0xc   : > { %s321_s26 = sshll.u32 %s1579_s25, 4  ;;  %s1580_s28 = smov [#allocation9]   ;;  %s322_s26 = int_to_ptr.vmem [resolvable:$true] %s321_s26 }
   0xd   : > { %p1230_p4 = pneg %p1673_p3  ;;  %s347_s29 = sshll.u32 %s1580_s28, 4  ;;  %s348_s29 = int_to_ptr.vmem [resolvable:$true] %s347_s29 }
   0xe   : > { %s372_s12 = sshll.u32 %s1833_s8, 4  ;;  %s1581_s16 = smov 64   ;;  %s373_s12 = int_to_ptr.hbm [resolvable:$true] %s372_s12 }
   0xf   : > { %p1684_p5 = pnand %p1666_p2, %p1230_p4  ;;  %s1582_s18 = smov 4  }
  0x10   : > { %s319_s20 = sshll.u32 %s1839_s4, 4  ;;  %s1583_s19 = smov [#allocation12]   ;;  %s320_s20 = int_to_ptr.hbm [resolvable:$true] %s319_s20 }
  0x11   : > { %1236 = dma.hbm_to_vmem [thread:$0]  (!%p1684_p5), %s320_s20, 256, %s322_s26, [#allocation7], %s1581_s16, %s1581_s16, %s1582_s18  }
  0x12   : > { %1242 = dma.hbm_to_vmem [thread:$0]  (!%p1684_p5), %s346_s24, 256, %s348_s29, [#allocation10], %s1581_s16, %s1581_s16, %s1582_s18  }
  0x13   : > { %s374_s22 = sshll.u32 %s1583_s19, 4  ;;  %s36_s23 = sadd.s32 1, %s1573_s14  ;;  %s375_s22 = int_to_ptr.vmem [resolvable:$true] %s374_s22 }
  0x14   : > { %1248 = dma.hbm_to_vmem [thread:$0]  (!%p1684_p5), %s373_s12, 16, %s375_s22, [#allocation13]  }
  0x15   : > { %s1842_s2 = sld [smem:[#allocation19_spill]]  ;;  %p38_p6 = scmp.ge.s32.totalorder %s36_s23, 2 }
  0x16   : > { %s334_s20 = sshll.u32 %s1830_s5, 4  ;;  %s1584_s24 = smov [#allocation4]   ;;  %s335_s20 = int_to_ptr.hbm [resolvable:$true] %s334_s20 }
  0x17   : > { %s1846_s23 = smov (%p38_p6, %s36_s23), 0  ;;  %s304_s26 = sshll.u32 %s1584_s24, 4  ;;  %s305_s26 = int_to_ptr.vmem [resolvable:$true] %s304_s26 }
  0x18   : > { %s1585_s29 = smov [#allocation8]   ;;  %s360_s25 = sshll.u32 %s1832_s7, 4  ;;  %s361_s25 = int_to_ptr.hbm [resolvable:$true] %s360_s25 }
  0x19   : > { %s336_s12 = sshll.u32 %s1585_s29, 4  ;;  %s384_s11 = sshll.u32 %s1834_s9, 4  ;;  %s337_s12 = int_to_ptr.vmem [resolvable:$true] %s336_s12  ;;  %s385_s11 = int_to_ptr.hbm [resolvable:$true] %s384_s11 }
  0x1a   : > { %1239 = dma.hbm_to_vmem [thread:$0]  (!%p1684_p5), %s335_s20, 16, %s337_s12, [#allocation7]  }
  0x1b   : > { %s302_s30 = sshll.u32 %s1842_s2, 4  ;;  %s1586_s24 = smov [#allocation11]   ;;  %s303_s30 = int_to_ptr.hbm [resolvable:$true] %s302_s30 }
  0x1c   : > { %1233 = dma.hbm_to_vmem [thread:$0]  (!%p1684_p5), %s303_s30, 256, %s305_s26, [#allocation5], %s1581_s16, %s1581_s16, %s1582_s18  }
  0x1d   : > { %s362_s2 = sshll.u32 %s1586_s24, 4  ;;  %s1587_s16 = smov [#allocation14]   ;;  %s363_s2 = int_to_ptr.vmem [resolvable:$true] %s362_s2 }
  0x1e   : > { %1245 = dma.hbm_to_vmem [thread:$0]  (!%p1684_p5), %s361_s25, 16, %s363_s2, [#allocation10]  }
  0x1f   : > { %s386_s18 = sshll.u32 %s1587_s16, 4  ;;  %416 = sbr.rel (%p1673_p3) target bundleno = 1665 (0x681), region = 60  ;;  %s387_s18 = int_to_ptr.vmem [resolvable:$true] %s386_s18 }
  0x20   : > { %1251 = dma.hbm_to_vmem [thread:$0]  (!%p1684_p5), %s385_s11, 16, %s387_s18, [#allocation13]  }
  0x24   : > { %1552 = dma.done.wait (%p1666_p2), [#allocation5], 256  }
  0x25   : > { %1554 = vsyncadd (%p1666_p2), [#allocation5], 4294967040 }
  0x26   : > { %1556 = dma.done.wait (%p1666_p2), [#allocation7], 272  }
  0x27   : > { %1558 = vsyncadd (%p1666_p2), [#allocation7], 4294967024 }
  0x28   : > { %1560 = dma.done.wait (%p1666_p2), [#allocation10], 272  }
  0x29   : > { %1562 = vsyncadd (%p1666_p2), [#allocation10], 4294967024 }
  0x2a   : > { %1564 = dma.done.wait (%p1666_p2), [#allocation13], 32  }
  0x2b   : > { %1566 = vsyncadd (%p1666_p2), [#allocation13], 4294967264  ;;  %p493_p7 = scmp.lt.s32.totalorder %s1569_s13, 1  ;;  %v1199_v0 = vld [vmem:[#allocation6 + $0x8] sm:$0xff]  ;;  %v1201_v1 = vld [vmem:[#allocation4 + $0x8] sm:$0xff]  ;;  %vm537_vm0 = vcmask 261120  }
  0x2c   : > { %v1198_v2 = vld [vmem:[#allocation6] sm:$0xff]  ;;  %547 = vmatpush.bf16.msra.mxu0 %v1199_v0  ;;  %612 = vmatpush.bf16.msra.mxu2 %v1201_v1  ;;  %v1200_v3 = vld [vmem:[#allocation4] sm:$0xff]  ;;  %vm577_vm1 = vcmask 257024   ;;  %v1305_v11 = vld [vmem:[%s1828_s3] ss:$0 sm:$0xff]  ;;  %vm627_vm2 = vcmask 64512  }
  0x2d   : > { %s1848_s13 = smov (!%p493_p7, %s1569_s13), 1  ;;  %v1304_v6 = vld [vmem:[#allocation8] ss:$0 sm:$0xff]  ;;  %s1589_s19 = smov 120   ;;  %vm662_vm3 = vcmask 1043456  }
  0x2e   : > { %s1740_s2 = sshll.u32 %s1848_s13, 2  ;;  %s1588_s13 = smov 96   ;;  %v623_v40 = vld [vmem:[#allocation9] sm:$0xf] }
  0x2f   : > { %s496_s30 = scalar_lea.vmem %s1825_s0, %s1740_s2  ;;  %s503_s26 = scalar_lea.vmem %s1826_s1, %s1740_s2  ;;  %556 = vrot.lane.b32.xlu0 %v1199_v0, %s1588_s13  ;;  %v769_v41 = vsel %vm662_vm3, %v623_v40, 0 }
  0x30   : > { %548 = vmatpush.bf16.msra.mxu0 %v1198_v2  ;;  %613 = vmatpush.bf16.msra.mxu2 %v1200_v3  ;;  %v516_v4 = vld [vmem:[%s496_s30] sm:$0xf]  ;;  %s1590_s22 = smov 112   ;;  %s1591_s25 = smov 104  }
  0x31   : > { %v1750_v5 = vld [vmem:[%s503_s26] sm:$0xf]  ;;  %s510_s11 = scalar_lea.vmem %s1835_s10, %s1740_s2 }
  0x33   : > { %1173 = vmatmul.msk.bf16.vlgmr.msra.gmra.mxu0 %vm537_vm0, %v516_v4  ;;  %1183 = vmatmul.msk.bf16.vlgmr.msra.gmra.mxu2 %vm537_vm0, %v1750_v5 }
  0x37   : > { %554 = vrot.lane.b32.xlu0 %v1198_v2, %s1588_s13 }
  0xa1   : > { %v557_v9 = vpop.permute.xlu0 %556 }
  0xa2   : > { %569 = vmatpush.bf16.msra.mxu1 %v557_v9 }
  0xa9   : > { %v555_v16 = vpop.permute.xlu0 %554 }
  0xaa   : > { %570 = vmatpush.bf16.msra.mxu1 %v555_v16 }
  0xad   : > { %1174 = vmatmul.msk.bf16.vlgmr.msra.gmra.mxu1 %vm537_vm0, %v516_v4 }
  0xb0   : > { %v550_v7 = vpop.f32.mrf.mxu0 }
  0xb1   : > { %v551_v8 = vadd.f32 %v1304_v6, %v550_v7 }
  0xb3   : > { %v576_v10 = vpack.c.bf16 %v551_v8, %v551_v8 }
  0xb5   : > { %578 = vst.msk [vmem:[#allocation2] sm:$0xf] %vm577_vm1, %v576_v10 }
  0xb6   : > { %v615_v12 = vpop.f32.mrf.mxu2 }
  0xb7   : > { %v616_v13 = vadd.f32 %v1305_v11, %v615_v12 }
  0xb8   : > { %v552_v14 = vpop.f32.mrf.mxu0 }
  0xb9   : > { %v619_v15 = vmul.f32 0.35355338, %v616_v13 }
  0xbb   : > { %v620_v17 = vpack.c.bf16 %v619_v15, %v619_v15 }
  0xbc   : > { %v621_v18 = vld [vmem:[#allocation2] sm:$0xf] }
  0xbd   : > { %v681_v19 = vunpack.c.l.b16 %v620_v17  ;;  %v632_v20 = vsel %vm627_vm2, %v621_v18, 0  ;;  %v686_v23 = vunpack.c.l.b16 %v621_v18 }
  0xbe   : > { %v617_v21 = vpop.f32.mrf.mxu2  ;;  %641 = vmatpush.bf16.xpose.msra.mxu3 %v632_v20 }
  0xbf   : > { %v682_v22 = vpack.c.b16 %v681_v19, %v681_v19  ;;  %v687_v24 = vpack.c.b16 %v686_v23, %v686_v23 }
  0xc1   : > { %683 = vrot.lane.b32.xlu0 %v682_v22, %s1589_s19 }
  0xc5   : > { %1184 = vmatmul.msk.bf16.vlgmr.msra.gmra.mxu3 %vm627_vm2, %v620_v17 }
  0xc9   : > { %786 = vrot.lane.b32.xlu0 %v687_v24, %s1590_s22 }
  0xd1   : > { %784 = vrot.lane.b32.xlu0 %v682_v22, %s1590_s22 }
 0x12a   : > { %v572_v33 = vpop.f32.mrf.mxu1 }
 0x132   : > { %v574_v34 = vpop.f32.mrf.mxu1 }
 0x133   : > { %v684_v42 = vpop.permute.xlu0 %683 }
 0x13b   : > { %v787_v45 = vpop.permute.xlu0 %786 }
 0x13c   : > { %v792_v49 = vsel %vm627_vm2, %v787_v45, 0 }
 0x143   : > { %v785_v53 = vpop.permute.xlu0 %784 }
 0x148   : > { %v643_v25 = vpop.f32.mrf.mxu3 }
 0x149   : > { %v647_v26 = vsel %vm627_vm2, %v643_v25, -inf }
 0x14a   : > { %648 = vmax.xlane.f32.xlu1 %v647_v26 }
 0x150   : > { %v645_v27 = vpop.f32.mrf.mxu3 }
 0x163   : > { %560 = vrot.lane.b32.xlu1 %v1304_v6, %s1588_s13 }
 0x16b   : > { %861 = vrot.lane.b32.xlu1 %v682_v22, %s1591_s25 }
 0x1bd   : > { %v649_v28 = vpop.xlane.xlu1 %648 }
 0x1be   : > { %v650_v29 = vsub.f32 %v643_v25, %v649_v28 }
 0x1c0   : > { %v651_v30 = vmul.f32 1.442695, %v650_v29 }
 0x1c2   : > { %1309 = vpow2.f32 %v651_v30 }
 0x1c8   : > { %v1310_v31 = vpop.eup %1309 }
 0x1c9   : > { %v653_v32 = vsel %vm627_vm2, %v1310_v31, 0.0 }
 0x1ca   : > { %654 = vadd.xlane.f32.xlu2 %v653_v32 }
 0x1d5   : > { %v561_v35 = vpop.permute.xlu1 %560 }
 0x1d6   : > { %v573_v36 = vadd.f32 %v572_v33, %v561_v35  ;;  %v624_v35 = vld [vmem:[#allocation9 + $0x4] sm:$0xf] }
 0x1d8   : > { %v579_v37 = vpack.c.bf16 %v573_v36, %v573_v36  ;;  %v750_v36 = vsel %vm662_vm3, %v624_v35, 0 }
 0x1d9   : > { %759 = vmatpush.bf16.msrb.mxu3 %v750_v36 }
 0x1da   : > { %580 = vst.msk [vmem:[#allocation3] sm:$0xf] %vm577_vm1, %v579_v37  ;;  %v625_v37 = vld [vmem:[#allocation9 + $0x8] sm:$0xf] }
 0x1dd   : > { %v862_v60 = vpop.permute.xlu1 %861 }
 0x1e1   : > { %v622_v38 = vld [vmem:[#allocation3] sm:$0xf] }
 0x1e2   : > { %688 = vrot.lane.b32.xlu2 %v687_v24, %s1589_s19  ;;  %v664_v39 = vsel %vm662_vm3, %v622_v38, 0  ;;  %v722_v61 = vunpack.c.l.b16 %v622_v38  ;;  %v845_v38 = vsel %vm662_vm3, %v625_v37, 0 }
 0x1e3   : > { %673 = vmatpush.bf16.msrb.mxu0 %v664_v39  ;;  %854 = vmatpush.bf16.msra.mxu3 %v845_v38 }
 0x1e4   : > { %v723_v0 = vpack.c.b16 %v722_v61, %v722_v61 }
 0x1e7   : > { %778 = vmatpush.bf16.msra.mxu0 %v769_v41 }
 0x1ea   : > { %863 = vrot.lane.b32.xlu2 %v687_v24, %s1591_s25 }
 0x23d   : > { %v655_v43 = vpop.xlane.xlu2 %654 }
 0x23e   : > { %1311 = vrcp.f32 %v655_v43 }
 0x244   : > { %v1312_v44 = vpop.eup %1311 }
 0x245   : > { %v657_v46 = vmul.f32 %v1312_v44, %v1310_v31  ;;  %v689_v47 = vpop.permute.xlu2 %688 }
 0x246   : > { %v694_v48 = vsel %vm627_vm2, %v689_v47, 0 }
 0x247   : > { %703 = vmatpush.bf16.xpose.msrb.mxu1 %v694_v48  ;;  %v658_v50 = vpack.c.bf16 %v657_v46, %v657_v46 }
 0x249   : > { %1185 = vmatmul.msk.bf16.vlgmr.msrb.gmra.mxu0 %vm627_vm2, %v658_v50 }
 0x24d   : > { %v864_v51 = vpop.permute.xlu2 %863 }
 0x24e   : > { %v869_v52 = vsel %vm627_vm2, %v864_v51, 0  ;;  %1186 = vmatmul.msk.bf16.vlgmr.msrb.gmra.mxu1 %vm627_vm2, %v684_v42  ;;  %v626_v51 = vld [vmem:[#allocation9 + $0xc] sm:$0xf] }
 0x24f   : > { %801 = vmatpush.bf16.xpose.msra.mxu1 %v792_v49  ;;  %878 = vmatpush.bf16.xpose.msrb.mxu0 %v869_v52  ;;  %v922_v52 = vsel %vm662_vm3, %v626_v51, 0 }
 0x25e   : > { %1190 = vmatmul.msk.bf16.vlgmr.msra.gmra.mxu1 %vm627_vm2, %v785_v53 }
 0x2c6   : > { %v675_v54 = vpop.f32.mrf.mxu0 }
 0x2c7   : > { %v679_v55 = vpack.c.bf16 %v675_v54, %v675_v54 }
 0x2c9   : > { %1189 = vmatmul.msk.bf16.vlgmr.msra.gmra.mxu0 %vm627_vm2, %v679_v55 }
 0x2cb   : > { %v705_v56 = vpop.f32.mrf.mxu1 }
 0x2cc   : > { %v709_v57 = vsel %vm627_vm2, %v705_v56, -inf }
 0x2cd   : > { %710 = vmax.xlane.f32.xlu0 %v709_v57 }
 0x2ce   : > { %v677_v58 = vpop.f32.mrf.mxu0 }
 0x2d3   : > { %v707_v59 = vpop.f32.mrf.mxu1 }
 0x2d9   : > { %1193 = vmatmul.msk.bf16.vlgmr.msrb.gmra.mxu0 %vm627_vm2, %v862_v60 }
 0x2db   : > { %v803_v62 = vpop.f32.mrf.mxu1 }
 0x2dc   : > { %v807_v63 = vsel %vm627_vm2, %v803_v62, -inf }
 0x2dd   : > { %808 = vmax.xlane.f32.xlu2 %v807_v63 }
 0x2e1   : > { %724 = vrot.lane.b32.xlu0 %v723_v0, %s1589_s19 }
 0x2e3   : > { %v805_v1 = vpop.f32.mrf.mxu1 }
 0x340   : > { %v711_v2 = vpop.xlane.xlu0 %710 }
 0x341   : > { %v712_v3 = vsub.f32 %v705_v56, %v711_v2 }
 0x343   : > { %v713_v4 = vmul.f32 1.442695, %v712_v3 }
 0x345   : > { %1313 = vpow2.f32 %v713_v4 }
 0x346   : > { %v1787_v6 = vpop.f32.mrf.mxu0 }
 0x34b   : > { %v1314_v7 = vpop.eup %1313 }
 0x34c   : > { %v715_v8 = vsel %vm627_vm2, %v1314_v7, 0.0 }
 0x34d   : > { %716 = vadd.xlane.f32.xlu2 %v715_v8  ;;  %v1592_v8 = vmov 32.0  }
 0x34e   : > { %v782_v9 = vpop.f32.mrf.mxu0 }
 0x350   : > { %v809_v10 = vpop.xlane.xlu2 %808 }
 0x351   : > { %v810_v11 = vsub.f32 %v803_v62, %v809_v10  ;;  %v1306_v62 = vld [vmem:[#allocation11] ss:$0 sm:$0xff] }
 0x353   : > { %v811_v12 = vmul.f32 1.442695, %v810_v11  ;;  %v725_v13 = vpop.permute.xlu0 %724 }
 0x354   : > { %v730_v14 = vsel %vm662_vm3, %v725_v13, 0 }
 0x355   : > { %739 = vmatpush.bf16.msrb.mxu2 %v730_v14  ;;  %1315 = vpow2.f32 %v811_v12 }
 0x356   : > { %v880_v15 = vpop.f32.mrf.mxu0 }
 0x357   : > { %v884_v16 = vsel %vm627_vm2, %v880_v15, -inf }
 0x358   : > { %885 = vmax.xlane.f32.xlu1 %v884_v16 }
 0x35b   : > { %v1316_v17 = vpop.eup %1315 }
 0x35c   : > { %v813_v19 = vsel %vm627_vm2, %v1316_v17, 0.0 }
 0x35e   : > { %v882_v18 = vpop.f32.mrf.mxu0 }
 0x360   : > { %814 = vadd.xlane.f32.xlu1 %v813_v19 }
 0x365   : > { %819 = vrot.lane.b32.xlu2 %v723_v0, %s1590_s22 }
 0x3c0   : > { %v717_v20 = vpop.xlane.xlu2 %716 }
 0x3c1   : > { %1317 = vrcp.f32 %v717_v20 }
 0x3c7   : > { %v1318_v21 = vpop.eup %1317 }
 0x3c8   : > { %v719_v22 = vmul.f32 %v1318_v21, %v1314_v7  ;;  %v820_v23 = vpop.permute.xlu2 %819 }
 0x3c9   : > { %v825_v24 = vsel %vm662_vm3, %v820_v23, 0 }
 0x3ca   : > { %834 = vmatpush.bf16.msra.mxu2 %v825_v24  ;;  %v720_v25 = vpack.c.bf16 %v719_v22, %v719_v22 }
 0x3cb   : > { %v886_v26 = vpop.xlane.xlu1 %885 }
 0x3cc   : > { %v887_v27 = vsub.f32 %v880_v15, %v886_v26  ;;  %1187 = vmatmul.msk.bf16.vlgmr.msrb.gmra.mxu2 %vm627_vm2, %v720_v25 }
 0x3ce   : > { %v888_v28 = vmul.f32 1.442695, %v887_v27  ;;  %931 = vmatpush.bf16.msrb.mxu2 %v922_v52  ;;  %v1307_v27 = vld [vmem:[#allocation12] ss:$0 sm:$0xff] }
 0x3d0   : > { %1319 = vpow2.f32 %v888_v28 }
 0x3d3   : > { %v815_v29 = vpop.xlane.xlu1 %814 }
 0x3d4   : > { %1321 = vrcp.f32 %v815_v29  ;;  %v1308_v29 = vld [vmem:[#allocation14] ss:$0 sm:$0xff] }
 0x3d6   : > { %v1320_v30 = vpop.eup %1319 }
 0x3d7   : > { %v890_v31 = vsel %vm627_vm2, %v1320_v30, 0.0 }
 0x3d8   : > { %891 = vadd.xlane.f32.xlu1 %v890_v31 }
 0x3da   : > { %v1322_v32 = vpop.eup %1321 }
 0x3db   : > { %v817_v33 = vmul.f32 %v1322_v32, %v1316_v17 }
 0x3dd   : > { %v818_v34 = vpack.c.bf16 %v817_v33, %v817_v33 }
 0x3df   : > { %1191 = vmatmul.msk.bf16.vlgmr.msra.gmra.mxu2 %vm627_vm2, %v818_v34 }
 0x3f1   : > { %896 = vrot.lane.b32.xlu1 %v723_v0, %s1591_s25  ;;  %v943_v0 = vunpack.c.l.bf16 %v1750_v5 }
 0x44b   : > { %v892_v41 = vpop.xlane.xlu1 %891 }
 0x44c   : > { %1323 = vrcp.f32 %v892_v41 }
 0x44d   : > { %1325 = vrcp.f32 %v1592_v8 }
 0x44f   : > { %v741_v39 = vpop.f32.mrf.mxu2 }
 0x450   : > { %v745_v40 = vpack.c.bf16 %v741_v39, %v741_v39 }
 0x452   : > { %1188 = vmatmul.msk.bf16.vlgmr.msrb.gmra.mxu3 %vm627_vm2, %v745_v40  ;;  %v1324_v43 = vpop.eup %1323 }
 0x453   : > { %v894_v44 = vmul.f32 %v1324_v43, %v1320_v30 }
 0x455   : > { %v895_v49 = vpack.c.bf16 %v894_v44, %v894_v44 }
 0x457   : > { %v743_v42 = vpop.f32.mrf.mxu2 }
 0x462   : > { %v836_v45 = vpop.f32.mrf.mxu2 }
 0x463   : > { %v840_v46 = vpack.c.bf16 %v836_v45, %v836_v45  ;;  %v897_v47 = vpop.permute.xlu1 %896 }
 0x464   : > { %v902_v48 = vsel %vm662_vm3, %v897_v47, 0 }
 0x465   : > { %1192 = vmatmul.msk.bf16.vlgmr.msra.gmra.mxu3 %vm627_vm2, %v840_v46  ;;  %911 = vmatpush.bf16.msrb.mxu1 %v902_v48 }
 0x468   : > { %1194 = vmatmul.msk.bf16.vlgmr.msrb.gmra.mxu1 %vm627_vm2, %v895_v49 }
 0x46a   : > { %v838_v50 = vpop.f32.mrf.mxu2 }
 0x4d5   : > { %v761_v53 = vpop.f32.mrf.mxu3 }
 0x4d6   : > { %v781_v57 = vadd.f32 %v1787_v6, %v761_v53  ;;  %v1326_v6 = vpop.eup %1325 }
 0x4d7   : > { %v951_v9 = vmul.f32 32.0, %v1326_v6  ;;  %vm955_vm4 = vweird.f32 %v1326_v6 }
 0x4d9   : > { %v952_v10 = vsub.f32 1.0, %v951_v9 }
 0x4db   : > { %v953_v11 = vmul.f32 %v1326_v6, %v952_v10 }
 0x4dd   : > { %v763_v54 = vpop.f32.mrf.mxu3  ;;  %v954_v12 = vadd.f32 %v1326_v6, %v953_v11 }
 0x4df   : > { %v956_v13 = vsel %vm955_vm4, %v1326_v6, %v954_v12 }
 0x4e5   : > { %v913_v55 = vpop.f32.mrf.mxu1 }
 0x4e6   : > { %v917_v56 = vpack.c.bf16 %v913_v55, %v913_v55 }
 0x4e8   : > { %v856_v58 = vpop.f32.mrf.mxu3  ;;  %1195 = vmatmul.msk.bf16.vlgmr.msrb.gmra.mxu2 %vm627_vm2, %v917_v56 }
 0x4e9   : > { %v860_v59 = vadd.f32 %v856_v58, %v781_v57 }
 0x4ed   : > { %v915_v60 = vpop.f32.mrf.mxu1 }
 0x4f0   : > { %v858_v61 = vpop.f32.mrf.mxu3 }
 0x56b   : > { %v933_v63 = vpop.f32.mrf.mxu2 }
 0x56c   : > { %v937_v1 = vadd.f32 %v933_v63, %v860_v59 }
 0x56e   : > { %v942_v2 = vadd.f32 %v1306_v62, %v937_v1 }
 0x570   : > { %v944_v3 = vadd.f32 %v943_v0, %v942_v2 }
 0x572   : > { %v947_v4 = vsel %vm537_vm0, %v944_v3, 0.0 }
 0x573   : > { %v935_v7 = vpop.f32.mrf.mxu2  ;;  %948 = vadd.xlane.f32.xlu0 %v947_v4 }
 0x5e6   : > { %v949_v14 = vpop.xlane.xlu0 %948 }
 0x5e7   : > { %v957_v15 = vmul.f32 %v956_v13, %v949_v14 }
 0x5e9   : > { %v958_v16 = vsub.f32 %v944_v3, %v957_v15 }
 0x5eb   : > { %v959_v5 = vmul.f32 %v958_v16, %v958_v16 }
 0x5ed   : > { %v960_v17 = vsel %vm537_vm0, %v959_v5, 0.0 }
 0x5ee   : > { %961 = vadd.xlane.f32.xlu2 %v960_v17 }
 0x661   : > { %v962_v18 = vpop.xlane.xlu2 %961 }
 0x662   : > { %v963_v19 = vmul.f32 %v962_v18, %v956_v13 }
 0x664   : > { %v964_v20 = vadd.f32 1e-05, %v963_v19 }
 0x666   : > { %1327 = vrsqrt.f32 %v964_v20  ;;  %vm971_vm6 = vweird.f32 %v964_v20 }
 0x66c   : > { %v1328_v21 = vpop.eup %1327 }
 0x66d   : > { %v966_v22 = vmul.f32 %v1328_v21, %v964_v20  ;;  %vm972_vm5 = vweird.f32 %v1328_v21 }
 0x66e   : > { %vm973_vm7 = vmor %vm971_vm6, %vm972_vm5 }
 0x66f   : > { %v967_v23 = vmul.f32 %v1328_v21, %v966_v22 }
 0x671   : > { %v968_v24 = vmul.f32 0.5, %v967_v23 }
 0x673   : > { %v969_v25 = vsub.f32 1.5, %v968_v24 }
 0x675   : > { %v970_v26 = vmul.f32 %v1328_v21, %v969_v25 }
 0x677   : > { %v974_v28 = vsel %vm973_vm7, %v1328_v21, %v970_v26 }
 0x678   : > { %v975_v30 = vmul.f32 %v974_v28, %v958_v16 }
 0x67a   : > { %v979_v31 = vmul.f32 %v1307_v27, %v975_v30 }
 0x67c   : > { %v983_v32 = vadd.f32 %v1308_v29, %v979_v31 }
 0x67e   : > { %v984_v33 = vpack.c.bf16 %v983_v32, %v983_v32 }
 0x680   : > { %986 = vst.msk [vmem:[%s510_s11] sm:$0xf] %vm577_vm1, %v984_v33 }
 0x681 PF: > { %s24_s15 = sadd.s32 1, %s1577_s15   ;;  %s1843_s13 = smov %s1573_s14 }
 0x682   : > { %p21_p8 = scmp.ge.s32.totalorder %s24_s15, 4   ;;  %s1844_s14 = smov %s1846_s23 }
 0x684   :  { %23 = sbr.rel (!%p21_p8) target bundleno = 8 (0x8), region = 126 }
 0x689   :  { %1012 = vsyncpa [#allocation5], 1 }
 0x68a   :  { %1014 = vsyncpa [#allocation5 + $0x1], 1 }
 0x68b   :  { %1015 = vsyncpa [#allocation7], 1 }
 0x68c   :  { %1016 = vsyncpa [#allocation10], 1 }
 0x68d   :  { %1017 = vsyncpa [#allocation13], 1 }

</bundles_post_ra>
